<compile_context>
chip_gen: v5e
topology: v5e:2x2
jax: 0.10.0
libtpu: 0.0.40
codegen_flags: <defaults>
</compile_context>

<pallas_src>
import functools

import jax
import jax.numpy as jnp
from jax.experimental import pallas as pl
from jax.experimental.pallas import tpu as pltpu


_VMEM_LIMIT = 32 * 1024 * 1024  # explicit; safe on v5e/v6e/v7x, working sets tiny


# ---------------------------------------------------------------------------
# Pallas kernels
# ---------------------------------------------------------------------------

def _conv_pool_relu_kernel(p_ref, w_ref, b_ref, o_ref):
    """Fused conv(3x3) + bias + MaxPool2d(2,2) + ReLU for one image.

    p_ref: (1, 4, R, K) bf16 im2col patches, quadrant-major: quadrant q=(i*2+j)
           holds the patch rows of output pixels (2*ho+i, 2*wo+j) in (ho, wo)
           row-major order (R = H/2 * W/2, K = 9*Cin).
    w_ref: (K, Cout) bf16 resident weight.   b_ref: (1, Cout) f32 bias.
    o_ref: (1, R, Cout) bf16 pooled+ReLU'd output rows in (ho, wo) order.

    max-pool == elementwise max over the 4 quadrant matmul results; bias and
    ReLU commute with the max, so they are applied once after it.
    """
    w = w_ref[...]
    m = jnp.dot(p_ref[0, 0], w, preferred_element_type=jnp.float32)
    for q in range(1, 4):
        y = jnp.dot(p_ref[0, q], w, preferred_element_type=jnp.float32)
        m = jnp.maximum(m, y)
    m = m + b_ref[...]
    o_ref[0] = jnp.maximum(m, 0.0).astype(o_ref.dtype)


def _mlp_kernel(f_ref, w1_ref, b1_ref, w2_ref, b2_ref, o_ref):
    """Fused fc1 + bias + ReLU + fc2 + bias, full batch in one block.

    f_ref: (B, 4096) bf16, w1: (4096,128) bf16, w2: (128,10) bf16,
    biases f32, o_ref: (B, 10) f32.
    """
    h = jnp.dot(f_ref[...], w1_ref[...], preferred_element_type=jnp.float32)
    h = jnp.maximum(h + b1_ref[...], 0.0).astype(jnp.bfloat16)
    o = jnp.dot(h, w2_ref[...], preferred_element_type=jnp.float32)
    o_ref[...] = o + b2_ref[...]


# ---------------------------------------------------------------------------
# pallas_call wrappers
# ---------------------------------------------------------------------------

def conv_pool_relu(patches, w_mat, bias):
    """patches: (B, 4, R, K) bf16 -> (B, R, Cout) bf16 pooled+ReLU'd rows."""
    B, Q, R, K = patches.shape
    Kw, N = w_mat.shape
    assert Q == 4 and K == Kw, (patches.shape, w_mat.shape)
    return pl.pallas_call(
        _conv_pool_relu_kernel,
        out_shape=jax.ShapeDtypeStruct((B, R, N), jnp.bfloat16),
        grid_spec=pltpu.PrefetchScalarGridSpec(
            num_scalar_prefetch=0,
            grid=(B,),
            in_specs=[
                pl.BlockSpec((1, Q, R, K), lambda b: (b, 0, 0, 0)),  # full-extent minors
                pl.BlockSpec((Kw, N), lambda b: (0, 0)),             # weight resident
                pl.BlockSpec((1, N), lambda b: (0, 0)),
            ],
            out_specs=pl.BlockSpec((1, R, N), lambda b: (b, 0, 0)),
        ),
        compiler_params=pltpu.CompilerParams(
            dimension_semantics=("parallel",),   # batch=2 -> both v7x TCs
            vmem_limit_bytes=_VMEM_LIMIT,
        ),
    )(patches, w_mat, bias)


def mlp_head(feat, fc1, fc2):
    """feat: (B, 4096) bf16 -> logits (B, 10) f32.  fc1+ReLU+fc2 in one kernel."""
    w1, b1 = fc1
    w2, b2 = fc2
    B, K1 = feat.shape
    _, N1 = w1.shape
    _, N2 = w2.shape
    return pl.pallas_call(
        _mlp_kernel,
        out_shape=jax.ShapeDtypeStruct((B, N2), jnp.float32),
        grid_spec=pltpu.PrefetchScalarGridSpec(
            num_scalar_prefetch=0,
            grid=(1,),
            in_specs=[
                pl.BlockSpec((B, K1), lambda i: (0, 0)),   # M = B = 2, no padding
                pl.BlockSpec((K1, N1), lambda i: (0, 0)),
                pl.BlockSpec((1, N1), lambda i: (0, 0)),
                pl.BlockSpec((N1, N2), lambda i: (0, 0)),
                pl.BlockSpec((1, N2), lambda i: (0, 0)),
            ],
            out_specs=pl.BlockSpec((B, N2), lambda i: (0, 0)),
        ),
        compiler_params=pltpu.CompilerParams(
            dimension_semantics=("arbitrary",),
            vmem_limit_bytes=_VMEM_LIMIT,
        ),
    )(feat, w1, b1, w2, b2)


def im2col_quadrants(x):
    """x: (B,H,W,C) NHWC bf16 -> (B, 4, H/2*W/2, 9*C) bf16 im2col patches for a
    3x3 / pad=1 conv, with rows grouped by MaxPool2d(2,2) quadrant.

    Quadrant q = 2*i + j holds the patch rows of conv-output pixels
    (h=2*ho+i, w=2*wo+j), rows in (ho, wo) row-major order. Tap order is
    (dy, dx) major, channel minor, matching weights reshaped from
    (3,3,Cin,Cout) to (9*Cin, Cout).
    """
    B, H, W, C = x.shape
    xp = jnp.pad(x, ((0, 0), (1, 1), (1, 1), (0, 0)))
    cols = [xp[:, dy:dy + H, dx:dx + W, :] for dy in range(3) for dx in range(3)]
    p = jnp.concatenate(cols, axis=-1)                       # (B, H, W, 9C)
    p = p.reshape(B, H // 2, 2, W // 2, 2, 9 * C)            # (b, ho, i, wo, j, k)
    p = jnp.transpose(p, (0, 2, 4, 1, 3, 5))                 # (b, i, j, ho, wo, k)
    return p.reshape(B, 4, (H // 2) * (W // 2), 9 * C)


# ---------------------------------------------------------------------------
# Model: parameters + forward (matches SVHNModel)
# ---------------------------------------------------------------------------

_NUM_CLASSES = 10
_C1_IN, _C1_OUT = 3, 32
_C2_IN, _C2_OUT = 32, 64
_POOLED_HW = 8
_FC1_IN, _FC1_OUT = _C2_OUT * _POOLED_HW * _POOLED_HW, 128   # 64*8*8 -> 128


def init_params(key):
    """Parameters in PyTorch layout (Conv2d: OIHW, Linear: (out, in))."""
    k = jax.random.split(key, 8)
    return {
        "conv1_w": jax.random.normal(k[0], (_C1_OUT, _C1_IN, 3, 3), jnp.float32) * 0.05,
        "conv1_b": jax.random.normal(k[1], (_C1_OUT,), jnp.float32) * 0.05,
        "conv2_w": jax.random.normal(k[2], (_C2_OUT, _C2_IN, 3, 3), jnp.float32) * 0.05,
        "conv2_b": jax.random.normal(k[3], (_C2_OUT,), jnp.float32) * 0.05,
        "fc1_w": jax.random.normal(k[4], (_FC1_OUT, _FC1_IN), jnp.float32) * 0.02,
        "fc1_b": jax.random.normal(k[5], (_FC1_OUT,), jnp.float32) * 0.02,
        "fc2_w": jax.random.normal(k[6], (_NUM_CLASSES, _FC1_OUT), jnp.float32) * 0.02,
        "fc2_b": jax.random.normal(k[7], (_NUM_CLASSES,), jnp.float32) * 0.02,
    }


def preprocess_params(p):
    """One-time conversion of PyTorch-layout params into kernel layout.

    conv (Cout,Cin,3,3) -> (9*Cin, Cout) bf16; Linear (out,in) -> (in,out) bf16.
    fc1 is permuted from NCHW-flatten to NHWC-flatten order so that flattening
    the NHWC feature map reproduces torch's x.view(B, -1).
    """
    def conv_mat(w):
        cout, cin = w.shape[0], w.shape[1]
        return jnp.transpose(w, (2, 3, 1, 0)).reshape(9 * cin, cout).astype(jnp.bfloat16)

    fc1_w = p["fc1_w"].reshape(_FC1_OUT, _C2_OUT, _POOLED_HW, _POOLED_HW)   # (out,C,H,W)
    fc1_w = jnp.transpose(fc1_w, (0, 2, 3, 1)).reshape(_FC1_OUT, _FC1_IN)   # (out,H*W*C)
    return {
        "conv1": (conv_mat(p["conv1_w"]), p["conv1_b"].reshape(1, -1).astype(jnp.float32)),
        "conv2": (conv_mat(p["conv2_w"]), p["conv2_b"].reshape(1, -1).astype(jnp.float32)),
        "fc1": (fc1_w.T.astype(jnp.bfloat16), p["fc1_b"].reshape(1, -1).astype(jnp.float32)),
        "fc2": (p["fc2_w"].T.astype(jnp.bfloat16), p["fc2_b"].reshape(1, -1).astype(jnp.float32)),
    }


def svhn_forward(x_nchw, kp):
    """Matches SVHNModel.forward. Input x_nchw: (B, 3, 32, 32) float32."""
    B = x_nchw.shape[0]
    x = jnp.transpose(x_nchw, (0, 2, 3, 1)).astype(jnp.bfloat16)        # NHWC bf16

    # stage 1: conv1 + bias + maxpool(2,2) + relu  (one fused kernel)
    p1 = im2col_quadrants(x)                                  # (B, 4, 256, 27)
    x1 = conv_pool_relu(p1, *kp["conv1"])                     # (B, 256, 32) bf16
    x1 = x1.reshape(B, 16, 16, _C1_OUT)                       # free: rows are (ho,wo)

    # stage 2: conv2 + bias + maxpool(2,2) + relu  (one fused kernel)
    p2 = im2col_quadrants(x1)                                 # (B, 4, 64, 288)
    x2 = conv_pool_relu(p2, *kp["conv2"])                     # (B, 64, 64) bf16

    # stage 3: flatten (NHWC order; fc1 weight pre-permuted to match) + fc1+relu+fc2
    feat = x2.reshape(B, _FC1_IN)                             # (B, 4096) bf16, free
    return mlp_head(feat, kp["fc1"], kp["fc2"])               # (B, 10) f32


# ---------------------------------------------------------------------------
# Main
# ---------------------------------------------------------------------------

if __name__ == "__main__":
    key = jax.random.PRNGKey(0)
    k_params, k_x = jax.random.split(key)
    params = preprocess_params(init_params(k_params))   # weight prep hoisted out of fwd
    # SVHN is 32x32 RGB; spatial 32 is required by the 64*8*8 classifier input.
    x = jax.random.normal(k_x, (2, 3, 32, 32), jnp.float32)

    fwd = jax.jit(svhn_forward)
    logits = jax.block_until_ready(fwd(x, params))

    assert logits.shape == (2, _NUM_CLASSES), logits.shape
    assert bool(jnp.all(jnp.isfinite(logits))), "non-finite output"
    print("KERNEL_OK")
</pallas_src>

<mosaic_0001>
module attributes {stable_mosaic.version = 11 : i64} {
  func.func @_conv_pool_relu_kernel(%arg0: i32, %arg1: memref<1x4x256x27xbf16, #tpu.memory_space<vmem>>, %arg2: memref<27x32xbf16, #tpu.memory_space<vmem>>, %arg3: memref<1x32xf32, #tpu.memory_space<vmem>>, %arg4: memref<1x256x32xbf16, #tpu.memory_space<vmem>>) attributes {dimension_semantics = [#tpu.dimension_semantics<parallel>], iteration_bounds = array<i64: 2>, scalar_prefetch = 0 : i64, scratch_operands = 0 : i64, tpu.core_type = #tpu.core_type<tc>, window_params = [{transform_indices = @transform_0, window_bounds = array<i64: 1, 4, 256, 27>}, {pipeline_mode = #tpu.pipeline_mode<synchronous>, transform_indices = @transform_1, window_bounds = array<i64: 27, 32>}, {pipeline_mode = #tpu.pipeline_mode<synchronous>, transform_indices = @transform_2, window_bounds = array<i64: 1, 32>}, {transform_indices = @transform_3, window_bounds = array<i64: 1, 256, 32>}]} {
    %c0 = arith.constant 0 : index
    %c0_0 = arith.constant 0 : index
    %0 = vector.load %arg2[%c0, %c0_0] : memref<27x32xbf16, #tpu.memory_space<vmem>>, vector<27x32xbf16>
    %c0_1 = arith.constant 0 : index
    %c0_2 = arith.constant 0 : index
    %c0_3 = arith.constant 0 : index
    %c0_4 = arith.constant 0 : index
    %1 = vector.load %arg1[%c0_1, %c0_2, %c0_3, %c0_4] : memref<1x4x256x27xbf16, #tpu.memory_space<vmem>>, vector<1x1x256x27xbf16>
    %2 = vector.shape_cast %1 : vector<1x1x256x27xbf16> to vector<256x27xbf16>
    %cst = arith.constant dense<0.000000e+00> : vector<256x32xf32>
    %3 = tpu.matmul %2, %0, %cst {dimension_numbers = #tpu.dot_dimension_numbers<[1], [0], [0], [1], [0, 0, 1, 1], [], []>} : vector<256x27xbf16>, vector<27x32xbf16>, vector<256x32xf32> -> vector<256x32xf32>
    %c0_5 = arith.constant 0 : index
    %c1 = arith.constant 1 : index
    %c0_6 = arith.constant 0 : index
    %c0_7 = arith.constant 0 : index
    %4 = vector.load %arg1[%c0_5, %c1, %c0_6, %c0_7] : memref<1x4x256x27xbf16, #tpu.memory_space<vmem>>, vector<1x1x256x27xbf16>
    %5 = vector.shape_cast %4 : vector<1x1x256x27xbf16> to vector<256x27xbf16>
    %cst_8 = arith.constant dense<0.000000e+00> : vector<256x32xf32>
    %6 = tpu.matmul %5, %0, %cst_8 {dimension_numbers = #tpu.dot_dimension_numbers<[1], [0], [0], [1], [0, 0, 1, 1], [], []>} : vector<256x27xbf16>, vector<27x32xbf16>, vector<256x32xf32> -> vector<256x32xf32>
    %7 = arith.maximumf %3, %6 : vector<256x32xf32>
    %c0_9 = arith.constant 0 : index
    %c2 = arith.constant 2 : index
    %c0_10 = arith.constant 0 : index
    %c0_11 = arith.constant 0 : index
    %8 = vector.load %arg1[%c0_9, %c2, %c0_10, %c0_11] : memref<1x4x256x27xbf16, #tpu.memory_space<vmem>>, vector<1x1x256x27xbf16>
    %9 = vector.shape_cast %8 : vector<1x1x256x27xbf16> to vector<256x27xbf16>
    %cst_12 = arith.constant dense<0.000000e+00> : vector<256x32xf32>
    %10 = tpu.matmul %9, %0, %cst_12 {dimension_numbers = #tpu.dot_dimension_numbers<[1], [0], [0], [1], [0, 0, 1, 1], [], []>} : vector<256x27xbf16>, vector<27x32xbf16>, vector<256x32xf32> -> vector<256x32xf32>
    %11 = arith.maximumf %7, %10 : vector<256x32xf32>
    %c0_13 = arith.constant 0 : index
    %c3 = arith.constant 3 : index
    %c0_14 = arith.constant 0 : index
    %c0_15 = arith.constant 0 : index
    %12 = vector.load %arg1[%c0_13, %c3, %c0_14, %c0_15] : memref<1x4x256x27xbf16, #tpu.memory_space<vmem>>, vector<1x1x256x27xbf16>
    %13 = vector.shape_cast %12 : vector<1x1x256x27xbf16> to vector<256x27xbf16>
    %cst_16 = arith.constant dense<0.000000e+00> : vector<256x32xf32>
    %14 = tpu.matmul %13, %0, %cst_16 {dimension_numbers = #tpu.dot_dimension_numbers<[1], [0], [0], [1], [0, 0, 1, 1], [], []>} : vector<256x27xbf16>, vector<27x32xbf16>, vector<256x32xf32> -> vector<256x32xf32>
    %15 = arith.maximumf %11, %14 : vector<256x32xf32>
    %c0_17 = arith.constant 0 : index
    %c0_18 = arith.constant 0 : index
    %16 = vector.load %arg3[%c0_17, %c0_18] : memref<1x32xf32, #tpu.memory_space<vmem>>, vector<1x32xf32>
    %17 = vector.broadcast %16 : vector<1x32xf32> to vector<256x32xf32>
    %18 = arith.addf %15, %17 : vector<256x32xf32>
    %cst_19 = arith.constant 0.000000e+00 : f32
    %19 = vector.broadcast %cst_19 : f32 to vector<256x32xf32>
    %20 = arith.maximumf %18, %19 : vector<256x32xf32>
    %21 = arith.truncf %20 : vector<256x32xf32> to vector<256x32xbf16>
    %c0_20 = arith.constant 0 : index
    %c0_21 = arith.constant 0 : index
    %c0_22 = arith.constant 0 : index
    %22 = vector.load %arg4[%c0_20, %c0_21, %c0_22] : memref<1x256x32xbf16, #tpu.memory_space<vmem>>, vector<1x256x32xbf16>
    %23 = vector.shape_cast %22 : vector<1x256x32xbf16> to vector<256x32xbf16>
    %24 = vector.shape_cast %21 : vector<256x32xbf16> to vector<1x256x32xbf16>
    tpu.vector_store %arg4[%c0_20, %c0_21, %c0_22], %24 {strides = array<i32>} : memref<1x256x32xbf16, #tpu.memory_space<vmem>>, vector<1x256x32xbf16>,
    return
  }
  func.func @transform_0(%arg0: i32) -> (i32, i32, i32, i32) {
    %c0_i32 = arith.constant 0 : i32
    %c0_i32_0 = arith.constant 0 : i32
    %c0_i32_1 = arith.constant 0 : i32
    %c0_i32_2 = arith.constant 0 : i32
    return %arg0, %c0_i32, %c0_i32_0, %c0_i32_1 : i32, i32, i32, i32
  }
  func.func @transform_1(%arg0: i32) -> (i32, i32) {
    %c0_i32 = arith.constant 0 : i32
    %c0_i32_0 = arith.constant 0 : i32
    %c0_i32_1 = arith.constant 0 : i32
    return %c0_i32, %c0_i32_0 : i32, i32
  }
  func.func @transform_2(%arg0: i32) -> (i32, i32) {
    %c0_i32 = arith.constant 0 : i32
    %c0_i32_0 = arith.constant 0 : i32
    %c0_i32_1 = arith.constant 0 : i32
    return %c0_i32, %c0_i32_0 : i32, i32
  }
  func.func @transform_3(%arg0: i32) -> (i32, i32, i32) {
    %c0_i32 = arith.constant 0 : i32
    %c0_i32_0 = arith.constant 0 : i32
    %c0_i32_1 = arith.constant 0 : i32
    return %arg0, %c0_i32, %c0_i32_0 : i32, i32, i32
  }
}

module attributes {stable_mosaic.version = 11 : i64} {
  func.func @_conv_pool_relu_kernel(%arg0: i32, %arg1: memref<1x4x64x288xbf16, #tpu.memory_space<vmem>>, %arg2: memref<288x64xbf16, #tpu.memory_space<vmem>>, %arg3: memref<1x64xf32, #tpu.memory_space<vmem>>, %arg4: memref<1x64x64xbf16, #tpu.memory_space<vmem>>) attributes {dimension_semantics = [#tpu.dimension_semantics<parallel>], iteration_bounds = array<i64: 2>, scalar_prefetch = 0 : i64, scratch_operands = 0 : i64, tpu.core_type = #tpu.core_type<tc>, window_params = [{transform_indices = @transform_0, window_bounds = array<i64: 1, 4, 64, 288>}, {pipeline_mode = #tpu.pipeline_mode<synchronous>, transform_indices = @transform_1, window_bounds = array<i64: 288, 64>}, {pipeline_mode = #tpu.pipeline_mode<synchronous>, transform_indices = @transform_2, window_bounds = array<i64: 1, 64>}, {transform_indices = @transform_3, window_bounds = array<i64: 1, 64, 64>}]} {
    %c0 = arith.constant 0 : index
    %c0_0 = arith.constant 0 : index
    %0 = vector.load %arg2[%c0, %c0_0] : memref<288x64xbf16, #tpu.memory_space<vmem>>, vector<288x64xbf16>
    %c0_1 = arith.constant 0 : index
    %c0_2 = arith.constant 0 : index
    %c0_3 = arith.constant 0 : index
    %c0_4 = arith.constant 0 : index
    %1 = vector.load %arg1[%c0_1, %c0_2, %c0_3, %c0_4] : memref<1x4x64x288xbf16, #tpu.memory_space<vmem>>, vector<1x1x64x288xbf16>
    %2 = vector.shape_cast %1 : vector<1x1x64x288xbf16> to vector<64x288xbf16>
    %cst = arith.constant dense<0.000000e+00> : vector<64x64xf32>
    %3 = tpu.matmul %2, %0, %cst {dimension_numbers = #tpu.dot_dimension_numbers<[1], [0], [0], [1], [0, 0, 1, 1], [], []>} : vector<64x288xbf16>, vector<288x64xbf16>, vector<64x64xf32> -> vector<64x64xf32>
    %c0_5 = arith.constant 0 : index
    %c1 = arith.constant 1 : index
    %c0_6 = arith.constant 0 : index
    %c0_7 = arith.constant 0 : index
    %4 = vector.load %arg1[%c0_5, %c1, %c0_6, %c0_7] : memref<1x4x64x288xbf16, #tpu.memory_space<vmem>>, vector<1x1x64x288xbf16>
    %5 = vector.shape_cast %4 : vector<1x1x64x288xbf16> to vector<64x288xbf16>
    %cst_8 = arith.constant dense<0.000000e+00> : vector<64x64xf32>
    %6 = tpu.matmul %5, %0, %cst_8 {dimension_numbers = #tpu.dot_dimension_numbers<[1], [0], [0], [1], [0, 0, 1, 1], [], []>} : vector<64x288xbf16>, vector<288x64xbf16>, vector<64x64xf32> -> vector<64x64xf32>
    %7 = arith.maximumf %3, %6 : vector<64x64xf32>
    %c0_9 = arith.constant 0 : index
    %c2 = arith.constant 2 : index
    %c0_10 = arith.constant 0 : index
    %c0_11 = arith.constant 0 : index
    %8 = vector.load %arg1[%c0_9, %c2, %c0_10, %c0_11] : memref<1x4x64x288xbf16, #tpu.memory_space<vmem>>, vector<1x1x64x288xbf16>
    %9 = vector.shape_cast %8 : vector<1x1x64x288xbf16> to vector<64x288xbf16>
    %cst_12 = arith.constant dense<0.000000e+00> : vector<64x64xf32>
    %10 = tpu.matmul %9, %0, %cst_12 {dimension_numbers = #tpu.dot_dimension_numbers<[1], [0], [0], [1], [0, 0, 1, 1], [], []>} : vector<64x288xbf16>, vector<288x64xbf16>, vector<64x64xf32> -> vector<64x64xf32>
    %11 = arith.maximumf %7, %10 : vector<64x64xf32>
    %c0_13 = arith.constant 0 : index
    %c3 = arith.constant 3 : index
    %c0_14 = arith.constant 0 : index
    %c0_15 = arith.constant 0 : index
    %12 = vector.load %arg1[%c0_13, %c3, %c0_14, %c0_15] : memref<1x4x64x288xbf16, #tpu.memory_space<vmem>>, vector<1x1x64x288xbf16>
    %13 = vector.shape_cast %12 : vector<1x1x64x288xbf16> to vector<64x288xbf16>
    %cst_16 = arith.constant dense<0.000000e+00> : vector<64x64xf32>
    %14 = tpu.matmul %13, %0, %cst_16 {dimension_numbers = #tpu.dot_dimension_numbers<[1], [0], [0], [1], [0, 0, 1, 1], [], []>} : vector<64x288xbf16>, vector<288x64xbf16>, vector<64x64xf32> -> vector<64x64xf32>
    %15 = arith.maximumf %11, %14 : vector<64x64xf32>
    %c0_17 = arith.constant 0 : index
    %c0_18 = arith.constant 0 : index
    %16 = vector.load %arg3[%c0_17, %c0_18] : memref<1x64xf32, #tpu.memory_space<vmem>>, vector<1x64xf32>
    %17 = vector.broadcast %16 : vector<1x64xf32> to vector<64x64xf32>
    %18 = arith.addf %15, %17 : vector<64x64xf32>
    %cst_19 = arith.constant 0.000000e+00 : f32
    %19 = vector.broadcast %cst_19 : f32 to vector<64x64xf32>
    %20 = arith.maximumf %18, %19 : vector<64x64xf32>
    %21 = arith.truncf %20 : vector<64x64xf32> to vector<64x64xbf16>
    %c0_20 = arith.constant 0 : index
    %c0_21 = arith.constant 0 : index
    %c0_22 = arith.constant 0 : index
    %22 = vector.load %arg4[%c0_20, %c0_21, %c0_22] : memref<1x64x64xbf16, #tpu.memory_space<vmem>>, vector<1x64x64xbf16>
    %23 = vector.shape_cast %22 : vector<1x64x64xbf16> to vector<64x64xbf16>
    %24 = vector.shape_cast %21 : vector<64x64xbf16> to vector<1x64x64xbf16>
    tpu.vector_store %arg4[%c0_20, %c0_21, %c0_22], %24 {strides = array<i32>} : memref<1x64x64xbf16, #tpu.memory_space<vmem>>, vector<1x64x64xbf16>,
    return
  }
  func.func @transform_0(%arg0: i32) -> (i32, i32, i32, i32) {
    %c0_i32 = arith.constant 0 : i32
    %c0_i32_0 = arith.constant 0 : i32
    %c0_i32_1 = arith.constant 0 : i32
    %c0_i32_2 = arith.constant 0 : i32
    return %arg0, %c0_i32, %c0_i32_0, %c0_i32_1 : i32, i32, i32, i32
  }
  func.func @transform_1(%arg0: i32) -> (i32, i32) {
    %c0_i32 = arith.constant 0 : i32
    %c0_i32_0 = arith.constant 0 : i32
    %c0_i32_1 = arith.constant 0 : i32
    return %c0_i32, %c0_i32_0 : i32, i32
  }
  func.func @transform_2(%arg0: i32) -> (i32, i32) {
    %c0_i32 = arith.constant 0 : i32
    %c0_i32_0 = arith.constant 0 : i32
    %c0_i32_1 = arith.constant 0 : i32
    return %c0_i32, %c0_i32_0 : i32, i32
  }
  func.func @transform_3(%arg0: i32) -> (i32, i32, i32) {
    %c0_i32 = arith.constant 0 : i32
    %c0_i32_0 = arith.constant 0 : i32
    %c0_i32_1 = arith.constant 0 : i32
    return %arg0, %c0_i32, %c0_i32_0 : i32, i32, i32
  }
}

module attributes {stable_mosaic.version = 11 : i64} {
  func.func @_mlp_kernel(%arg0: i32, %arg1: memref<2x4096xbf16, #tpu.memory_space<vmem>>, %arg2: memref<4096x128xbf16, #tpu.memory_space<vmem>>, %arg3: memref<1x128xf32, #tpu.memory_space<vmem>>, %arg4: memref<128x10xbf16, #tpu.memory_space<vmem>>, %arg5: memref<1x10xf32, #tpu.memory_space<vmem>>, %arg6: memref<2x10xf32, #tpu.memory_space<vmem>>) attributes {dimension_semantics = [#tpu.dimension_semantics<arbitrary>], iteration_bounds = array<i64: 1>, scalar_prefetch = 0 : i64, scratch_operands = 0 : i64, tpu.core_type = #tpu.core_type<tc>, window_params = [{pipeline_mode = #tpu.pipeline_mode<synchronous>, transform_indices = @transform_0, window_bounds = array<i64: 2, 4096>}, {pipeline_mode = #tpu.pipeline_mode<synchronous>, transform_indices = @transform_1, window_bounds = array<i64: 4096, 128>}, {pipeline_mode = #tpu.pipeline_mode<synchronous>, transform_indices = @transform_2, window_bounds = array<i64: 1, 128>}, {pipeline_mode = #tpu.pipeline_mode<synchronous>, transform_indices = @transform_3, window_bounds = array<i64: 128, 10>}, {pipeline_mode = #tpu.pipeline_mode<synchronous>, transform_indices = @transform_4, window_bounds = array<i64: 1, 10>}, {pipeline_mode = #tpu.pipeline_mode<synchronous>, transform_indices = @transform_5, window_bounds = array<i64: 2, 10>}]} {
    %c0 = arith.constant 0 : index
    %c0_0 = arith.constant 0 : index
    %0 = vector.load %arg1[%c0, %c0_0] : memref<2x4096xbf16, #tpu.memory_space<vmem>>, vector<2x4096xbf16>
    %c0_1 = arith.constant 0 : index
    %c0_2 = arith.constant 0 : index
    %1 = vector.load %arg2[%c0_1, %c0_2] : memref<4096x128xbf16, #tpu.memory_space<vmem>>, vector<4096x128xbf16>
    %cst = arith.constant dense<0.000000e+00> : vector<2x128xf32>
    %2 = tpu.matmul %0, %1, %cst {dimension_numbers = #tpu.dot_dimension_numbers<[1], [0], [0], [1], [0, 0, 1, 1], [], []>} : vector<2x4096xbf16>, vector<4096x128xbf16>, vector<2x128xf32> -> vector<2x128xf32>
    %c0_3 = arith.constant 0 : index
    %c0_4 = arith.constant 0 : index
    %3 = vector.load %arg3[%c0_3, %c0_4] : memref<1x128xf32, #tpu.memory_space<vmem>>, vector<1x128xf32>
    %4 = vector.broadcast %3 : vector<1x128xf32> to vector<2x128xf32>
    %5 = arith.addf %2, %4 : vector<2x128xf32>
    %cst_5 = arith.constant 0.000000e+00 : f32
    %6 = vector.broadcast %cst_5 : f32 to vector<2x128xf32>
    %7 = arith.maximumf %5, %6 : vector<2x128xf32>
    %8 = arith.truncf %7 : vector<2x128xf32> to vector<2x128xbf16>
    %c0_6 = arith.constant 0 : index
    %c0_7 = arith.constant 0 : index
    %9 = vector.load %arg4[%c0_6, %c0_7] : memref<128x10xbf16, #tpu.memory_space<vmem>>, vector<128x10xbf16>
    %cst_8 = arith.constant dense<0.000000e+00> : vector<2x10xf32>
    %10 = tpu.matmul %8, %9, %cst_8 {dimension_numbers = #tpu.dot_dimension_numbers<[1], [0], [0], [1], [0, 0, 1, 1], [], []>} : vector<2x128xbf16>, vector<128x10xbf16>, vector<2x10xf32> -> vector<2x10xf32>
    %c0_9 = arith.constant 0 : index
    %c0_10 = arith.constant 0 : index
    %11 = vector.load %arg5[%c0_9, %c0_10] : memref<1x10xf32, #tpu.memory_space<vmem>>, vector<1x10xf32>
    %12 = vector.broadcast %11 : vector<1x10xf32> to vector<2x10xf32>
    %13 = arith.addf %10, %12 : vector<2x10xf32>
    %c0_11 = arith.constant 0 : index
    %c0_12 = arith.constant 0 : index
    %14 = vector.load %arg6[%c0_11, %c0_12] : memref<2x10xf32, #tpu.memory_space<vmem>>, vector<2x10xf32>
    tpu.vector_store %arg6[%c0_11, %c0_12], %13 {strides = array<i32>} : memref<2x10xf32, #tpu.memory_space<vmem>>, vector<2x10xf32>,
    return
  }
  func.func @transform_0(%arg0: i32) -> (i32, i32) {
    %c0_i32 = arith.constant 0 : i32
    %c0_i32_0 = arith.constant 0 : i32
    %c0_i32_1 = arith.constant 0 : i32
    return %c0_i32, %c0_i32_0 : i32, i32
  }
  func.func @transform_1(%arg0: i32) -> (i32, i32) {
    %c0_i32 = arith.constant 0 : i32
    %c0_i32_0 = arith.constant 0 : i32
    %c0_i32_1 = arith.constant 0 : i32
    return %c0_i32, %c0_i32_0 : i32, i32
  }
  func.func @transform_2(%arg0: i32) -> (i32, i32) {
    %c0_i32 = arith.constant 0 : i32
    %c0_i32_0 = arith.constant 0 : i32
    %c0_i32_1 = arith.constant 0 : i32
    return %c0_i32, %c0_i32_0 : i32, i32
  }
  func.func @transform_3(%arg0: i32) -> (i32, i32) {
    %c0_i32 = arith.constant 0 : i32
    %c0_i32_0 = arith.constant 0 : i32
    %c0_i32_1 = arith.constant 0 : i32
    return %c0_i32, %c0_i32_0 : i32, i32
  }
  func.func @transform_4(%arg0: i32) -> (i32, i32) {
    %c0_i32 = arith.constant 0 : i32
    %c0_i32_0 = arith.constant 0 : i32
    %c0_i32_1 = arith.constant 0 : i32
    return %c0_i32, %c0_i32_0 : i32, i32
  }
  func.func @transform_5(%arg0: i32) -> (i32, i32) {
    %c0_i32 = arith.constant 0 : i32
    %c0_i32_0 = arith.constant 0 : i32
    %c0_i32_1 = arith.constant 0 : i32
    return %c0_i32, %c0_i32_0 : i32, i32
  }
}

</mosaic_0001>

<bundles_post_ra>
// kernel: svhn_forward.3
= control target key start
LH: loop header
LB: loop body
LE: loop exit
PB: predicated region body
PF: predicated region fallthrough
CT: control target
= control target key end

     0   :  { %s2020_s12 = smov 0   ;;  %s2283_s0 = inlined_call_operand.vmem [shape: bf16[2,4,256,27], index: 0, kind: input, shape index: {}]   ;;  %s2284_s1 = inlined_call_operand.vmem [shape: bf16[27,32], index: 1, kind: input, shape index: {}]   ;;  %s2285_s2 = inlined_call_operand.vmem [shape: f32[1,32], index: 2, kind: input, shape index: {}]   ;;  %s2286_s3 = inlined_call_operand.vmem [shape: bf16[2,256,32], index: 3, kind: output, shape index: {}]  }
   0x1 LB: > { %s1478_s13 = sadd.s32 4294967295, %s1997_s12   ;;  %p1482_p0 = scmp.ge.s32.totalorder %s1997_s12, 1  ;;  %s1997_s12 = sphi %s2020_s12, %s13_s12  }
   0x2   : > { %p137_p1 = scmp.lt.s32.totalorder %s1997_s12, 3 }
   0x4   : > { %p138_p2 = pnand %p1482_p0, %p137_p1 }
   0x5   : > { %p161_p3 = scmp.lt.s32.totalorder (!%p138_p2), %s1478_s13, 1 }
   0x6   : > { %141 = sbr.rel (%p138_p2) target bundleno = 416 (0x1a0), region = 32 }
   0xb   : > { %v1557_v0 = vld [vmem:[%s2284_s1 + $0x8] sm:$0xf]  ;;  %v1916_v1 = vld [vmem:[%s2284_s1 + $0x8] sm:$0x30]  ;;  %vm348_vm0 = vcmask 1044480   ;;  %vm349_vm1 = vcmask 1045504  }
   0xc   : > { %v1558_v2 = vor.u32 %v1916_v1, %v1557_v0  ;;  %v1999_v3 = vmov 65535   ;;  %s2288_s13 = smov (!%p161_p3, %s1478_s13), 1  ;;  %v1915_v7 = vld [vmem:[%s2284_s1] sm:$0xff]  ;;  %vm299_vm2 = vcmask 220160   ;;  %vm1390_vm3 = vcmask 257024  }
   0xd   : > { %v350_v4 = vsel %vm348_vm0, 4294967295, %v1999_v3  ;;  %s1913_s18 = sshll.u32 %s2288_s13, 9  ;;  %v2120_v50 = vld [vmem:[%s2285_s2] ss:$0 sm:$0xff]  ;;  %s1914_s26 = sshll.u32 %s2288_s13, 7 }
   0xe   : > { %v351_v5 = vsel %vm349_vm1, %v350_v4, 0  ;;  %s2043_s23 = scalar_lea.vmem %s2283_s0, %s1913_s18  ;;  %s2127_s29 = scalar_lea.vmem %s2286_s3, %s1914_s26 }
   0xf   : > { %v353_v6 = vand.u32 %v1558_v2, %v351_v5  ;;  %v1917_v8 = vld [vmem:[%s2043_s23] sm:$0xff]  ;;  %v1918_v12 = vld [vmem:[%s2043_s23 + $0x8] sm:$0xff]  ;;  %v1919_v16 = vld [vmem:[%s2043_s23 + $0x10] sm:$0xff] }
  0x10   : > { %v1933_v9 = vld [vmem:[%s2043_s23 + $0x80] sm:$0xff]  ;;  %v1934_v13 = vld [vmem:[%s2043_s23 + $0x88] sm:$0xff]  ;;  %v1935_v17 = vld [vmem:[%s2043_s23 + $0x90] sm:$0xff] }
  0x11   : > { %361 = vmatpush.bf16.msra.mxu0 %v353_v6  ;;  %611 = vmatpush.bf16.msra.mxu1 %v353_v6  ;;  %v1949_v10 = vld [vmem:[%s2043_s23 + $0x100] sm:$0xff]  ;;  %v1950_v14 = vld [vmem:[%s2043_s23 + $0x108] sm:$0xff]  ;;  %v1951_v18 = vld [vmem:[%s2043_s23 + $0x110] sm:$0xff] }
  0x12   : > { %893 = vmatpush.bf16.msra.mxu2 %v353_v6  ;;  %1175 = vmatpush.bf16.msra.mxu3 %v353_v6  ;;  %v1965_v11 = vld [vmem:[%s2043_s23 + $0x180] sm:$0xff]  ;;  %v1966_v15 = vld [vmem:[%s2043_s23 + $0x188] sm:$0xff]  ;;  %v1967_v19 = vld [vmem:[%s2043_s23 + $0x190] sm:$0xff] }
  0x13   : > { %v1920_v20 = vld [vmem:[%s2043_s23 + $0x18] sm:$0xff]  ;;  %v1921_v24 = vld [vmem:[%s2043_s23 + $0x20] sm:$0xff]  ;;  %v1922_v28 = vld [vmem:[%s2043_s23 + $0x28] sm:$0xff] }
  0x14   : > { %v1936_v21 = vld [vmem:[%s2043_s23 + $0x98] sm:$0xff]  ;;  %v1937_v25 = vld [vmem:[%s2043_s23 + $0xa0] sm:$0xff]  ;;  %v1938_v29 = vld [vmem:[%s2043_s23 + $0xa8] sm:$0xff] }
  0x15   : > { %362 = vmatpush.bf16.msra.mxu0 %v1915_v7  ;;  %612 = vmatpush.bf16.msra.mxu1 %v1915_v7  ;;  %v1952_v22 = vld [vmem:[%s2043_s23 + $0x118] sm:$0xff]  ;;  %v1953_v26 = vld [vmem:[%s2043_s23 + $0x120] sm:$0xff]  ;;  %v1954_v30 = vld [vmem:[%s2043_s23 + $0x128] sm:$0xff] }
  0x16   : > { %894 = vmatpush.bf16.msra.mxu2 %v1915_v7  ;;  %1176 = vmatpush.bf16.msra.mxu3 %v1915_v7  ;;  %v1968_v23 = vld [vmem:[%s2043_s23 + $0x198] sm:$0xff]  ;;  %v1969_v27 = vld [vmem:[%s2043_s23 + $0x1a0] sm:$0xff]  ;;  %v1970_v31 = vld [vmem:[%s2043_s23 + $0x1a8] sm:$0xff] }
  0x17   : > { %v1923_v32 = vld [vmem:[%s2043_s23 + $0x30] sm:$0xff]  ;;  %v1924_v36 = vld [vmem:[%s2043_s23 + $0x38] sm:$0xff]  ;;  %v1925_v40 = vld [vmem:[%s2043_s23 + $0x40] sm:$0xff] }
  0x18   : > { %1559 = vmatmul.msk.bf16.vlgmr.msra.gmra.mxu0 %vm299_vm2, %v1917_v8  ;;  %1671 = vmatmul.msk.bf16.vlgmr.msra.gmra.mxu1 %vm299_vm2, %v1933_v9  ;;  %v1939_v33 = vld [vmem:[%s2043_s23 + $0xb0] sm:$0xff]  ;;  %v1940_v37 = vld [vmem:[%s2043_s23 + $0xb8] sm:$0xff]  ;;  %v1941_v41 = vld [vmem:[%s2043_s23 + $0xc0] sm:$0xff] }
  0x19   : > { %1783 = vmatmul.msk.bf16.vlgmr.msra.gmra.mxu2 %vm299_vm2, %v1949_v10  ;;  %1895 = vmatmul.msk.bf16.vlgmr.msra.gmra.mxu3 %vm299_vm2, %v1965_v11  ;;  %v1955_v34 = vld [vmem:[%s2043_s23 + $0x130] sm:$0xff]  ;;  %v1956_v38 = vld [vmem:[%s2043_s23 + $0x138] sm:$0xff]  ;;  %v1957_v44 = vld [vmem:[%s2043_s23 + $0x140] sm:$0xff] }
  0x1a   : > { %v1971_v35 = vld [vmem:[%s2043_s23 + $0x1b0] sm:$0xff]  ;;  %v1972_v39 = vld [vmem:[%s2043_s23 + $0x1b8] sm:$0xff]  ;;  %v1973_v45 = vld [vmem:[%s2043_s23 + $0x1c0] sm:$0xff] }
  0x1b   : > { %v1926_v59 = vld [vmem:[%s2043_s23 + $0x48] sm:$0xff] }
  0x1c   : > { %v1942_v60 = vld [vmem:[%s2043_s23 + $0xc8] sm:$0xff] }
  0x1d   : > { %v1958_v1 = vld [vmem:[%s2043_s23 + $0x148] sm:$0xff] }
  0x1e   : > { %v1974_v2 = vld [vmem:[%s2043_s23 + $0x1c8] sm:$0xff] }
  0x28   : > { %1560 = vmatmul.msk.bf16.gmra.mxu0 %vm299_vm2, %v1918_v12  ;;  %1672 = vmatmul.msk.bf16.gmra.mxu1 %vm299_vm2, %v1934_v13 }
  0x29   : > { %1784 = vmatmul.msk.bf16.gmra.mxu2 %vm299_vm2, %v1950_v14  ;;  %1896 = vmatmul.msk.bf16.gmra.mxu3 %vm299_vm2, %v1966_v15 }
  0x38   : > { %1561 = vmatmul.msk.bf16.gmra.mxu0 %vm299_vm2, %v1919_v16  ;;  %1673 = vmatmul.msk.bf16.gmra.mxu1 %vm299_vm2, %v1935_v17 }
  0x39   : > { %1785 = vmatmul.msk.bf16.gmra.mxu2 %vm299_vm2, %v1951_v18  ;;  %1897 = vmatmul.msk.bf16.gmra.mxu3 %vm299_vm2, %v1967_v19  ;;  %v1927_v19 = vld [vmem:[%s2043_s23 + $0x50] sm:$0xff] }
  0x48   : > { %1562 = vmatmul.msk.bf16.gmra.mxu0 %vm299_vm2, %v1920_v20  ;;  %1674 = vmatmul.msk.bf16.gmra.mxu1 %vm299_vm2, %v1936_v21  ;;  %v1943_v20 = vld [vmem:[%s2043_s23 + $0xd0] sm:$0xff] }
  0x49   : > { %1786 = vmatmul.msk.bf16.gmra.mxu2 %vm299_vm2, %v1952_v22  ;;  %1898 = vmatmul.msk.bf16.gmra.mxu3 %vm299_vm2, %v1968_v23 }
  0x58   : > { %1563 = vmatmul.msk.bf16.gmra.mxu0 %vm299_vm2, %v1921_v24  ;;  %1675 = vmatmul.msk.bf16.gmra.mxu1 %vm299_vm2, %v1937_v25  ;;  %v1959_v25 = vld [vmem:[%s2043_s23 + $0x150] sm:$0xff] }
  0x59   : > { %1787 = vmatmul.msk.bf16.gmra.mxu2 %vm299_vm2, %v1953_v26  ;;  %1899 = vmatmul.msk.bf16.gmra.mxu3 %vm299_vm2, %v1969_v27  ;;  %v1975_v26 = vld [vmem:[%s2043_s23 + $0x1d0] sm:$0xff] }
  0x68   : > { %1564 = vmatmul.msk.bf16.gmra.mxu0 %vm299_vm2, %v1922_v28  ;;  %1676 = vmatmul.msk.bf16.gmra.mxu1 %vm299_vm2, %v1938_v29 }
  0x69   : > { %1788 = vmatmul.msk.bf16.gmra.mxu2 %vm299_vm2, %v1954_v30  ;;  %1900 = vmatmul.msk.bf16.gmra.mxu3 %vm299_vm2, %v1970_v31 }
  0x78   : > { %1565 = vmatmul.msk.bf16.gmra.mxu0 %vm299_vm2, %v1923_v32  ;;  %1677 = vmatmul.msk.bf16.gmra.mxu1 %vm299_vm2, %v1939_v33 }
  0x79   : > { %1789 = vmatmul.msk.bf16.gmra.mxu2 %vm299_vm2, %v1955_v34  ;;  %1901 = vmatmul.msk.bf16.gmra.mxu3 %vm299_vm2, %v1971_v35 }
  0x88   : > { %1566 = vmatmul.msk.bf16.gmra.mxu0 %vm299_vm2, %v1924_v36  ;;  %1678 = vmatmul.msk.bf16.gmra.mxu1 %vm299_vm2, %v1940_v37 }
  0x89   : > { %1790 = vmatmul.msk.bf16.gmra.mxu2 %vm299_vm2, %v1956_v38  ;;  %1902 = vmatmul.msk.bf16.gmra.mxu3 %vm299_vm2, %v1972_v39 }
  0x95   : > { %v364_v42 = vpop.f32.mrf.mxu0  ;;  %v614_v43 = vpop.f32.mrf.mxu1 }
  0x96   : > { %v694_v46 = vmax.f32 %v364_v42, %v614_v43  ;;  %v1928_v43 = vld [vmem:[%s2043_s23 + $0x58] sm:$0xff] }
  0x98   : > { %1567 = vmatmul.msk.bf16.gmra.mxu0 %vm299_vm2, %v1925_v40  ;;  %1679 = vmatmul.msk.bf16.gmra.mxu1 %vm299_vm2, %v1941_v41 }
  0x99   : > { %1791 = vmatmul.msk.bf16.gmra.mxu2 %vm299_vm2, %v1957_v44  ;;  %1903 = vmatmul.msk.bf16.gmra.mxu3 %vm299_vm2, %v1973_v45  ;;  %v1944_v44 = vld [vmem:[%s2043_s23 + $0xd8] sm:$0xff] }
  0x9c   : > { %v896_v47 = vpop.f32.mrf.mxu2  ;;  %v1178_v48 = vpop.f32.mrf.mxu3 }
  0x9d   : > { %v976_v49 = vmax.f32 %v694_v46, %v896_v47  ;;  %v366_v51 = vpop.f32.mrf.mxu0  ;;  %v616_v52 = vpop.f32.mrf.mxu1 }
  0x9e   : > { %v695_v56 = vmax.f32 %v366_v51, %v616_v52  ;;  %v1976_v51 = vld [vmem:[%s2043_s23 + $0x1d8] sm:$0xff] }
  0x9f   : > { %v1258_v53 = vmax.f32 %v976_v49, %v1178_v48  ;;  %v1960_v49 = vld [vmem:[%s2043_s23 + $0x158] sm:$0xff] }
  0xa1   : > { %v1294_v54 = vadd.f32 %v2120_v50, %v1258_v53 }
  0xa3   : > { %v1326_v55 = vmax.f32 %v1294_v54, 0.0 }
  0xa4   : > { %v898_v57 = vpop.f32.mrf.mxu2  ;;  %v1180_v58 = vpop.f32.mrf.mxu3 }
  0xa5   : > { %v1358_v61 = vpack.c.bf16 %v1326_v55, %v1326_v55  ;;  %v977_v62 = vmax.f32 %v695_v56, %v898_v57  ;;  %v369_v63 = vpop.f32.mrf.mxu0  ;;  %v619_v0 = vpop.f32.mrf.mxu1 }
  0xa6   : > { %v696_v5 = vmax.f32 %v369_v63, %v619_v0 }
  0xa7   : > { %1391 = vst.msk [vmem:[%s2127_s29] sm:$0xf] %vm1390_vm3, %v1358_v61  ;;  %v1259_v3 = vmax.f32 %v977_v62, %v1180_v58 }
  0xa8   : > { %1568 = vmatmul.msk.bf16.gmra.mxu0 %vm299_vm2, %v1926_v59  ;;  %1680 = vmatmul.msk.bf16.gmra.mxu1 %vm299_vm2, %v1942_v60 }
  0xa9   : > { %v1295_v4 = vadd.f32 %v2120_v50, %v1259_v3  ;;  %1792 = vmatmul.msk.bf16.gmra.mxu2 %vm299_vm2, %v1958_v1  ;;  %1904 = vmatmul.msk.bf16.gmra.mxu3 %vm299_vm2, %v1974_v2 }
  0xab   : > { %v1327_v6 = vmax.f32 %v1295_v4, 0.0  ;;  %v1929_v4 = vld [vmem:[%s2043_s23 + $0x60] sm:$0xff] }
  0xac   : > { %v901_v7 = vpop.f32.mrf.mxu2  ;;  %v1183_v8 = vpop.f32.mrf.mxu3 }
  0xad   : > { %v1359_v9 = vpack.c.bf16 %v1327_v6, %v1327_v6  ;;  %v978_v10 = vmax.f32 %v696_v5, %v901_v7  ;;  %v371_v11 = vpop.f32.mrf.mxu0  ;;  %v621_v12 = vpop.f32.mrf.mxu1  ;;  %v1945_v5 = vld [vmem:[%s2043_s23 + $0xe0] sm:$0xff] }
  0xae   : > { %v697_v16 = vmax.f32 %v371_v11, %v621_v12  ;;  %v1977_v11 = vld [vmem:[%s2043_s23 + $0x1e0] sm:$0xff] }
  0xaf   : > { %1392 = vst.msk [vmem:[%s2127_s29 + $0x4] sm:$0xf] %vm1390_vm3, %v1359_v9  ;;  %v1260_v13 = vmax.f32 %v978_v10, %v1183_v8  ;;  %v1961_v10 = vld [vmem:[%s2043_s23 + $0x160] sm:$0xff] }
  0xb1   : > { %v1296_v14 = vadd.f32 %v2120_v50, %v1260_v13 }
  0xb3   : > { %v1328_v15 = vmax.f32 %v1296_v14, 0.0 }
  0xb4   : > { %v903_v17 = vpop.f32.mrf.mxu2  ;;  %v1185_v18 = vpop.f32.mrf.mxu3 }
  0xb5   : > { %v1360_v21 = vpack.c.bf16 %v1328_v15, %v1328_v15  ;;  %v979_v22 = vmax.f32 %v697_v16, %v903_v17  ;;  %v374_v23 = vpop.f32.mrf.mxu0  ;;  %v624_v24 = vpop.f32.mrf.mxu1 }
  0xb6   : > { %v698_v29 = vmax.f32 %v374_v23, %v624_v24 }
  0xb7   : > { %1393 = vst.msk [vmem:[%s2127_s29 + $0x8] sm:$0xf] %vm1390_vm3, %v1360_v21  ;;  %v1261_v27 = vmax.f32 %v979_v22, %v1185_v18 }
  0xb8   : > { %1569 = vmatmul.msk.bf16.gmra.mxu0 %vm299_vm2, %v1927_v19  ;;  %1681 = vmatmul.msk.bf16.gmra.mxu1 %vm299_vm2, %v1943_v20 }
  0xb9   : > { %v1297_v28 = vadd.f32 %v2120_v50, %v1261_v27  ;;  %1793 = vmatmul.msk.bf16.gmra.mxu2 %vm299_vm2, %v1959_v25  ;;  %1905 = vmatmul.msk.bf16.gmra.mxu3 %vm299_vm2, %v1975_v26 }
  0xbb   : > { %v1329_v30 = vmax.f32 %v1297_v28, 0.0  ;;  %v1930_v28 = vld [vmem:[%s2043_s23 + $0x68] sm:$0xff] }
  0xbc   : > { %v906_v31 = vpop.f32.mrf.mxu2  ;;  %v1188_v32 = vpop.f32.mrf.mxu3 }
  0xbd   : > { %v1361_v33 = vpack.c.bf16 %v1329_v30, %v1329_v30  ;;  %v980_v34 = vmax.f32 %v698_v29, %v906_v31  ;;  %v376_v35 = vpop.f32.mrf.mxu0  ;;  %v626_v36 = vpop.f32.mrf.mxu1  ;;  %v1946_v29 = vld [vmem:[%s2043_s23 + $0xe8] sm:$0xff] }
  0xbe   : > { %v699_v40 = vmax.f32 %v376_v35, %v626_v36  ;;  %v1978_v35 = vld [vmem:[%s2043_s23 + $0x1e8] sm:$0xff] }
  0xbf   : > { %1394 = vst.msk [vmem:[%s2127_s29 + $0xc] sm:$0xf] %vm1390_vm3, %v1361_v33  ;;  %v1262_v37 = vmax.f32 %v980_v34, %v1188_v32  ;;  %v1962_v34 = vld [vmem:[%s2043_s23 + $0x168] sm:$0xff] }
  0xc1   : > { %v1298_v38 = vadd.f32 %v2120_v50, %v1262_v37 }
  0xc3   : > { %v1330_v39 = vmax.f32 %v1298_v38, 0.0 }
  0xc4   : > { %v908_v41 = vpop.f32.mrf.mxu2  ;;  %v1190_v42 = vpop.f32.mrf.mxu3 }
  0xc5   : > { %v1362_v45 = vpack.c.bf16 %v1330_v39, %v1330_v39  ;;  %v981_v46 = vmax.f32 %v699_v40, %v908_v41  ;;  %v379_v47 = vpop.f32.mrf.mxu0  ;;  %v629_v48 = vpop.f32.mrf.mxu1 }
  0xc6   : > { %v700_v54 = vmax.f32 %v379_v47, %v629_v48 }
  0xc7   : > { %1395 = vst.msk [vmem:[%s2127_s29 + $0x10] sm:$0xf] %vm1390_vm3, %v1362_v45  ;;  %v1263_v52 = vmax.f32 %v981_v46, %v1190_v42 }
  0xc8   : > { %1570 = vmatmul.msk.bf16.gmra.mxu0 %vm299_vm2, %v1928_v43  ;;  %1682 = vmatmul.msk.bf16.gmra.mxu1 %vm299_vm2, %v1944_v44 }
  0xc9   : > { %v1299_v53 = vadd.f32 %v2120_v50, %v1263_v52  ;;  %1794 = vmatmul.msk.bf16.gmra.mxu2 %vm299_vm2, %v1960_v49  ;;  %1906 = vmatmul.msk.bf16.gmra.mxu3 %vm299_vm2, %v1976_v51 }
  0xcb   : > { %v1331_v55 = vmax.f32 %v1299_v53, 0.0  ;;  %v1931_v53 = vld [vmem:[%s2043_s23 + $0x70] sm:$0xff] }
  0xcc   : > { %v911_v56 = vpop.f32.mrf.mxu2  ;;  %v1193_v57 = vpop.f32.mrf.mxu3 }
  0xcd   : > { %v1363_v58 = vpack.c.bf16 %v1331_v55, %v1331_v55  ;;  %v982_v59 = vmax.f32 %v700_v54, %v911_v56  ;;  %v381_v60 = vpop.f32.mrf.mxu0  ;;  %v631_v61 = vpop.f32.mrf.mxu1  ;;  %v1947_v54 = vld [vmem:[%s2043_s23 + $0xf0] sm:$0xff] }
  0xce   : > { %v701_v1 = vmax.f32 %v381_v60, %v631_v61  ;;  %v1979_v60 = vld [vmem:[%s2043_s23 + $0x1f0] sm:$0xff] }
  0xcf   : > { %1396 = vst.msk [vmem:[%s2127_s29 + $0x14] sm:$0xf] %vm1390_vm3, %v1363_v58  ;;  %v1264_v62 = vmax.f32 %v982_v59, %v1193_v57  ;;  %v1963_v59 = vld [vmem:[%s2043_s23 + $0x170] sm:$0xff] }
  0xd1   : > { %v1300_v63 = vadd.f32 %v2120_v50, %v1264_v62 }
  0xd3   : > { %v1332_v0 = vmax.f32 %v1300_v63, 0.0 }
  0xd4   : > { %v913_v2 = vpop.f32.mrf.mxu2  ;;  %v1195_v3 = vpop.f32.mrf.mxu3 }
  0xd5   : > { %v1364_v6 = vpack.c.bf16 %v1332_v0, %v1332_v0  ;;  %v983_v7 = vmax.f32 %v701_v1, %v913_v2  ;;  %v384_v8 = vpop.f32.mrf.mxu0  ;;  %v634_v9 = vpop.f32.mrf.mxu1 }
  0xd6   : > { %v702_v14 = vmax.f32 %v384_v8, %v634_v9 }
  0xd7   : > { %1397 = vst.msk [vmem:[%s2127_s29 + $0x18] sm:$0xf] %vm1390_vm3, %v1364_v6  ;;  %v1265_v12 = vmax.f32 %v983_v7, %v1195_v3 }
  0xd8   : > { %1571 = vmatmul.msk.bf16.gmra.mxu0 %vm299_vm2, %v1929_v4  ;;  %1683 = vmatmul.msk.bf16.gmra.mxu1 %vm299_vm2, %v1945_v5 }
  0xd9   : > { %v1301_v13 = vadd.f32 %v2120_v50, %v1265_v12  ;;  %1795 = vmatmul.msk.bf16.gmra.mxu2 %vm299_vm2, %v1961_v10  ;;  %1907 = vmatmul.msk.bf16.gmra.mxu3 %vm299_vm2, %v1977_v11 }
  0xdb   : > { %v1333_v15 = vmax.f32 %v1301_v13, 0.0  ;;  %v1932_v13 = vld [vmem:[%s2043_s23 + $0x78] sm:$0xff] }
  0xdc   : > { %v916_v16 = vpop.f32.mrf.mxu2  ;;  %v1198_v17 = vpop.f32.mrf.mxu3 }
  0xdd   : > { %v1365_v18 = vpack.c.bf16 %v1333_v15, %v1333_v15  ;;  %v984_v19 = vmax.f32 %v702_v14, %v916_v16  ;;  %v386_v20 = vpop.f32.mrf.mxu0  ;;  %v636_v21 = vpop.f32.mrf.mxu1  ;;  %v1948_v14 = vld [vmem:[%s2043_s23 + $0xf8] sm:$0xff] }
  0xde   : > { %v703_v25 = vmax.f32 %v386_v20, %v636_v21  ;;  %v1980_v20 = vld [vmem:[%s2043_s23 + $0x1f8] sm:$0xff] }
  0xdf   : > { %1398 = vst.msk [vmem:[%s2127_s29 + $0x1c] sm:$0xf] %vm1390_vm3, %v1365_v18  ;;  %v1266_v22 = vmax.f32 %v984_v19, %v1198_v17  ;;  %v1964_v19 = vld [vmem:[%s2043_s23 + $0x178] sm:$0xff] }
  0xe1   : > { %v1302_v23 = vadd.f32 %v2120_v50, %v1266_v22 }
  0xe3   : > { %v1334_v24 = vmax.f32 %v1302_v23, 0.0 }
  0xe4   : > { %v918_v26 = vpop.f32.mrf.mxu2  ;;  %v1200_v27 = vpop.f32.mrf.mxu3 }
  0xe5   : > { %v1366_v30 = vpack.c.bf16 %v1334_v24, %v1334_v24  ;;  %v985_v31 = vmax.f32 %v703_v25, %v918_v26  ;;  %v389_v32 = vpop.f32.mrf.mxu0  ;;  %v639_v33 = vpop.f32.mrf.mxu1 }
  0xe6   : > { %v704_v38 = vmax.f32 %v389_v32, %v639_v33 }
  0xe7   : > { %1399 = vst.msk [vmem:[%s2127_s29 + $0x20] sm:$0xf] %vm1390_vm3, %v1366_v30  ;;  %v1267_v36 = vmax.f32 %v985_v31, %v1200_v27 }
  0xe8   : > { %1572 = vmatmul.msk.bf16.gmra.mxu0 %vm299_vm2, %v1930_v28  ;;  %1684 = vmatmul.msk.bf16.gmra.mxu1 %vm299_vm2, %v1946_v29 }
  0xe9   : > { %v1303_v37 = vadd.f32 %v2120_v50, %v1267_v36  ;;  %1796 = vmatmul.msk.bf16.gmra.mxu2 %vm299_vm2, %v1962_v34  ;;  %1908 = vmatmul.msk.bf16.gmra.mxu3 %vm299_vm2, %v1978_v35 }
  0xeb   : > { %v1335_v39 = vmax.f32 %v1303_v37, 0.0 }
  0xec   : > { %v921_v40 = vpop.f32.mrf.mxu2  ;;  %v1203_v41 = vpop.f32.mrf.mxu3 }
  0xed   : > { %v1367_v42 = vpack.c.bf16 %v1335_v39, %v1335_v39  ;;  %v986_v43 = vmax.f32 %v704_v38, %v921_v40  ;;  %v391_v44 = vpop.f32.mrf.mxu0  ;;  %v641_v45 = vpop.f32.mrf.mxu1 }
  0xee   : > { %v705_v49 = vmax.f32 %v391_v44, %v641_v45 }
  0xef   : > { %1400 = vst.msk [vmem:[%s2127_s29 + $0x24] sm:$0xf] %vm1390_vm3, %v1367_v42  ;;  %v1268_v46 = vmax.f32 %v986_v43, %v1203_v41 }
  0xf1   : > { %v1304_v47 = vadd.f32 %v2120_v50, %v1268_v46 }
  0xf3   : > { %v1336_v48 = vmax.f32 %v1304_v47, 0.0 }
  0xf4   : > { %v923_v51 = vpop.f32.mrf.mxu2  ;;  %v1205_v52 = vpop.f32.mrf.mxu3 }
  0xf5   : > { %v1368_v55 = vpack.c.bf16 %v1336_v48, %v1336_v48  ;;  %v987_v56 = vmax.f32 %v705_v49, %v923_v51  ;;  %v394_v57 = vpop.f32.mrf.mxu0  ;;  %v644_v58 = vpop.f32.mrf.mxu1 }
  0xf6   : > { %v706_v63 = vmax.f32 %v394_v57, %v644_v58 }
  0xf7   : > { %1401 = vst.msk [vmem:[%s2127_s29 + $0x28] sm:$0xf] %vm1390_vm3, %v1368_v55  ;;  %v1269_v61 = vmax.f32 %v987_v56, %v1205_v52 }
  0xf8   : > { %1573 = vmatmul.msk.bf16.gmra.mxu0 %vm299_vm2, %v1931_v53  ;;  %1685 = vmatmul.msk.bf16.gmra.mxu1 %vm299_vm2, %v1947_v54 }
  0xf9   : > { %v1305_v62 = vadd.f32 %v2120_v50, %v1269_v61  ;;  %1797 = vmatmul.msk.bf16.gmra.mxu2 %vm299_vm2, %v1963_v59  ;;  %1909 = vmatmul.msk.bf16.gmra.mxu3 %vm299_vm2, %v1979_v60 }
  0xfb   : > { %v1337_v0 = vmax.f32 %v1305_v62, 0.0 }
  0xfc   : > { %v926_v1 = vpop.f32.mrf.mxu2  ;;  %v1208_v2 = vpop.f32.mrf.mxu3 }
  0xfd   : > { %v1369_v3 = vpack.c.bf16 %v1337_v0, %v1337_v0  ;;  %v988_v4 = vmax.f32 %v706_v63, %v926_v1  ;;  %v396_v5 = vpop.f32.mrf.mxu0  ;;  %v646_v6 = vpop.f32.mrf.mxu1 }
  0xfe   : > { %v707_v10 = vmax.f32 %v396_v5, %v646_v6 }
  0xff   : > { %1402 = vst.msk [vmem:[%s2127_s29 + $0x2c] sm:$0xf] %vm1390_vm3, %v1369_v3  ;;  %v1270_v7 = vmax.f32 %v988_v4, %v1208_v2 }
 0x101   : > { %v1306_v8 = vadd.f32 %v2120_v50, %v1270_v7 }
 0x103   : > { %v1338_v9 = vmax.f32 %v1306_v8, 0.0 }
 0x104   : > { %v928_v11 = vpop.f32.mrf.mxu2  ;;  %v1210_v12 = vpop.f32.mrf.mxu3 }
 0x105   : > { %v1370_v15 = vpack.c.bf16 %v1338_v9, %v1338_v9  ;;  %v989_v16 = vmax.f32 %v707_v10, %v928_v11  ;;  %v399_v17 = vpop.f32.mrf.mxu0  ;;  %v649_v18 = vpop.f32.mrf.mxu1 }
 0x106   : > { %v708_v23 = vmax.f32 %v399_v17, %v649_v18 }
 0x107   : > { %1403 = vst.msk [vmem:[%s2127_s29 + $0x30] sm:$0xf] %vm1390_vm3, %v1370_v15  ;;  %v1271_v21 = vmax.f32 %v989_v16, %v1210_v12 }
 0x108   : > { %1574 = vmatmul.msk.bf16.gmra.mxu0 %vm299_vm2, %v1932_v13  ;;  %1686 = vmatmul.msk.bf16.gmra.mxu1 %vm299_vm2, %v1948_v14 }
 0x109   : > { %v1307_v22 = vadd.f32 %v2120_v50, %v1271_v21  ;;  %1798 = vmatmul.msk.bf16.gmra.mxu2 %vm299_vm2, %v1964_v19  ;;  %1910 = vmatmul.msk.bf16.gmra.mxu3 %vm299_vm2, %v1980_v20 }
 0x10b   : > { %v1339_v24 = vmax.f32 %v1307_v22, 0.0 }
 0x10c   : > { %v931_v25 = vpop.f32.mrf.mxu2  ;;  %v1213_v26 = vpop.f32.mrf.mxu3 }
 0x10d   : > { %v1371_v27 = vpack.c.bf16 %v1339_v24, %v1339_v24  ;;  %v990_v28 = vmax.f32 %v708_v23, %v931_v25  ;;  %v401_v29 = vpop.f32.mrf.mxu0  ;;  %v651_v30 = vpop.f32.mrf.mxu1 }
 0x10e   : > { %v709_v34 = vmax.f32 %v401_v29, %v651_v30 }
 0x10f   : > { %1404 = vst.msk [vmem:[%s2127_s29 + $0x34] sm:$0xf] %vm1390_vm3, %v1371_v27  ;;  %v1272_v31 = vmax.f32 %v990_v28, %v1213_v26 }
 0x111   : > { %v1308_v32 = vadd.f32 %v2120_v50, %v1272_v31 }
 0x113   : > { %v1340_v33 = vmax.f32 %v1308_v32, 0.0 }
 0x114   : > { %v933_v35 = vpop.f32.mrf.mxu2  ;;  %v1215_v36 = vpop.f32.mrf.mxu3 }
 0x115   : > { %v1372_v37 = vpack.c.bf16 %v1340_v33, %v1340_v33  ;;  %v991_v38 = vmax.f32 %v709_v34, %v933_v35  ;;  %v404_v39 = vpop.f32.mrf.mxu0  ;;  %v654_v40 = vpop.f32.mrf.mxu1 }
 0x116   : > { %v710_v43 = vmax.f32 %v404_v39, %v654_v40 }
 0x117   : > { %1405 = vst.msk [vmem:[%s2127_s29 + $0x38] sm:$0xf] %vm1390_vm3, %v1372_v37  ;;  %v1273_v41 = vmax.f32 %v991_v38, %v1215_v36 }
 0x119   : > { %v1309_v42 = vadd.f32 %v2120_v50, %v1273_v41 }
 0x11b   : > { %v1341_v44 = vmax.f32 %v1309_v42, 0.0 }
 0x11c   : > { %v936_v45 = vpop.f32.mrf.mxu2  ;;  %v1218_v46 = vpop.f32.mrf.mxu3 }
 0x11d   : > { %v1373_v47 = vpack.c.bf16 %v1341_v44, %v1341_v44  ;;  %v992_v48 = vmax.f32 %v710_v43, %v936_v45  ;;  %v406_v49 = vpop.f32.mrf.mxu0  ;;  %v656_v51 = vpop.f32.mrf.mxu1 }
 0x11e   : > { %v711_v55 = vmax.f32 %v406_v49, %v656_v51 }
 0x11f   : > { %1406 = vst.msk [vmem:[%s2127_s29 + $0x3c] sm:$0xf] %vm1390_vm3, %v1373_v47  ;;  %v1274_v52 = vmax.f32 %v992_v48, %v1218_v46 }
 0x121   : > { %v1310_v53 = vadd.f32 %v2120_v50, %v1274_v52 }
 0x123   : > { %v1342_v54 = vmax.f32 %v1310_v53, 0.0 }
 0x124   : > { %v938_v56 = vpop.f32.mrf.mxu2  ;;  %v1220_v57 = vpop.f32.mrf.mxu3 }
 0x125   : > { %v1374_v58 = vpack.c.bf16 %v1342_v54, %v1342_v54  ;;  %v993_v59 = vmax.f32 %v711_v55, %v938_v56  ;;  %v409_v60 = vpop.f32.mrf.mxu0  ;;  %v659_v61 = vpop.f32.mrf.mxu1 }
 0x126   : > { %v712_v0 = vmax.f32 %v409_v60, %v659_v61 }
 0x127   : > { %1407 = vst.msk [vmem:[%s2127_s29 + $0x40] sm:$0xf] %vm1390_vm3, %v1374_v58  ;;  %v1275_v62 = vmax.f32 %v993_v59, %v1220_v57 }
 0x129   : > { %v1311_v63 = vadd.f32 %v2120_v50, %v1275_v62 }
 0x12b   : > { %v1343_v1 = vmax.f32 %v1311_v63, 0.0 }
 0x12c   : > { %v941_v2 = vpop.f32.mrf.mxu2  ;;  %v1223_v3 = vpop.f32.mrf.mxu3 }
 0x12d   : > { %v1375_v4 = vpack.c.bf16 %v1343_v1, %v1343_v1  ;;  %v994_v5 = vmax.f32 %v712_v0, %v941_v2  ;;  %v411_v6 = vpop.f32.mrf.mxu0  ;;  %v661_v7 = vpop.f32.mrf.mxu1 }
 0x12e   : > { %v713_v11 = vmax.f32 %v411_v6, %v661_v7 }
 0x12f   : > { %1408 = vst.msk [vmem:[%s2127_s29 + $0x44] sm:$0xf] %vm1390_vm3, %v1375_v4  ;;  %v1276_v8 = vmax.f32 %v994_v5, %v1223_v3 }
 0x131   : > { %v1312_v9 = vadd.f32 %v2120_v50, %v1276_v8 }
 0x133   : > { %v1344_v10 = vmax.f32 %v1312_v9, 0.0 }
 0x134   : > { %v943_v12 = vpop.f32.mrf.mxu2  ;;  %v1225_v13 = vpop.f32.mrf.mxu3 }
 0x135   : > { %v1376_v14 = vpack.c.bf16 %v1344_v10, %v1344_v10  ;;  %v995_v15 = vmax.f32 %v713_v11, %v943_v12  ;;  %v414_v16 = vpop.f32.mrf.mxu0  ;;  %v664_v17 = vpop.f32.mrf.mxu1 }
 0x136   : > { %v714_v20 = vmax.f32 %v414_v16, %v664_v17 }
 0x137   : > { %1409 = vst.msk [vmem:[%s2127_s29 + $0x48] sm:$0xf] %vm1390_vm3, %v1376_v14  ;;  %v1277_v18 = vmax.f32 %v995_v15, %v1225_v13 }
 0x139   : > { %v1313_v19 = vadd.f32 %v2120_v50, %v1277_v18 }
 0x13b   : > { %v1345_v21 = vmax.f32 %v1313_v19, 0.0 }
 0x13c   : > { %v946_v22 = vpop.f32.mrf.mxu2  ;;  %v1228_v23 = vpop.f32.mrf.mxu3 }
 0x13d   : > { %v1377_v24 = vpack.c.bf16 %v1345_v21, %v1345_v21  ;;  %v996_v25 = vmax.f32 %v714_v20, %v946_v22  ;;  %v416_v26 = vpop.f32.mrf.mxu0  ;;  %v666_v27 = vpop.f32.mrf.mxu1 }
 0x13e   : > { %v715_v31 = vmax.f32 %v416_v26, %v666_v27 }
 0x13f   : > { %1410 = vst.msk [vmem:[%s2127_s29 + $0x4c] sm:$0xf] %vm1390_vm3, %v1377_v24  ;;  %v1278_v28 = vmax.f32 %v996_v25, %v1228_v23 }
 0x141   : > { %v1314_v29 = vadd.f32 %v2120_v50, %v1278_v28 }
 0x143   : > { %v1346_v30 = vmax.f32 %v1314_v29, 0.0 }
 0x144   : > { %v948_v32 = vpop.f32.mrf.mxu2  ;;  %v1230_v33 = vpop.f32.mrf.mxu3 }
 0x145   : > { %v1378_v34 = vpack.c.bf16 %v1346_v30, %v1346_v30  ;;  %v997_v35 = vmax.f32 %v715_v31, %v948_v32  ;;  %v419_v36 = vpop.f32.mrf.mxu0  ;;  %v669_v37 = vpop.f32.mrf.mxu1 }
 0x146   : > { %v716_v40 = vmax.f32 %v419_v36, %v669_v37 }
 0x147   : > { %1411 = vst.msk [vmem:[%s2127_s29 + $0x50] sm:$0xf] %vm1390_vm3, %v1378_v34  ;;  %v1279_v38 = vmax.f32 %v997_v35, %v1230_v33 }
 0x149   : > { %v1315_v39 = vadd.f32 %v2120_v50, %v1279_v38 }
 0x14b   : > { %v1347_v41 = vmax.f32 %v1315_v39, 0.0 }
 0x14c   : > { %v951_v42 = vpop.f32.mrf.mxu2  ;;  %v1233_v43 = vpop.f32.mrf.mxu3 }
 0x14d   : > { %v1379_v44 = vpack.c.bf16 %v1347_v41, %v1347_v41  ;;  %v998_v45 = vmax.f32 %v716_v40, %v951_v42  ;;  %v421_v46 = vpop.f32.mrf.mxu0  ;;  %v671_v47 = vpop.f32.mrf.mxu1 }
 0x14e   : > { %v717_v52 = vmax.f32 %v421_v46, %v671_v47 }
 0x14f   : > { %1412 = vst.msk [vmem:[%s2127_s29 + $0x54] sm:$0xf] %vm1390_vm3, %v1379_v44  ;;  %v1280_v48 = vmax.f32 %v998_v45, %v1233_v43 }
 0x151   : > { %v1316_v49 = vadd.f32 %v2120_v50, %v1280_v48 }
 0x153   : > { %v1348_v51 = vmax.f32 %v1316_v49, 0.0 }
 0x154   : > { %v953_v53 = vpop.f32.mrf.mxu2  ;;  %v1235_v54 = vpop.f32.mrf.mxu3 }
 0x155   : > { %v1380_v55 = vpack.c.bf16 %v1348_v51, %v1348_v51  ;;  %v999_v56 = vmax.f32 %v717_v52, %v953_v53  ;;  %v424_v57 = vpop.f32.mrf.mxu0  ;;  %v674_v58 = vpop.f32.mrf.mxu1 }
 0x156   : > { %v718_v61 = vmax.f32 %v424_v57, %v674_v58 }
 0x157   : > { %1413 = vst.msk [vmem:[%s2127_s29 + $0x58] sm:$0xf] %vm1390_vm3, %v1380_v55  ;;  %v1281_v59 = vmax.f32 %v999_v56, %v1235_v54 }
 0x159   : > { %v1317_v60 = vadd.f32 %v2120_v50, %v1281_v59 }
 0x15b   : > { %v1349_v62 = vmax.f32 %v1317_v60, 0.0 }
 0x15c   : > { %v956_v63 = vpop.f32.mrf.mxu2  ;;  %v1238_v0 = vpop.f32.mrf.mxu3 }
 0x15d   : > { %v1381_v1 = vpack.c.bf16 %v1349_v62, %v1349_v62  ;;  %v1000_v2 = vmax.f32 %v718_v61, %v956_v63  ;;  %v426_v3 = vpop.f32.mrf.mxu0  ;;  %v676_v4 = vpop.f32.mrf.mxu1 }
 0x15e   : > { %v719_v8 = vmax.f32 %v426_v3, %v676_v4 }
 0x15f   : > { %1414 = vst.msk [vmem:[%s2127_s29 + $0x5c] sm:$0xf] %vm1390_vm3, %v1381_v1  ;;  %v1282_v5 = vmax.f32 %v1000_v2, %v1238_v0 }
 0x161   : > { %v1318_v6 = vadd.f32 %v2120_v50, %v1282_v5 }
 0x163   : > { %v1350_v7 = vmax.f32 %v1318_v6, 0.0 }
 0x164   : > { %v958_v9 = vpop.f32.mrf.mxu2  ;;  %v1240_v10 = vpop.f32.mrf.mxu3 }
 0x165   : > { %v1382_v11 = vpack.c.bf16 %v1350_v7, %v1350_v7  ;;  %v1001_v12 = vmax.f32 %v719_v8, %v958_v9  ;;  %v429_v13 = vpop.f32.mrf.mxu0  ;;  %v679_v14 = vpop.f32.mrf.mxu1 }
 0x166   : > { %v720_v17 = vmax.f32 %v429_v13, %v679_v14 }
 0x167   : > { %1415 = vst.msk [vmem:[%s2127_s29 + $0x60] sm:$0xf] %vm1390_vm3, %v1382_v11  ;;  %v1283_v15 = vmax.f32 %v1001_v12, %v1240_v10 }
 0x169   : > { %v1319_v16 = vadd.f32 %v2120_v50, %v1283_v15 }
 0x16b   : > { %v1351_v18 = vmax.f32 %v1319_v16, 0.0 }
 0x16c   : > { %v961_v19 = vpop.f32.mrf.mxu2  ;;  %v1243_v20 = vpop.f32.mrf.mxu3 }
 0x16d   : > { %v1383_v21 = vpack.c.bf16 %v1351_v18, %v1351_v18  ;;  %v1002_v22 = vmax.f32 %v720_v17, %v961_v19  ;;  %v431_v23 = vpop.f32.mrf.mxu0  ;;  %v681_v24 = vpop.f32.mrf.mxu1 }
 0x16e   : > { %v721_v28 = vmax.f32 %v431_v23, %v681_v24 }
 0x16f   : > { %1416 = vst.msk [vmem:[%s2127_s29 + $0x64] sm:$0xf] %vm1390_vm3, %v1383_v21  ;;  %v1284_v25 = vmax.f32 %v1002_v22, %v1243_v20 }
 0x171   : > { %v1320_v26 = vadd.f32 %v2120_v50, %v1284_v25 }
 0x173   : > { %v1352_v27 = vmax.f32 %v1320_v26, 0.0 }
 0x174   : > { %v963_v29 = vpop.f32.mrf.mxu2  ;;  %v1245_v30 = vpop.f32.mrf.mxu3 }
 0x175   : > { %v1384_v31 = vpack.c.bf16 %v1352_v27, %v1352_v27  ;;  %v1003_v32 = vmax.f32 %v721_v28, %v963_v29  ;;  %v434_v33 = vpop.f32.mrf.mxu0  ;;  %v684_v34 = vpop.f32.mrf.mxu1 }
 0x176   : > { %v722_v37 = vmax.f32 %v434_v33, %v684_v34 }
 0x177   : > { %1417 = vst.msk [vmem:[%s2127_s29 + $0x68] sm:$0xf] %vm1390_vm3, %v1384_v31  ;;  %v1285_v35 = vmax.f32 %v1003_v32, %v1245_v30 }
 0x179   : > { %v1321_v36 = vadd.f32 %v2120_v50, %v1285_v35 }
 0x17b   : > { %v1353_v38 = vmax.f32 %v1321_v36, 0.0 }
 0x17c   : > { %v966_v39 = vpop.f32.mrf.mxu2  ;;  %v1248_v40 = vpop.f32.mrf.mxu3 }
 0x17d   : > { %v1385_v41 = vpack.c.bf16 %v1353_v38, %v1353_v38  ;;  %v1004_v42 = vmax.f32 %v722_v37, %v966_v39  ;;  %v436_v43 = vpop.f32.mrf.mxu0  ;;  %v686_v44 = vpop.f32.mrf.mxu1 }
 0x17e   : > { %v723_v48 = vmax.f32 %v436_v43, %v686_v44 }
 0x17f   : > { %1418 = vst.msk [vmem:[%s2127_s29 + $0x6c] sm:$0xf] %vm1390_vm3, %v1385_v41  ;;  %v1286_v45 = vmax.f32 %v1004_v42, %v1248_v40 }
 0x181   : > { %v1322_v46 = vadd.f32 %v2120_v50, %v1286_v45 }
 0x183   : > { %v1354_v47 = vmax.f32 %v1322_v46, 0.0 }
 0x184   : > { %v968_v49 = vpop.f32.mrf.mxu2  ;;  %v1250_v51 = vpop.f32.mrf.mxu3 }
 0x185   : > { %v1386_v52 = vpack.c.bf16 %v1354_v47, %v1354_v47  ;;  %v1005_v53 = vmax.f32 %v723_v48, %v968_v49  ;;  %v439_v54 = vpop.f32.mrf.mxu0  ;;  %v689_v55 = vpop.f32.mrf.mxu1 }
 0x186   : > { %v724_v58 = vmax.f32 %v439_v54, %v689_v55 }
 0x187   : > { %1419 = vst.msk [vmem:[%s2127_s29 + $0x70] sm:$0xf] %vm1390_vm3, %v1386_v52  ;;  %v1287_v56 = vmax.f32 %v1005_v53, %v1250_v51 }
 0x189   : > { %v1323_v57 = vadd.f32 %v2120_v50, %v1287_v56 }
 0x18b   : > { %v1355_v59 = vmax.f32 %v1323_v57, 0.0 }
 0x18c   : > { %v971_v60 = vpop.f32.mrf.mxu2  ;;  %v1253_v61 = vpop.f32.mrf.mxu3 }
 0x18d   : > { %v1387_v62 = vpack.c.bf16 %v1355_v59, %v1355_v59  ;;  %v1006_v63 = vmax.f32 %v724_v58, %v971_v60  ;;  %v441_v1 = vpop.f32.mrf.mxu0  ;;  %v691_v2 = vpop.f32.mrf.mxu1 }
 0x18e   : > { %v725_v5 = vmax.f32 %v441_v1, %v691_v2 }
 0x18f   : > { %1420 = vst.msk [vmem:[%s2127_s29 + $0x74] sm:$0xf] %vm1390_vm3, %v1387_v62  ;;  %v1288_v0 = vmax.f32 %v1006_v63, %v1253_v61 }
 0x191   : > { %v1324_v3 = vadd.f32 %v2120_v50, %v1288_v0 }
 0x193   : > { %v1356_v4 = vmax.f32 %v1324_v3, 0.0 }
 0x194   : > { %v973_v6 = vpop.f32.mrf.mxu2  ;;  %v1255_v9 = vpop.f32.mrf.mxu3 }
 0x195   : > { %v1388_v7 = vpack.c.bf16 %v1356_v4, %v1356_v4  ;;  %v1007_v8 = vmax.f32 %v725_v5, %v973_v6 }
 0x197   : > { %1421 = vst.msk [vmem:[%s2127_s29 + $0x78] sm:$0xf] %vm1390_vm3, %v1388_v7  ;;  %v1289_v10 = vmax.f32 %v1007_v8, %v1255_v9 }
 0x199   : > { %v1325_v11 = vadd.f32 %v2120_v50, %v1289_v10 }
 0x19b   : > { %v1357_v12 = vmax.f32 %v1325_v11, 0.0 }
 0x19d   : > { %v1389_v13 = vpack.c.bf16 %v1357_v12, %v1357_v12 }
 0x19f   : > { %1422 = vst.msk [vmem:[%s2127_s29 + $0x7c] sm:$0xf] %vm1390_vm3, %v1389_v13 }
 0x1a0 PF: > { %s13_s12 = sadd.s32 1, %s1997_s12  }
 0x1a1   : > { %p10_p4 = scmp.ge.s32.totalorder %s13_s12, 4  }
 0x1a3   :  { %12 = sbr.rel (!%p10_p4) target bundleno = 1 (0x1), region = 65 }

// kernel: svhn_forward.4
= control target key start
LH: loop header
LB: loop body
LE: loop exit
PB: predicated region body
PF: predicated region fallthrough
CT: control target
= control target key end

     0   :  { %s1579_s12 = smov 0   ;;  %s2015_s0 = inlined_call_operand.vmem [shape: bf16[2,4,64,288], index: 0, kind: input, shape index: {}]   ;;  %s2016_s1 = inlined_call_operand.vmem [shape: bf16[288,64], index: 1, kind: input, shape index: {}]   ;;  %s2017_s2 = inlined_call_operand.vmem [shape: f32[1,64], index: 2, kind: input, shape index: {}]   ;;  %s2018_s3 = inlined_call_operand.vmem [shape: bf16[2,64,64], index: 3, kind: output, shape index: {}]  }
   0x1 LB: > { %s1136_s13 = sadd.s32 4294967295, %s1557_s12   ;;  %p1140_p0 = scmp.ge.s32.totalorder %s1557_s12, 1  ;;  %s1557_s12 = sphi %s1579_s12, %s13_s12  }
   0x2   : > { %p137_p1 = scmp.lt.s32.totalorder %s1557_s12, 3 }
   0x4   : > { %p138_p2 = pnand %p1140_p0, %p137_p1 }
   0x5   : > { %p161_p3 = scmp.lt.s32.totalorder (!%p138_p2), %s1136_s13, 1 }
   0x6   : > { %141 = sbr.rel (%p138_p2) target bundleno = 373 (0x175), region = 32 }
   0xb   : > { %v1590_v0 = vld [vmem:[%s2016_s1 + $0x38] sm:$0xff]  ;;  %v1600_v2 = vld [vmem:[%s2016_s1 + $0x88] sm:$0xff]  ;;  %v1607_v3 = vld [vmem:[%s2016_s1 + $0x30] sm:$0xff]  ;;  %s2020_s13 = smov (!%p161_p3, %s1136_s13), 1  ;;  %vm392_vm0 = vcmask 261120   ;;  %vm1072_vm1 = vcmask 519168  }
   0xc   : > { %v1595_v1 = vld [vmem:[%s2016_s1 + $0x78] sm:$0xff]  ;;  %405 = vmatpush.bf16.msra.mxu0 %v1590_v0  ;;  %v1612_v4 = vld [vmem:[%s2016_s1 + $0x70] sm:$0xff]  ;;  %469 = vmatpush.bf16.msra.mxu2 %v1600_v2  ;;  %v1621_v5 = vld [vmem:[%s2016_s1 + $0x80] sm:$0xff]  ;;  %s1541_s26 = smul.u32 384, %s2020_s13  ;;  %s1474_s4 = sshll.u32 %s2020_s13, 5 }
   0xd   : > { %434 = vmatpush.bf16.msra.mxu1 %v1595_v1  ;;  %581 = vmatpush.bf16.msra.mxu3 %v1590_v0  ;;  %v1634_v6 = vld [vmem:[%s2016_s1 + $0x28] sm:$0xff]  ;;  %v1651_v11 = vld [vmem:[%s2016_s1 + $0x20] sm:$0xff]  ;;  %v1665_v13 = vld [vmem:[%s2016_s1 + $0x18] sm:$0xff]  ;;  %s1955_s7 = scalar_lea.vmem %s2018_s3, %s1474_s4 }
   0xe   : > { %s1629_s29 = scalar_lea.vmem %s2015_s0, %s1541_s26  ;;  %v1643_v9 = vld [vmem:[%s2016_s1 + $0x68] sm:$0xff]  ;;  %v1658_v12 = vld [vmem:[%s2016_s1 + $0x60] sm:$0xff]  ;;  %v1672_v14 = vld [vmem:[%s2016_s1 + $0x58] sm:$0xff] }
   0xf   : > { %v1154_v7 = vld [vmem:[%s1629_s29 + $0x8] sm:$0xf]  ;;  %v1495_v8 = vld [vmem:[%s1629_s29 + $0x10] sm:$0xf0]  ;;  %v1166_v17 = vld [vmem:[%s1629_s29 + $0x20] sm:$0xf] }
  0x10   : > { %406 = vmatpush.bf16.msra.mxu0 %v1607_v3  ;;  %470 = vmatpush.bf16.msra.mxu2 %v1621_v5  ;;  %v1155_v10 = vor.u32 %v1495_v8, %v1154_v7  ;;  %v1679_v15 = vld [vmem:[%s2016_s1 + $0x10] sm:$0xff]  ;;  %v1498_v18 = vld [vmem:[%s1629_s29 + $0x28] sm:$0xf0]  ;;  %v1708_v22 = vld [vmem:[%s2016_s1] sm:$0xff] }
  0x11   : > { %435 = vmatpush.bf16.msra.mxu1 %v1612_v4  ;;  %582 = vmatpush.bf16.msra.mxu3 %v1607_v3  ;;  %v1686_v16 = vld [vmem:[%s2016_s1 + $0x50] sm:$0xff]  ;;  %v1167_v19 = vor.u32 %v1498_v18, %v1166_v17  ;;  %v1695_v20 = vld [vmem:[%s2016_s1 + $0x8] sm:$0xff]  ;;  %v1713_v23 = vld [vmem:[%s2016_s1 + $0x40] sm:$0xff] }
  0x12   : > { %v1702_v21 = vld [vmem:[%s2016_s1 + $0x48] sm:$0xff]  ;;  %v1146_v24 = vld [vmem:[%s1629_s29] sm:$0xf]  ;;  %v1493_v26 = vld [vmem:[%s1629_s29 + $0x4] sm:$0xf] }
  0x13   : > { %1264 = vmatmul.msk.bf16.vlgmr.msra.gmra.mxu2 %vm392_vm0, %v1155_v10  ;;  %v1494_v25 = vld [vmem:[%s1629_s29 + $0x8] sm:$0xf0]  ;;  %v1148_v27 = vld [vmem:[%s1629_s29 + $0xc] sm:$0xf0]  ;;  %v1286_v28 = vld [vmem:[%s1629_s29 + $0x60] sm:$0xf] }
  0x14   : > { %610 = vmatpush.bf16.msrb.mxu2 %v1595_v1  ;;  %407 = vmatpush.bf16.msra.mxu0 %v1634_v6  ;;  %v1506_v29 = vld [vmem:[%s1629_s29 + $0x68] sm:$0xf0]  ;;  %v1147_v30 = vor.u32 %v1494_v25, %v1146_v24  ;;  %v1151_v31 = vor.u32 %v1493_v26, %v1148_v27  ;;  %v1178_v33 = vld [vmem:[%s1629_s29 + $0x38] sm:$0xf]  ;;  %v1501_v34 = vld [vmem:[%s1629_s29 + $0x40] sm:$0xf0] }
  0x15   : > { %436 = vmatpush.bf16.msra.mxu1 %v1643_v9  ;;  %583 = vmatpush.bf16.msra.mxu3 %v1634_v6  ;;  %v1287_v32 = vor.u32 %v1506_v29, %v1286_v28  ;;  %v1179_v35 = vor.u32 %v1501_v34, %v1178_v33  ;;  %v1158_v36 = vld [vmem:[%s1629_s29 + $0x18] sm:$0xf]  ;;  %v1497_v37 = vld [vmem:[%s1629_s29 + $0x20] sm:$0xf0]  ;;  %v1496_v38 = vld [vmem:[%s1629_s29 + $0x1c] sm:$0xf] }
  0x16   : > { %v1160_v39 = vld [vmem:[%s1629_s29 + $0x24] sm:$0xf0]  ;;  %v1298_v40 = vld [vmem:[%s1629_s29 + $0x78] sm:$0xf]  ;;  %v1509_v41 = vld [vmem:[%s1629_s29 + $0x80] sm:$0xf0]  ;;  %v1159_v42 = vor.u32 %v1497_v37, %v1158_v36 }
  0x17   : > { %v1163_v43 = vor.u32 %v1496_v38, %v1160_v39  ;;  %v1299_v44 = vor.u32 %v1509_v41, %v1298_v40  ;;  %v1190_v45 = vld [vmem:[%s1629_s29 + $0x50] sm:$0xf]  ;;  %v1504_v46 = vld [vmem:[%s1629_s29 + $0x58] sm:$0xf0]  ;;  %v1499_v50 = vld [vmem:[%s1629_s29 + $0x34] sm:$0xf] }
  0x18   : > { %611 = vmatpush.bf16.msrb.mxu2 %v1612_v4  ;;  %408 = vmatpush.bf16.msra.mxu0 %v1651_v11  ;;  %v1191_v47 = vor.u32 %v1504_v46, %v1190_v45  ;;  %v1170_v48 = vld [vmem:[%s1629_s29 + $0x30] sm:$0xf]  ;;  %v1500_v49 = vld [vmem:[%s1629_s29 + $0x38] sm:$0xf0]  ;;  %v1172_v51 = vld [vmem:[%s1629_s29 + $0x3c] sm:$0xf0] }
  0x19   : > { %437 = vmatpush.bf16.msra.mxu1 %v1658_v12  ;;  %584 = vmatpush.bf16.msra.mxu3 %v1651_v11  ;;  %v1310_v52 = vld [vmem:[%s1629_s29 + $0x90] sm:$0xf]  ;;  %v1512_v53 = vld [vmem:[%s1629_s29 + $0x98] sm:$0xf0]  ;;  %v1171_v54 = vor.u32 %v1500_v49, %v1170_v48  ;;  %v1175_v55 = vor.u32 %v1499_v50, %v1172_v51  ;;  %v1505_v57 = vld [vmem:[%s1629_s29 + $0x64] sm:$0xf] }
  0x1a   : > { %v1311_v56 = vor.u32 %v1512_v53, %v1310_v52  ;;  %v1288_v58 = vld [vmem:[%s1629_s29 + $0x6c] sm:$0xf0]  ;;  %v1182_v60 = vld [vmem:[%s1629_s29 + $0x48] sm:$0xf]  ;;  %v1503_v61 = vld [vmem:[%s1629_s29 + $0x50] sm:$0xf0] }
  0x1b   : > { %v1291_v59 = vor.u32 %v1505_v57, %v1288_v58  ;;  %v1502_v62 = vld [vmem:[%s1629_s29 + $0x4c] sm:$0xf]  ;;  %v1184_v63 = vld [vmem:[%s1629_s29 + $0x54] sm:$0xf0]  ;;  %v1294_v8 = vld [vmem:[%s1629_s29 + $0x68] sm:$0xf] }
  0x1c   : > { %612 = vmatpush.bf16.msrb.mxu2 %v1643_v9  ;;  %409 = vmatpush.bf16.msra.mxu0 %v1665_v13  ;;  %v1354_v10 = vld [vmem:[%s1629_s29 + $0xc0] sm:$0xf]  ;;  %v1511_v17 = vld [vmem:[%s1629_s29 + $0x94] sm:$0xf]  ;;  %v1520_v24 = vld [vmem:[%s1629_s29 + $0xdc] sm:$0xf] }
  0x1d   : > { %438 = vmatpush.bf16.msra.mxu1 %v1672_v14  ;;  %585 = vmatpush.bf16.msra.mxu3 %v1665_v13  ;;  %v1312_v18 = vld [vmem:[%s1629_s29 + $0x9c] sm:$0xf0]  ;;  %v1368_v25 = vld [vmem:[%s1629_s29 + $0xe4] sm:$0xf0]  ;;  %v1514_v29 = vld [vmem:[%s1629_s29 + $0xac] sm:$0xf] }
  0x1e   : > { %v1371_v28 = vor.u32 %v1520_v24, %v1368_v25  ;;  %v1513_v33 = vld [vmem:[%s1629_s29 + $0xa0] sm:$0xf0]  ;;  %v1378_v34 = vld [vmem:[%s1629_s29 + $0xf0] sm:$0xf]  ;;  %v1523_v36 = vld [vmem:[%s1629_s29 + $0xf4] sm:$0xf] }
  0x1f   : > { %v1380_v37 = vld [vmem:[%s1629_s29 + $0xfc] sm:$0xf0]  ;;  %v1362_v41 = vld [vmem:[%s1629_s29 + $0xc8] sm:$0xf]  ;;  %v1516_v45 = vld [vmem:[%s1629_s29 + $0xb8] sm:$0xf0] }
  0x20   : > { %613 = vmatpush.bf16.msrb.mxu2 %v1658_v12  ;;  %410 = vmatpush.bf16.msra.mxu0 %v1679_v15  ;;  %v1383_v40 = vor.u32 %v1523_v36, %v1380_v37  ;;  %v1390_v46 = vld [vmem:[%s1629_s29 + $0x108] sm:$0xf]  ;;  %v1526_v48 = vld [vmem:[%s1629_s29 + $0x10c] sm:$0xf]  ;;  %v1392_v49 = vld [vmem:[%s1629_s29 + $0x114] sm:$0xf0] }
  0x21   : > { %439 = vmatpush.bf16.msra.mxu1 %v1686_v16  ;;  %586 = vmatpush.bf16.msra.mxu3 %v1679_v15  ;;  %v1395_v53 = vor.u32 %v1526_v48, %v1392_v49  ;;  %v1422_v58 = vld [vmem:[%s1629_s29 + $0x120] sm:$0xf] }
  0x23   : > { %1265 = vmatmul.msk.bf16.gmra.mxu2 %vm392_vm0, %v1167_v19  ;;  %v1315_v19 = vor.u32 %v1511_v17, %v1312_v18  ;;  %v1434_v17 = vld [vmem:[%s1629_s29 + $0x138] sm:$0xf]  ;;  %v1533_v18 = vld [vmem:[%s1629_s29 + $0x140] sm:$0xf0] }
  0x24   : > { %614 = vmatpush.bf16.msrb.mxu2 %v1672_v14  ;;  %411 = vmatpush.bf16.msra.mxu0 %v1695_v20  ;;  %v1435_v25 = vor.u32 %v1533_v18, %v1434_v17 }
  0x25   : > { %440 = vmatpush.bf16.msra.mxu1 %v1702_v21  ;;  %587 = vmatpush.bf16.msra.mxu3 %v1695_v20 }
  0x28   : > { %615 = vmatpush.bf16.msrb.mxu2 %v1686_v16  ;;  %412 = vmatpush.bf16.msra.mxu0 %v1708_v22 }
  0x29   : > { %441 = vmatpush.bf16.msra.mxu1 %v1713_v23  ;;  %588 = vmatpush.bf16.msra.mxu3 %v1708_v22 }
  0x2b   : > { %413 = vmatmul.bf16.vlgmr.msra.gmra.mxu0 %v1147_v30  ;;  %v1324_v30 = vld [vmem:[%s1629_s29 + $0xb4] sm:$0xf0] }
  0x2c   : > { %645 = vmatpush.bf16.msrb.mxu0 %v1600_v2  ;;  %442 = vmatmul.bf16.vlgmr.msra.gmra.mxu1 %v1151_v31  ;;  %v1327_v31 = vor.u32 %v1514_v29, %v1324_v30 }
  0x2d   : > { %794 = vmatpush.bf16.msrb.mxu3 %v1595_v1  ;;  %765 = vmatpush.bf16.msrb.mxu1 %v1590_v0 }
  0x2e   : > { %589 = vmatmul.bf16.vlgmr.msra.gmra.mxu3 %v1287_v32  ;;  %616 = vmatpush.bf16.msrb.mxu2 %v1702_v21  ;;  %v1318_v32 = vld [vmem:[%s1629_s29 + $0x98] sm:$0xf] }
  0x2f   : > { %v1319_v38 = vor.u32 %v1513_v33, %v1318_v32  ;;  %v1398_v32 = vld [vmem:[%s1629_s29 + $0x110] sm:$0xf]  ;;  %v1528_v33 = vld [vmem:[%s1629_s29 + $0x118] sm:$0xf0] }
  0x30   : > { %646 = vmatpush.bf16.msrb.mxu0 %v1621_v5  ;;  %v1399_v37 = vor.u32 %v1528_v33, %v1398_v32 }
  0x31   : > { %795 = vmatpush.bf16.msrb.mxu3 %v1612_v4  ;;  %766 = vmatpush.bf16.msrb.mxu1 %v1607_v3 }
  0x32   : > { %617 = vmatpush.bf16.msrb.mxu2 %v1713_v23 }
  0x33   : > { %1266 = vmatmul.msk.bf16.gmra.mxu2 %vm392_vm0, %v1179_v35  ;;  %v1524_v35 = vld [vmem:[%s1629_s29 + $0xf8] sm:$0xf0] }
  0x34   : > { %949 = vmatpush.bf16.msra.mxu0 %v1590_v0  ;;  %v1322_v0 = vld [vmem:[%s1629_s29 + $0xa8] sm:$0xf]  ;;  %v1379_v39 = vor.u32 %v1524_v35, %v1378_v34 }
  0x35   : > { %796 = vmatpush.bf16.msrb.mxu3 %v1643_v9  ;;  %767 = vmatpush.bf16.msrb.mxu1 %v1634_v6 }
  0x36   : > { %829 = vmatpush.bf16.msra.mxu2 %v1600_v2 }
  0x38   : > { %950 = vmatpush.bf16.msra.mxu0 %v1607_v3  ;;  %v1187_v3 = vor.u32 %v1502_v62, %v1184_v63  ;;  %v1430_v62 = vld [vmem:[%s1629_s29 + $0x128] sm:$0xf]  ;;  %v1531_v63 = vld [vmem:[%s1629_s29 + $0x130] sm:$0xf0] }
  0x39   : > { %797 = vmatpush.bf16.msrb.mxu3 %v1658_v12  ;;  %768 = vmatpush.bf16.msrb.mxu1 %v1651_v11 }
  0x3a   : > { %830 = vmatpush.bf16.msra.mxu2 %v1621_v5 }
  0x3b   : > { %418 = vmatmul.bf16.gmra.mxu0 %v1159_v42  ;;  %v1519_v42 = vld [vmem:[%s1629_s29 + $0xd0] sm:$0xf0] }
  0x3c   : > { %951 = vmatpush.bf16.msra.mxu0 %v1634_v6  ;;  %447 = vmatmul.bf16.gmra.mxu1 %v1163_v43  ;;  %v1300_v6 = vld [vmem:[%s1629_s29 + $0x84] sm:$0xf0]  ;;  %v1363_v43 = vor.u32 %v1519_v42, %v1362_v41  ;;  %v1446_v41 = vld [vmem:[%s1629_s29 + $0x150] sm:$0xf]  ;;  %v1536_v42 = vld [vmem:[%s1629_s29 + $0x158] sm:$0xf0] }
  0x3d   : > { %798 = vmatpush.bf16.msrb.mxu3 %v1672_v14  ;;  %769 = vmatpush.bf16.msrb.mxu1 %v1665_v13  ;;  %v1447_v49 = vor.u32 %v1536_v42, %v1446_v41 }
  0x3e   : > { %594 = vmatmul.bf16.gmra.mxu3 %v1299_v44  ;;  %v1330_v44 = vld [vmem:[%s1629_s29 + $0xb0] sm:$0xf] }
  0x3f   : > { %v1331_v51 = vor.u32 %v1516_v45, %v1330_v44  ;;  %v1448_v44 = vld [vmem:[%s1629_s29 + $0x15c] sm:$0xf0]  ;;  %v1454_v45 = vld [vmem:[%s1629_s29 + $0x158] sm:$0xf] }
  0x40   : > { %952 = vmatpush.bf16.msra.mxu0 %v1651_v11  ;;  %v1518_v11 = vld [vmem:[%s1629_s29 + $0xc8] sm:$0xf0] }
  0x41   : > { %799 = vmatpush.bf16.msrb.mxu3 %v1686_v16  ;;  %770 = vmatpush.bf16.msrb.mxu1 %v1679_v15 }
  0x43   : > { %1267 = vmatmul.msk.bf16.gmra.mxu2 %vm392_vm0, %v1191_v47  ;;  %v1527_v47 = vld [vmem:[%s1629_s29 + $0x110] sm:$0xf0] }
  0x44   : > { %953 = vmatpush.bf16.msra.mxu0 %v1665_v13  ;;  %v1356_v13 = vld [vmem:[%s1629_s29 + $0xcc] sm:$0xf0]  ;;  %v1391_v52 = vor.u32 %v1527_v47, %v1390_v46  ;;  %v1537_v46 = vld [vmem:[%s1629_s29 + $0x160] sm:$0xf0] }
  0x45   : > { %800 = vmatpush.bf16.msrb.mxu3 %v1702_v21  ;;  %771 = vmatpush.bf16.msrb.mxu1 %v1695_v20 }
  0x48   : > { %954 = vmatpush.bf16.msra.mxu0 %v1679_v15  ;;  %v1355_v15 = vor.u32 %v1518_v11, %v1354_v10 }
  0x49   : > { %801 = vmatpush.bf16.msrb.mxu3 %v1713_v23  ;;  %772 = vmatpush.bf16.msrb.mxu1 %v1708_v22 }
  0x4b   : > { %423 = vmatmul.bf16.gmra.mxu0 %v1171_v54  ;;  %v1374_v54 = vld [vmem:[%s1629_s29 + $0xe0] sm:$0xf] }
  0x4c   : > { %955 = vmatpush.bf16.msra.mxu0 %v1695_v20  ;;  %452 = vmatmul.bf16.gmra.mxu1 %v1175_v55  ;;  %v1306_v20 = vld [vmem:[%s1629_s29 + $0x80] sm:$0xf]  ;;  %v1522_v55 = vld [vmem:[%s1629_s29 + $0xe8] sm:$0xf0] }
  0x4d   : > { %1013 = vmatpush.bf16.msra.mxu3 %v1600_v2  ;;  %978 = vmatpush.bf16.msra.mxu1 %v1595_v1  ;;  %v1515_v1 = vld [vmem:[%s1629_s29 + $0xb0] sm:$0xf0]  ;;  %v1183_v2 = vor.u32 %v1503_v61, %v1182_v60  ;;  %v1375_v57 = vor.u32 %v1522_v55, %v1374_v54  ;;  %v1529_v60 = vld [vmem:[%s1629_s29 + $0x124] sm:$0xf]  ;;  %v1424_v61 = vld [vmem:[%s1629_s29 + $0x12c] sm:$0xf0] }
  0x4e   : > { %599 = vmatmul.bf16.gmra.mxu3 %v1311_v56 }
  0x50   : > { %956 = vmatpush.bf16.msra.mxu0 %v1708_v22  ;;  %v1366_v22 = vld [vmem:[%s1629_s29 + $0xd8] sm:$0xf] }
  0x51   : > { %1014 = vmatpush.bf16.msra.mxu3 %v1621_v5  ;;  %979 = vmatpush.bf16.msra.mxu1 %v1612_v4  ;;  %v1323_v4 = vor.u32 %v1515_v1, %v1322_v0  ;;  %v1508_v5 = vld [vmem:[%s1629_s29 + $0x7c] sm:$0xf] }
  0x52   : > { %v1303_v7 = vor.u32 %v1508_v5, %v1300_v6 }
  0x53   : > { %618 = vmatmul.bf16.vlgmr.msrb.gmra.mxu2 %v1291_v59  ;;  %v1530_v59 = vld [vmem:[%s1629_s29 + $0x128] sm:$0xf0] }
  0x54   : > { %v1423_v1 = vor.u32 %v1530_v59, %v1422_v58 }
  0x55   : > { %980 = vmatpush.bf16.msra.mxu1 %v1643_v9  ;;  %v1507_v9 = vld [vmem:[%s1629_s29 + $0x70] sm:$0xf0] }
  0x59   : > { %981 = vmatpush.bf16.msra.mxu1 %v1658_v12  ;;  %v1517_v12 = vld [vmem:[%s1629_s29 + $0xc4] sm:$0xf] }
  0x5b   : > { %428 = vmatmul.bf16.gmra.mxu0 %v1183_v2 }
  0x5c   : > { %457 = vmatmul.bf16.gmra.mxu1 %v1187_v3  ;;  %v1427_v3 = vor.u32 %v1529_v60, %v1424_v61 }
  0x5d   : > { %982 = vmatpush.bf16.msra.mxu1 %v1672_v14  ;;  %v1295_v14 = vor.u32 %v1507_v9, %v1294_v8  ;;  %v1386_v8 = vld [vmem:[%s1629_s29 + $0xf8] sm:$0xf]  ;;  %v1525_v9 = vld [vmem:[%s1629_s29 + $0x100] sm:$0xf0] }
  0x5e   : > { %604 = vmatmul.bf16.gmra.mxu3 %v1323_v4  ;;  %v1431_v4 = vor.u32 %v1531_v63, %v1430_v62  ;;  %v1458_v62 = vld [vmem:[%s1629_s29 + $0x168] sm:$0xf]  ;;  %v1539_v63 = vld [vmem:[%s1629_s29 + $0x170] sm:$0xf0] }
  0x61   : > { %983 = vmatpush.bf16.msra.mxu1 %v1686_v16  ;;  %v1359_v16 = vor.u32 %v1517_v12, %v1356_v13  ;;  %v1387_v13 = vor.u32 %v1525_v9, %v1386_v8 }
  0x63   : > { %623 = vmatmul.bf16.gmra.mxu2 %v1303_v7 }
  0x65   : > { %984 = vmatpush.bf16.msra.mxu1 %v1702_v21  ;;  %v1510_v21 = vld [vmem:[%s1629_s29 + $0x88] sm:$0xf0] }
  0x66   : > { %v1307_v26 = vor.u32 %v1510_v21, %v1306_v20  ;;  %v1436_v20 = vld [vmem:[%s1629_s29 + $0x144] sm:$0xf0]  ;;  %v1442_v21 = vld [vmem:[%s1629_s29 + $0x140] sm:$0xf] }
  0x69   : > { %985 = vmatpush.bf16.msra.mxu1 %v1713_v23  ;;  %v1521_v23 = vld [vmem:[%s1629_s29 + $0xe0] sm:$0xf0] }
  0x6a   : > { %v1367_v27 = vor.u32 %v1521_v23, %v1366_v22  ;;  %v1534_v22 = vld [vmem:[%s1629_s29 + $0x148] sm:$0xf0] }
  0x6b   : > { %1332 = vmatmul.msk.bf16.vlgmr.msrb.gmra.mxu0 %vm392_vm0, %v1295_v14 }
  0x6c   : > { %773 = vmatmul.bf16.vlgmr.msrb.gmra.mxu1 %v1355_v15 }
  0x6e   : > { %802 = vmatmul.bf16.vlgmr.msrb.gmra.mxu3 %v1359_v16 }
  0x73   : > { %628 = vmatmul.bf16.gmra.mxu2 %v1315_v19  ;;  %v1532_v19 = vld [vmem:[%s1629_s29 + $0x13c] sm:$0xf] }
  0x7b   : > { %1333 = vmatmul.msk.bf16.gmra.mxu0 %vm392_vm0, %v1307_v26 }
  0x7c   : > { %778 = vmatmul.bf16.gmra.mxu1 %v1367_v27  ;;  %v1439_v27 = vor.u32 %v1532_v19, %v1436_v20 }
  0x7e   : > { %807 = vmatmul.bf16.gmra.mxu3 %v1371_v28  ;;  %v1443_v28 = vor.u32 %v1534_v22, %v1442_v21 }
  0x83   : > { %633 = vmatmul.bf16.gmra.mxu2 %v1327_v31 }
  0x8b   : > { %1334 = vmatmul.msk.bf16.gmra.mxu0 %vm392_vm0, %v1319_v38 }
  0x8c   : > { %783 = vmatmul.bf16.gmra.mxu1 %v1379_v39 }
  0x8e   : > { %812 = vmatmul.bf16.gmra.mxu3 %v1383_v40 }
  0x93   : > { %1400 = vmatmul.msk.bf16.vlgmr.msra.gmra.mxu2 %vm392_vm0, %v1363_v43  ;;  %v1535_v43 = vld [vmem:[%s1629_s29 + $0x154] sm:$0xf] }
  0x96   : > { %v472_v50 = vpop.f32.mrf.mxu2 }
  0x9b   : > { %1335 = vmatmul.msk.bf16.gmra.mxu0 %vm392_vm0, %v1331_v51  ;;  %v1451_v51 = vor.u32 %v1535_v43, %v1448_v44 }
  0x9c   : > { %788 = vmatmul.bf16.gmra.mxu1 %v1391_v52  ;;  %v1455_v52 = vor.u32 %v1537_v46, %v1454_v45 }
  0x9e   : > { %817 = vmatmul.bf16.gmra.mxu3 %v1395_v53  ;;  %v474_v56 = vpop.f32.mrf.mxu2 }
  0xa3   : > { %1401 = vmatmul.msk.bf16.gmra.mxu2 %vm392_vm0, %v1375_v57 }
  0xa6   : > { %v477_v0 = vpop.f32.mrf.mxu2 }
  0xa8   : > { %v414_v2 = vpop.f32.mrf.mxu0 }
  0xa9   : > { %v443_v5 = vpop.f32.mrf.mxu1 }
  0xaa   : > { %v444_v6 = vadd.f32 %v443_v5, %v414_v2  ;;  %v1466_v2 = vld [vmem:[%s1629_s29 + $0x170] sm:$0xf] }
  0xab   : > { %957 = vmatmul.bf16.vlgmr.msra.gmra.mxu0 %v1423_v1  ;;  %v1460_v1 = vld [vmem:[%s1629_s29 + $0x174] sm:$0xf0] }
  0xac   : > { %v1841_v7 = vadd.f32 %v472_v50, %v444_v6  ;;  %986 = vmatmul.bf16.vlgmr.msra.gmra.mxu1 %v1427_v3  ;;  %v1540_v3 = vld [vmem:[%s1629_s29 + $0x178] sm:$0xf0]  ;;  %v1459_v6 = vor.u32 %v1539_v63, %v1458_v62 }
  0xae   : > { %1468 = vmatmul.msk.bf16.vlgmr.msra.gmra.mxu3 %vm392_vm0, %v1431_v4  ;;  %v479_v10 = vpop.f32.mrf.mxu2 }
  0xb0   : > { %v416_v12 = vpop.f32.mrf.mxu0 }
  0xb1   : > { %v1846_v11 = vpop.f32.mrf.mxu3  ;;  %v445_v14 = vpop.f32.mrf.mxu1 }
  0xb2   : > { %v446_v15 = vadd.f32 %v445_v14, %v416_v12 }
  0xb3   : > { %1402 = vmatmul.msk.bf16.gmra.mxu2 %vm392_vm0, %v1387_v13 }
  0xb4   : > { %v1848_v16 = vadd.f32 %v474_v56, %v446_v15 }
  0xb6   : > { %v482_v23 = vpop.f32.mrf.mxu2 }
  0xb8   : > { %v419_v26 = vpop.f32.mrf.mxu0 }
  0xb9   : > { %v1857_v24 = vpop.f32.mrf.mxu3  ;;  %v448_v29 = vpop.f32.mrf.mxu1 }
  0xba   : > { %v449_v30 = vadd.f32 %v448_v29, %v419_v26 }
  0xbb   : > { %962 = vmatmul.bf16.gmra.mxu0 %v1435_v25 }
  0xbc   : > { %v1859_v31 = vadd.f32 %v477_v0, %v449_v30  ;;  %991 = vmatmul.bf16.gmra.mxu1 %v1439_v27  ;;  %v1538_v0 = vld [vmem:[%s1629_s29 + $0x16c] sm:$0xf] }
  0xbd   : > { %v1463_v9 = vor.u32 %v1538_v0, %v1460_v1 }
  0xbe   : > { %1469 = vmatmul.msk.bf16.gmra.mxu3 %vm392_vm0, %v1443_v28  ;;  %v484_v34 = vpop.f32.mrf.mxu2 }
  0xc0   : > { %v421_v36 = vpop.f32.mrf.mxu0 }
  0xc1   : > { %v1864_v35 = vpop.f32.mrf.mxu3  ;;  %v450_v38 = vpop.f32.mrf.mxu1 }
  0xc2   : > { %v451_v39 = vadd.f32 %v450_v38, %v421_v36 }
  0xc3   : > { %1403 = vmatmul.msk.bf16.gmra.mxu2 %vm392_vm0, %v1399_v37 }
  0xc4   : > { %v1866_v40 = vadd.f32 %v479_v10, %v451_v39  ;;  %v1467_v10 = vor.u32 %v1540_v3, %v1466_v2 }
  0xc6   : > { %v487_v47 = vpop.f32.mrf.mxu2 }
  0xc8   : > { %v424_v50 = vpop.f32.mrf.mxu0 }
  0xc9   : > { %v597_v48 = vpop.f32.mrf.mxu3  ;;  %v453_v53 = vpop.f32.mrf.mxu1 }
  0xca   : > { %v454_v54 = vadd.f32 %v453_v53, %v424_v50 }
  0xcb   : > { %967 = vmatmul.bf16.gmra.mxu0 %v1447_v49 }
  0xcc   : > { %v1875_v55 = vadd.f32 %v482_v23, %v454_v54  ;;  %996 = vmatmul.bf16.gmra.mxu1 %v1451_v51 }
  0xce   : > { %1470 = vmatmul.msk.bf16.gmra.mxu3 %vm392_vm0, %v1455_v52  ;;  %v489_v56 = vpop.f32.mrf.mxu2 }
  0xd0   : > { %v426_v58 = vpop.f32.mrf.mxu0 }
  0xd1   : > { %v600_v57 = vpop.f32.mrf.mxu3  ;;  %v455_v59 = vpop.f32.mrf.mxu1 }
  0xd2   : > { %v456_v60 = vadd.f32 %v455_v59, %v426_v58 }
  0xd4   : > { %v1878_v61 = vadd.f32 %v484_v34, %v456_v60 }
  0xd6   : > { %v619_v5 = vpop.f32.mrf.mxu2 }
  0xd7   : > { %v620_v22 = vadd.f32 %v619_v5, %v1846_v11 }
  0xd8   : > { %v429_v8 = vpop.f32.mrf.mxu0 }
  0xd9   : > { %v602_v4 = vpop.f32.mrf.mxu3  ;;  %v458_v12 = vpop.f32.mrf.mxu1 }
  0xda   : > { %v459_v13 = vadd.f32 %v458_v12, %v429_v8 }
  0xdb   : > { %972 = vmatmul.bf16.gmra.mxu0 %v1459_v6 }
  0xdc   : > { %v1886_v14 = vadd.f32 %v487_v47, %v459_v13  ;;  %1001 = vmatmul.bf16.gmra.mxu1 %v1463_v9 }
  0xde   : > { %1471 = vmatmul.msk.bf16.gmra.mxu3 %vm392_vm0, %v1467_v10  ;;  %v621_v17 = vpop.f32.mrf.mxu2 }
  0xdf   : > { %v622_v30 = vadd.f32 %v621_v17, %v1857_v24 }
  0xe0   : > { %v431_v18 = vpop.f32.mrf.mxu0 }
  0xe1   : > { %v605_v15 = vpop.f32.mrf.mxu3  ;;  %v460_v19 = vpop.f32.mrf.mxu1 }
  0xe2   : > { %v461_v20 = vadd.f32 %v460_v19, %v431_v18 }
  0xe4   : > { %v1889_v21 = vadd.f32 %v489_v56, %v461_v20 }
  0xe6   : > { %v624_v25 = vpop.f32.mrf.mxu2 }
  0xe7   : > { %v625_v11 = vadd.f32 %v624_v25, %v1864_v35 }
  0xe8   : > { %v648_v26 = vpop.f32.mrf.mxu0 }
  0xe9   : > { %v607_v23 = vpop.f32.mrf.mxu3  ;;  %v649_v27 = vadd.f32 %v648_v26, %v620_v22  ;;  %v774_v28 = vpop.f32.mrf.mxu1 }
  0xeb   : > { %v668_v29 = vmax.f32 %v1841_v7, %v649_v27 }
  0xee   : > { %v626_v32 = vpop.f32.mrf.mxu2 }
  0xef   : > { %v627_v24 = vadd.f32 %v626_v32, %v597_v48 }
  0xf0   : > { %v650_v34 = vpop.f32.mrf.mxu0 }
  0xf1   : > { %v803_v33 = vpop.f32.mrf.mxu3  ;;  %v1894_v36 = vadd.f32 %v650_v34, %v622_v30  ;;  %v776_v37 = vpop.f32.mrf.mxu1 }
  0xf2   : > { %v804_v26 = vadd.f32 %v803_v33, %v774_v28 }
  0xf3   : > { %v669_v38 = vmax.f32 %v1848_v16, %v1894_v36 }
  0xf6   : > { %v629_v39 = vpop.f32.mrf.mxu2 }
  0xf7   : > { %v630_v51 = vadd.f32 %v629_v39, %v600_v57  ;;  %v1948_v39 = vld [vmem:[%s2017_s2] ss:$0 sm:$0xff] }
  0xf8   : > { %v653_v42 = vpop.f32.mrf.mxu0 }
  0xf9   : > { %v805_v41 = vpop.f32.mrf.mxu3  ;;  %v1899_v43 = vadd.f32 %v653_v42, %v625_v11  ;;  %v1901_v44 = vpop.f32.mrf.mxu1 }
  0xfb   : > { %v670_v7 = vmax.f32 %v1859_v31, %v1899_v43 }
  0xfe   : > { %v631_v45 = vpop.f32.mrf.mxu2 }
  0xff   : > { %v632_v59 = vadd.f32 %v631_v45, %v602_v4  ;;  %v806_v45 = vadd.f32 %v805_v41, %v776_v37 }
 0x100   : > { %v655_v47 = vpop.f32.mrf.mxu0 }
 0x101   : > { %v808_v46 = vpop.f32.mrf.mxu3  ;;  %v1905_v49 = vadd.f32 %v655_v47, %v627_v24  ;;  %v1907_v50 = vpop.f32.mrf.mxu1 }
 0x103   : > { %v671_v35 = vmax.f32 %v1866_v40, %v1905_v49 }
 0x106   : > { %v634_v52 = vpop.f32.mrf.mxu2 }
 0x107   : > { %v635_v2 = vadd.f32 %v634_v52, %v605_v15 }
 0x108   : > { %v658_v54 = vpop.f32.mrf.mxu0 }
 0x109   : > { %v1911_v53 = vpop.f32.mrf.mxu3  ;;  %v1913_v56 = vadd.f32 %v658_v54, %v630_v51  ;;  %v1915_v58 = vpop.f32.mrf.mxu1 }
 0x10b   : > { %v672_v48 = vmax.f32 %v1875_v55, %v1913_v56 }
 0x10e   : > { %v636_v63 = vpop.f32.mrf.mxu2 }
 0x10f   : > { %v637_v10 = vadd.f32 %v636_v63, %v607_v23 }
 0x110   : > { %v660_v62 = vpop.f32.mrf.mxu0 }
 0x111   : > { %v1919_v60 = vpop.f32.mrf.mxu3  ;;  %v1921_v0 = vadd.f32 %v660_v62, %v632_v59  ;;  %v1923_v1 = vpop.f32.mrf.mxu1 }
 0x113   : > { %v673_v57 = vmax.f32 %v1878_v61, %v1921_v0 }
 0x116   : > { %v832_v4 = vpop.f32.mrf.mxu2 }
 0x117   : > { %v833_v27 = vadd.f32 %v832_v4, %v804_v26 }
 0x118   : > { %v663_v5 = vpop.f32.mrf.mxu0 }
 0x119   : > { %v1927_v3 = vpop.f32.mrf.mxu3  ;;  %v1929_v6 = vadd.f32 %v663_v5, %v635_v2  ;;  %v1931_v8 = vpop.f32.mrf.mxu1  ;;  %v852_v34 = vmax.f32 %v668_v29, %v833_v27  ;;  %v809_v2 = vadd.f32 %v808_v46, %v1901_v44  ;;  %v811_v44 = vadd.f32 %v1911_v53, %v1907_v50 }
 0x11a   : > { %v814_v50 = vadd.f32 %v1919_v60, %v1915_v58  ;;  %v816_v58 = vadd.f32 %v1927_v3, %v1923_v1 }
 0x11b   : > { %v674_v9 = vmax.f32 %v1886_v14, %v1929_v6 }
 0x11e   : > { %v834_v19 = vpop.f32.mrf.mxu2 }
 0x11f   : > { %v835_v51 = vadd.f32 %v834_v19, %v806_v45 }
 0x120   : > { %v665_v13 = vpop.f32.mrf.mxu0 }
 0x121   : > { %v1935_v12 = vpop.f32.mrf.mxu3  ;;  %v1937_v17 = vadd.f32 %v665_v13, %v637_v10  ;;  %v1939_v18 = vpop.f32.mrf.mxu1  ;;  %v853_v54 = vmax.f32 %v669_v38, %v835_v51 }
 0x122   : > { %v819_v1 = vadd.f32 %v1935_v12, %v1931_v8 }
 0x123   : > { %v675_v15 = vmax.f32 %v1889_v21, %v1937_v17 }
 0x126   : > { %v837_v23 = vpop.f32.mrf.mxu2 }
 0x127   : > { %v838_v4 = vadd.f32 %v837_v23, %v809_v2 }
 0x128   : > { %v958_v22 = vpop.f32.mrf.mxu0 }
 0x129   : > { %v1943_v20 = vpop.f32.mrf.mxu3  ;;  %v987_v25 = vpop.f32.mrf.mxu1  ;;  %v854_v16 = vmax.f32 %v670_v7, %v838_v4 }
 0x12a   : > { %v988_v30 = vadd.f32 %v987_v25, %v958_v22  ;;  %v821_v8 = vadd.f32 %v1943_v20, %v1939_v18 }
 0x12e   : > { %v839_v62 = vpop.f32.mrf.mxu2 }
 0x130   : > { %v960_v42 = vpop.f32.mrf.mxu0 }
 0x131   : > { %v1016_v32 = vpop.f32.mrf.mxu3  ;;  %v989_v24 = vpop.f32.mrf.mxu1 }
 0x132   : > { %v1017_v11 = vadd.f32 %v1016_v32, %v988_v30  ;;  %v990_v33 = vadd.f32 %v989_v24, %v960_v42  ;;  %v840_v30 = vadd.f32 %v839_v62, %v811_v44 }
 0x134   : > { %v1036_v47 = vmax.f32 %v852_v34, %v1017_v11  ;;  %v855_v31 = vmax.f32 %v671_v35, %v840_v30 }
 0x136   : > { %v1048_v52 = vadd.f32 %v1948_v39, %v1036_v47  ;;  %v842_v27 = vpop.f32.mrf.mxu2 }
 0x137   : > { %v843_v45 = vadd.f32 %v842_v27, %v814_v50 }
 0x138   : > { %v1056_v28 = vmax.f32 %v1048_v52, 0.0  ;;  %v963_v59 = vpop.f32.mrf.mxu0 }
 0x139   : > { %v1018_v29 = vpop.f32.mrf.mxu3  ;;  %v992_v63 = vpop.f32.mrf.mxu1  ;;  %v856_v40 = vmax.f32 %v672_v48, %v843_v45 }
 0x13a   : > { %v1064_v37 = vpack.c.bf16 %v1056_v28, %v1056_v28  ;;  %v1019_v41 = vadd.f32 %v1018_v29, %v990_v33  ;;  %v993_v13 = vadd.f32 %v992_v63, %v963_v59 }
 0x13c   : > { %1073 = vst.msk [vmem:[%s1955_s7] sm:$0xf] %vm1072_vm1, %v1064_v37  ;;  %v1037_v5 = vmax.f32 %v853_v54, %v1019_v41 }
 0x13e   : > { %v1049_v10 = vadd.f32 %v1948_v39, %v1037_v5  ;;  %v844_v52 = vpop.f32.mrf.mxu2 }
 0x13f   : > { %v845_v37 = vadd.f32 %v844_v52, %v816_v58 }
 0x140   : > { %v1057_v19 = vmax.f32 %v1049_v10, 0.0  ;;  %v965_v25 = vpop.f32.mrf.mxu0 }
 0x141   : > { %v1021_v22 = vpop.f32.mrf.mxu3  ;;  %v994_v26 = vpop.f32.mrf.mxu1  ;;  %v857_v55 = vmax.f32 %v673_v57, %v845_v37 }
 0x142   : > { %v1065_v36 = vpack.c.bf16 %v1057_v19, %v1057_v19  ;;  %v1022_v38 = vadd.f32 %v1021_v22, %v993_v13  ;;  %v995_v34 = vadd.f32 %v994_v26, %v965_v25 }
 0x144   : > { %1074 = vst.msk [vmem:[%s1955_s7 + $0x4] sm:$0xf] %vm1072_vm1, %v1065_v36  ;;  %v1038_v46 = vmax.f32 %v854_v16, %v1022_v38 }
 0x146   : > { %v1050_v23 = vadd.f32 %v1948_v39, %v1038_v46  ;;  %v847_v63 = vpop.f32.mrf.mxu2 }
 0x147   : > { %v848_v10 = vadd.f32 %v847_v63, %v819_v1 }
 0x148   : > { %v1058_v32 = vmax.f32 %v1050_v23, 0.0  ;;  %v968_v42 = vpop.f32.mrf.mxu0 }
 0x149   : > { %v1023_v11 = vpop.f32.mrf.mxu3  ;;  %v997_v24 = vpop.f32.mrf.mxu1  ;;  %v858_v61 = vmax.f32 %v674_v9, %v848_v10 }
 0x14a   : > { %v1066_v43 = vpack.c.bf16 %v1058_v32, %v1058_v32  ;;  %v1024_v7 = vadd.f32 %v1023_v11, %v995_v34  ;;  %v998_v51 = vadd.f32 %v997_v24, %v968_v42 }
 0x14c   : > { %1075 = vst.msk [vmem:[%s1955_s7 + $0x8] sm:$0xf] %vm1072_vm1, %v1066_v43  ;;  %v1039_v53 = vmax.f32 %v855_v31, %v1024_v7 }
 0x14e   : > { %v1051_v47 = vadd.f32 %v1948_v39, %v1039_v53  ;;  %v849_v36 = vpop.f32.mrf.mxu2 }
 0x14f   : > { %v850_v26 = vadd.f32 %v849_v36, %v821_v8 }
 0x150   : > { %v1059_v28 = vmax.f32 %v1051_v47, 0.0  ;;  %v970_v29 = vpop.f32.mrf.mxu0 }
 0x151   : > { %v1026_v33 = vpop.f32.mrf.mxu3  ;;  %v999_v54 = vpop.f32.mrf.mxu1  ;;  %v859_v6 = vmax.f32 %v675_v15, %v850_v26 }
 0x152   : > { %v1067_v49 = vpack.c.bf16 %v1059_v28, %v1059_v28  ;;  %v1027_v35 = vadd.f32 %v1026_v33, %v998_v51  ;;  %v1000_v62 = vadd.f32 %v999_v54, %v970_v29 }
 0x154   : > { %1076 = vst.msk [vmem:[%s1955_s7 + $0xc] sm:$0xf] %vm1072_vm1, %v1067_v49  ;;  %v1040_v60 = vmax.f32 %v856_v40, %v1027_v35 }
 0x156   : > { %v1052_v41 = vadd.f32 %v1948_v39, %v1040_v60 }
 0x158   : > { %v1060_v59 = vmax.f32 %v1052_v41, 0.0  ;;  %v973_v5 = vpop.f32.mrf.mxu0 }
 0x159   : > { %v1028_v2 = vpop.f32.mrf.mxu3  ;;  %v1002_v4 = vpop.f32.mrf.mxu1 }
 0x15a   : > { %v1068_v56 = vpack.c.bf16 %v1060_v59, %v1060_v59  ;;  %v1029_v48 = vadd.f32 %v1028_v2, %v1000_v62  ;;  %v1003_v19 = vadd.f32 %v1002_v4, %v973_v5 }
 0x15c   : > { %1077 = vst.msk [vmem:[%s1955_s7 + $0x10] sm:$0xf] %vm1072_vm1, %v1068_v56  ;;  %v1041_v3 = vmax.f32 %v857_v55, %v1029_v48 }
 0x15e   : > { %v1053_v13 = vadd.f32 %v1948_v39, %v1041_v3 }
 0x160   : > { %v1061_v22 = vmax.f32 %v1053_v13, 0.0  ;;  %v975_v38 = vpop.f32.mrf.mxu0 }
 0x161   : > { %v1031_v16 = vpop.f32.mrf.mxu3  ;;  %v1004_v25 = vpop.f32.mrf.mxu1 }
 0x162   : > { %v1069_v0 = vpack.c.bf16 %v1061_v22, %v1061_v22  ;;  %v1032_v57 = vadd.f32 %v1031_v16, %v1003_v19  ;;  %v1005_v27 = vadd.f32 %v1004_v25, %v975_v38 }
 0x164   : > { %1078 = vst.msk [vmem:[%s1955_s7 + $0x14] sm:$0xf] %vm1072_vm1, %v1069_v0  ;;  %v1042_v12 = vmax.f32 %v858_v61, %v1032_v57 }
 0x166   : > { %v1054_v44 = vadd.f32 %v1948_v39, %v1042_v12 }
 0x168   : > { %v1062_v46 = vmax.f32 %v1054_v44, 0.0 }
 0x169   : > { %v1033_v14 = vpop.f32.mrf.mxu3 }
 0x16a   : > { %v1070_v9 = vpack.c.bf16 %v1062_v46, %v1062_v46  ;;  %v1034_v30 = vadd.f32 %v1033_v14, %v1005_v27 }
 0x16c   : > { %1079 = vst.msk [vmem:[%s1955_s7 + $0x18] sm:$0xf] %vm1072_vm1, %v1070_v9  ;;  %v1043_v18 = vmax.f32 %v859_v6, %v1034_v30 }
 0x16e   : > { %v1055_v20 = vadd.f32 %v1948_v39, %v1043_v18 }
 0x170   : > { %v1063_v23 = vmax.f32 %v1055_v20, 0.0 }
 0x172   : > { %v1071_v32 = vpack.c.bf16 %v1063_v23, %v1063_v23 }
 0x174   : > { %1080 = vst.msk [vmem:[%s1955_s7 + $0x1c] sm:$0xf] %vm1072_vm1, %v1071_v32 }
 0x175 PF: > { %s13_s12 = sadd.s32 1, %s1557_s12  }
 0x176   : > { %p10_p4 = scmp.ge.s32.totalorder %s13_s12, 4  }
 0x178   :  { %12 = sbr.rel (!%p10_p4) target bundleno = 1 (0x1), region = 65 }

// kernel: svhn_forward.5
= control target key start
LH: loop header
LB: loop body
LE: loop exit
PB: predicated region body
PF: predicated region fallthrough
CT: control target
= control target key end

     0   :  { %s4862_s0 = inlined_call_operand.vmem [shape: bf16[2,4096], index: 0, kind: input, shape index: {}]   ;;  %s4863_s1 = inlined_call_operand.vmem [shape: bf16[4096,128], index: 1, kind: input, shape index: {}]   ;;  %s4864_s2 = inlined_call_operand.vmem [shape: f32[1,128], index: 2, kind: input, shape index: {}]   ;;  %s4865_s3 = inlined_call_operand.vmem [shape: bf16[128,10], index: 3, kind: input, shape index: {}]   ;;  %s4866_s4 = inlined_call_operand.vmem [shape: f32[1,10], index: 4, kind: input, shape index: {}]   ;;  %s4867_s5 = inlined_call_operand.hbm [shape: f32[2,10], index: 5, kind: output, shape index: {}]  }
   0x1   :  { %v3729_v0 = vld [vmem:[%s4863_s1 + $0x38] sm:$0xff]  ;;  %v3728_v4 = vld [vmem:[%s4863_s1 + $0x30] sm:$0xff]  ;;  %v3727_v8 = vld [vmem:[%s4863_s1 + $0x28] sm:$0xff] }
   0x2   :  { %v3737_v1 = vld [vmem:[%s4863_s1 + $0x78] sm:$0xff]  ;;  %2149 = vmatpush.bf16.msra.mxu0 %v3729_v0  ;;  %v3736_v5 = vld [vmem:[%s4863_s1 + $0x70] sm:$0xff]  ;;  %v3735_v9 = vld [vmem:[%s4863_s1 + $0x68] sm:$0xff] }
   0x3   :  { %v3745_v2 = vld [vmem:[%s4863_s1 + $0xb8] sm:$0xff]  ;;  %2162 = vmatpush.bf16.msra.mxu1 %v3737_v1  ;;  %v3744_v6 = vld [vmem:[%s4863_s1 + $0xb0] sm:$0xff]  ;;  %v3743_v10 = vld [vmem:[%s4863_s1 + $0xa8] sm:$0xff] }
   0x4   :  { %v3753_v3 = vld [vmem:[%s4863_s1 + $0xf8] sm:$0xff]  ;;  %2175 = vmatpush.bf16.msra.mxu2 %v3745_v2  ;;  %v3752_v7 = vld [vmem:[%s4863_s1 + $0xf0] sm:$0xff]  ;;  %v3751_v11 = vld [vmem:[%s4863_s1 + $0xe8] sm:$0xff] }
   0x5   :  { %2188 = vmatpush.bf16.msra.mxu3 %v3753_v3  ;;  %v3726_v12 = vld [vmem:[%s4863_s1 + $0x20] sm:$0xff]  ;;  %v3725_v16 = vld [vmem:[%s4863_s1 + $0x18] sm:$0xff]  ;;  %v3724_v20 = vld [vmem:[%s4863_s1 + $0x10] sm:$0xff] }
   0x6   :  { %2150 = vmatpush.bf16.msra.mxu0 %v3728_v4  ;;  %v3734_v13 = vld [vmem:[%s4863_s1 + $0x60] sm:$0xff]  ;;  %v3733_v17 = vld [vmem:[%s4863_s1 + $0x58] sm:$0xff]  ;;  %v3732_v21 = vld [vmem:[%s4863_s1 + $0x50] sm:$0xff] }
   0x7   :  { %2163 = vmatpush.bf16.msra.mxu1 %v3736_v5  ;;  %v3742_v14 = vld [vmem:[%s4863_s1 + $0xa0] sm:$0xff]  ;;  %v3741_v18 = vld [vmem:[%s4863_s1 + $0x98] sm:$0xff]  ;;  %v3740_v23 = vld [vmem:[%s4863_s1 + $0x90] sm:$0xff] }
   0x8   :  { %2176 = vmatpush.bf16.msra.mxu2 %v3744_v6  ;;  %v3750_v15 = vld [vmem:[%s4863_s1 + $0xe0] sm:$0xff]  ;;  %v3749_v19 = vld [vmem:[%s4863_s1 + $0xd8] sm:$0xff]  ;;  %v3748_v24 = vld [vmem:[%s4863_s1 + $0xd0] sm:$0xff] }
   0x9   :  { %2189 = vmatpush.bf16.msra.mxu3 %v3752_v7  ;;  %v21_v22 = vld [vmem:[%s4862_s0] sm:$0xff] }
   0xa   :  { %2151 = vmatpush.bf16.msra.mxu0 %v3727_v8  ;;  %542 = vst [vmem:[#allocation1] ss:$9 sm:$0xff] %v21_v22 }
   0xb   :  { %2164 = vmatpush.bf16.msra.mxu1 %v3735_v9 }
   0xc   :  { %2177 = vmatpush.bf16.msra.mxu2 %v3743_v10 }
   0xd   :  { %2190 = vmatpush.bf16.msra.mxu3 %v3751_v11 }
   0xe   :  { %2152 = vmatpush.bf16.msra.mxu0 %v3726_v12 }
   0xf   :  { %2165 = vmatpush.bf16.msra.mxu1 %v3734_v13 }
  0x10   :  { %2178 = vmatpush.bf16.msra.mxu2 %v3742_v14 }
  0x11   :  { %2191 = vmatpush.bf16.msra.mxu3 %v3750_v15 }
  0x12   :  { %2153 = vmatpush.bf16.msra.mxu0 %v3725_v16 }
  0x13   :  { %2166 = vmatpush.bf16.msra.mxu1 %v3733_v17 }
  0x14   :  { %2179 = vmatpush.bf16.msra.mxu2 %v3741_v18 }
  0x15   :  { %2192 = vmatpush.bf16.msra.mxu3 %v3749_v19 }
  0x16   :  { %10 = vsyncpa [#allocation3], 0  ;;  %2154 = vmatpush.bf16.msra.mxu0 %v3724_v20  ;;  %v3723_v25 = vld [vmem:[%s4863_s1 + $0x8] sm:$0xff]  ;;  %v3722_v29 = vld [vmem:[%s4863_s1] sm:$0xff]  ;;  %s4015_s18 = smov [#allocation2]   ;;  %s2657_s22 = sshll.u32 %s4867_s5, 4  ;;  %s2658_s22 = int_to_ptr.hbm [resolvable:$true] %s2657_s22 }
  0x17   :  { %2167 = vmatpush.bf16.msra.mxu1 %v3732_v21  ;;  %v3731_v26 = vld [vmem:[%s4863_s1 + $0x48] sm:$0xff]  ;;  %v3730_v30 = vld [vmem:[%s4863_s1 + $0x40] sm:$0xff]  ;;  %v3761_v33 = vld [vmem:[%s4863_s1 + $0x138] sm:$0xff]  ;;  %s2655_s19 = sshll.u32 %s4015_s18, 4  ;;  %vm2648_vm0 = vcmask 74752   ;;  %s2656_s19 = int_to_ptr.vmem [resolvable:$true] %s2655_s19 }
  0x18   :  { %2180 = vmatpush.bf16.msra.mxu2 %v3740_v23  ;;  %v3739_v27 = vld [vmem:[%s4863_s1 + $0x88] sm:$0xff]  ;;  %v3738_v31 = vld [vmem:[%s4863_s1 + $0x80] sm:$0xff]  ;;  %v3769_v34 = vld [vmem:[%s4863_s1 + $0x178] sm:$0xff] }
  0x19   :  { %2193 = vmatpush.bf16.msra.mxu3 %v3748_v24  ;;  %v3747_v28 = vld [vmem:[%s4863_s1 + $0xc8] sm:$0xff]  ;;  %v3746_v32 = vld [vmem:[%s4863_s1 + $0xc0] sm:$0xff]  ;;  %v3777_v35 = vld [vmem:[%s4863_s1 + $0x1b8] sm:$0xff] }
  0x1a   :  { %2155 = vmatpush.bf16.msra.mxu0 %v3723_v25  ;;  %v3785_v36 = vld [vmem:[%s4863_s1 + $0x1f8] sm:$0xff]  ;;  %v3760_v37 = vld [vmem:[%s4863_s1 + $0x130] sm:$0xff]  ;;  %v543_v39 = vld [vmem:[#allocation1] sm:$0xff] }
  0x1b   :  { %2168 = vmatpush.bf16.msra.mxu1 %v3731_v26  ;;  %v545_v38 = vld [vmem:[#allocation1 + $0x12] sm:$0xff]  ;;  %v546_v41 = vld [vmem:[#allocation1 + $0x1b] sm:$0xff]  ;;  %v544_v42 = vld [vmem:[#allocation1 + $0x9] sm:$0xff] }
  0x1c   :  { %2181 = vmatpush.bf16.msra.mxu2 %v3739_v27  ;;  %v3768_v40 = vld [vmem:[%s4863_s1 + $0x170] sm:$0xff]  ;;  %v3759_v45 = vld [vmem:[%s4863_s1 + $0x128] sm:$0xff]  ;;  %v3758_v49 = vld [vmem:[%s4863_s1 + $0x120] sm:$0xff] }
  0x1d   :  { %2194 = vmatpush.bf16.msra.mxu3 %v3747_v28  ;;  %v3776_v43 = vld [vmem:[%s4863_s1 + $0x1b0] sm:$0xff]  ;;  %v3767_v46 = vld [vmem:[%s4863_s1 + $0x168] sm:$0xff]  ;;  %v3766_v50 = vld [vmem:[%s4863_s1 + $0x160] sm:$0xff] }
  0x1e   :  { %2156 = vmatpush.bf16.msra.mxu0 %v3722_v29  ;;  %v3784_v44 = vld [vmem:[%s4863_s1 + $0x1f0] sm:$0xff]  ;;  %v3775_v47 = vld [vmem:[%s4863_s1 + $0x1a8] sm:$0xff]  ;;  %v550_v54 = vld [vmem:[#allocation1 + $0x3f] sm:$0xff] }
  0x1f   :  { %2169 = vmatpush.bf16.msra.mxu1 %v3730_v30  ;;  %v3783_v48 = vld [vmem:[%s4863_s1 + $0x1e8] sm:$0xff]  ;;  %v549_v51 = vld [vmem:[#allocation1 + $0x36] sm:$0xff]  ;;  %v3774_v56 = vld [vmem:[%s4863_s1 + $0x1a0] sm:$0xff] }
  0x20   :  { %2182 = vmatpush.bf16.msra.mxu2 %v3738_v31  ;;  %v22_v52 = vld [vmem:[%s4862_s0 + $0x8] sm:$0xff]  ;;  %v3782_v57 = vld [vmem:[%s4863_s1 + $0x1e0] sm:$0xff]  ;;  %v3757_v58 = vld [vmem:[%s4863_s1 + $0x118] sm:$0xff] }
  0x21   :  { %2195 = vmatpush.bf16.msra.mxu3 %v3746_v32  ;;  %2157 = vmatmul.bf16.vlgmr.msra.gmra.mxu0 %v543_v39  ;;  %v547_v53 = vld [vmem:[#allocation1 + $0x24] sm:$0xff]  ;;  %v548_v55 = vld [vmem:[#allocation1 + $0x2d] sm:$0xff]  ;;  %v3765_v59 = vld [vmem:[%s4863_s1 + $0x158] sm:$0xff] }
  0x22   :  { %2201 = vmatpush.bf16.msrb.mxu0 %v3761_v33  ;;  %2170 = vmatmul.bf16.vlgmr.msra.gmra.mxu1 %v544_v42  ;;  %552 = vst [vmem:[#allocation1] ss:$9 sm:$0xff] %v22_v52  ;;  %v3773_v60 = vld [vmem:[%s4863_s1 + $0x198] sm:$0xff]  ;;  %v3756_v62 = vld [vmem:[%s4863_s1 + $0x110] sm:$0xff]  ;;  %v3755_v2 = vld [vmem:[%s4863_s1 + $0x108] sm:$0xff] }
  0x23   :  { %2214 = vmatpush.bf16.msrb.mxu1 %v3769_v34  ;;  %2183 = vmatmul.bf16.vlgmr.msra.gmra.mxu2 %v545_v38  ;;  %v3781_v61 = vld [vmem:[%s4863_s1 + $0x1d8] sm:$0xff]  ;;  %v3764_v63 = vld [vmem:[%s4863_s1 + $0x150] sm:$0xff]  ;;  %v3763_v3 = vld [vmem:[%s4863_s1 + $0x148] sm:$0xff] }
  0x24   :  { %2227 = vmatpush.bf16.msrb.mxu2 %v3777_v35  ;;  %2196 = vmatmul.bf16.vlgmr.msra.gmra.mxu3 %v546_v41  ;;  %v3772_v0 = vld [vmem:[%s4863_s1 + $0x190] sm:$0xff]  ;;  %v3771_v4 = vld [vmem:[%s4863_s1 + $0x188] sm:$0xff]  ;;  %v3754_v6 = vld [vmem:[%s4863_s1 + $0x100] sm:$0xff] }
  0x25   :  { %2240 = vmatpush.bf16.msrb.mxu3 %v3785_v36  ;;  %v3780_v1 = vld [vmem:[%s4863_s1 + $0x1d0] sm:$0xff]  ;;  %v3779_v5 = vld [vmem:[%s4863_s1 + $0x1c8] sm:$0xff]  ;;  %v3762_v7 = vld [vmem:[%s4863_s1 + $0x140] sm:$0xff] }
  0x26   :  { %2202 = vmatpush.bf16.msrb.mxu0 %v3760_v37  ;;  %v3770_v8 = vld [vmem:[%s4863_s1 + $0x180] sm:$0xff]  ;;  %v3793_v10 = vld [vmem:[%s4863_s1 + $0x238] sm:$0xff]  ;;  %v3792_v14 = vld [vmem:[%s4863_s1 + $0x230] sm:$0xff] }
  0x27   :  { %2215 = vmatpush.bf16.msrb.mxu1 %v3768_v40  ;;  %v3778_v9 = vld [vmem:[%s4863_s1 + $0x1c0] sm:$0xff]  ;;  %v3801_v11 = vld [vmem:[%s4863_s1 + $0x278] sm:$0xff]  ;;  %v3800_v15 = vld [vmem:[%s4863_s1 + $0x270] sm:$0xff] }
  0x28   :  { %2228 = vmatpush.bf16.msrb.mxu2 %v3776_v43  ;;  %v3809_v12 = vld [vmem:[%s4863_s1 + $0x2b8] sm:$0xff]  ;;  %v3808_v16 = vld [vmem:[%s4863_s1 + $0x2b0] sm:$0xff]  ;;  %v3791_v18 = vld [vmem:[%s4863_s1 + $0x228] sm:$0xff] }
  0x29   :  { %2241 = vmatpush.bf16.msrb.mxu3 %v3784_v44  ;;  %v3817_v13 = vld [vmem:[%s4863_s1 + $0x2f8] sm:$0xff]  ;;  %v3816_v17 = vld [vmem:[%s4863_s1 + $0x2f0] sm:$0xff]  ;;  %v3799_v19 = vld [vmem:[%s4863_s1 + $0x268] sm:$0xff] }
  0x2a   :  { %2203 = vmatpush.bf16.msrb.mxu0 %v3759_v45  ;;  %v3807_v20 = vld [vmem:[%s4863_s1 + $0x2a8] sm:$0xff]  ;;  %v3790_v22 = vld [vmem:[%s4863_s1 + $0x220] sm:$0xff]  ;;  %v3789_v26 = vld [vmem:[%s4863_s1 + $0x218] sm:$0xff] }
  0x2b   :  { %2216 = vmatpush.bf16.msrb.mxu1 %v3767_v46  ;;  %v3815_v21 = vld [vmem:[%s4863_s1 + $0x2e8] sm:$0xff]  ;;  %v3798_v23 = vld [vmem:[%s4863_s1 + $0x260] sm:$0xff]  ;;  %v3797_v27 = vld [vmem:[%s4863_s1 + $0x258] sm:$0xff] }
  0x2c   :  { %2229 = vmatpush.bf16.msrb.mxu2 %v3775_v47  ;;  %v3806_v24 = vld [vmem:[%s4863_s1 + $0x2a0] sm:$0xff]  ;;  %v3805_v28 = vld [vmem:[%s4863_s1 + $0x298] sm:$0xff]  ;;  %v3788_v30 = vld [vmem:[%s4863_s1 + $0x210] sm:$0xff] }
  0x2d   :  { %2242 = vmatpush.bf16.msrb.mxu3 %v3783_v48  ;;  %v3814_v25 = vld [vmem:[%s4863_s1 + $0x2e0] sm:$0xff]  ;;  %v3813_v29 = vld [vmem:[%s4863_s1 + $0x2d8] sm:$0xff]  ;;  %v3796_v31 = vld [vmem:[%s4863_s1 + $0x250] sm:$0xff] }
  0x2e   :  { %2204 = vmatpush.bf16.msrb.mxu0 %v3758_v49  ;;  %v3804_v32 = vld [vmem:[%s4863_s1 + $0x290] sm:$0xff]  ;;  %v3787_v34 = vld [vmem:[%s4863_s1 + $0x208] sm:$0xff]  ;;  %v3786_v38 = vld [vmem:[%s4863_s1 + $0x200] sm:$0xff] }
  0x2f   :  { %2217 = vmatpush.bf16.msrb.mxu1 %v3766_v50  ;;  %v3812_v33 = vld [vmem:[%s4863_s1 + $0x2d0] sm:$0xff]  ;;  %v3795_v35 = vld [vmem:[%s4863_s1 + $0x248] sm:$0xff]  ;;  %v3794_v39 = vld [vmem:[%s4863_s1 + $0x240] sm:$0xff] }
  0x30   :  { %2230 = vmatpush.bf16.msrb.mxu2 %v3774_v56  ;;  %v3803_v36 = vld [vmem:[%s4863_s1 + $0x288] sm:$0xff]  ;;  %v3802_v40 = vld [vmem:[%s4863_s1 + $0x280] sm:$0xff]  ;;  %v3825_v42 = vld [vmem:[%s4863_s1 + $0x338] sm:$0xff] }
  0x31   :  { %2243 = vmatpush.bf16.msrb.mxu3 %v3782_v57  ;;  %v3811_v37 = vld [vmem:[%s4863_s1 + $0x2c8] sm:$0xff]  ;;  %v3810_v41 = vld [vmem:[%s4863_s1 + $0x2c0] sm:$0xff]  ;;  %v3833_v43 = vld [vmem:[%s4863_s1 + $0x378] sm:$0xff] }
  0x32   :  { %2205 = vmatpush.bf16.msrb.mxu0 %v3757_v58  ;;  %v3841_v44 = vld [vmem:[%s4863_s1 + $0x3b8] sm:$0xff]  ;;  %v553_v46 = vld [vmem:[#allocation1] sm:$0xff]  ;;  %v554_v48 = vld [vmem:[#allocation1 + $0x9] sm:$0xff] }
  0x33   :  { %2218 = vmatpush.bf16.msrb.mxu1 %v3765_v59  ;;  %v3849_v45 = vld [vmem:[%s4863_s1 + $0x3f8] sm:$0xff]  ;;  %v3824_v50 = vld [vmem:[%s4863_s1 + $0x330] sm:$0xff]  ;;  %v3839_v56 = vld [vmem:[%s4863_s1 + $0x3a8] sm:$0xff] }
  0x34   :  { %2231 = vmatpush.bf16.msrb.mxu2 %v3773_v60  ;;  %v555_v47 = vld [vmem:[#allocation1 + $0x12] sm:$0xff]  ;;  %v556_v49 = vld [vmem:[#allocation1 + $0x1b] sm:$0xff]  ;;  %v3847_v57 = vld [vmem:[%s4863_s1 + $0x3e8] sm:$0xff] }
  0x35   :  { %2244 = vmatpush.bf16.msrb.mxu3 %v3781_v61  ;;  %v3840_v52 = vld [vmem:[%s4863_s1 + $0x3b0] sm:$0xff]  ;;  %v3822_v58 = vld [vmem:[%s4863_s1 + $0x320] sm:$0xff] }
  0x36   :  { %2206 = vmatpush.bf16.msrb.mxu0 %v3756_v62  ;;  %v3830_v59 = vld [vmem:[%s4863_s1 + $0x360] sm:$0xff]  ;;  %v3821_v62 = vld [vmem:[%s4863_s1 + $0x318] sm:$0xff] }
  0x37   :  { %2219 = vmatpush.bf16.msrb.mxu1 %v3764_v63  ;;  %v3838_v60 = vld [vmem:[%s4863_s1 + $0x3a0] sm:$0xff]  ;;  %v3829_v63 = vld [vmem:[%s4863_s1 + $0x358] sm:$0xff] }
  0x38   :  { %2232 = vmatpush.bf16.msrb.mxu2 %v3772_v0  ;;  %v3846_v61 = vld [vmem:[%s4863_s1 + $0x3e0] sm:$0xff]  ;;  %v3837_v0 = vld [vmem:[%s4863_s1 + $0x398] sm:$0xff] }
  0x39   :  { %2245 = vmatpush.bf16.msrb.mxu3 %v3780_v1  ;;  %v3845_v1 = vld [vmem:[%s4863_s1 + $0x3d8] sm:$0xff] }
  0x3a   :  { %2207 = vmatpush.bf16.msrb.mxu0 %v3755_v2  ;;  %v3820_v2 = vld [vmem:[%s4863_s1 + $0x310] sm:$0xff] }
  0x3b   :  { %2220 = vmatpush.bf16.msrb.mxu1 %v3763_v3  ;;  %v3828_v3 = vld [vmem:[%s4863_s1 + $0x350] sm:$0xff] }
  0x3c   :  { %2233 = vmatpush.bf16.msrb.mxu2 %v3771_v4  ;;  %v3836_v4 = vld [vmem:[%s4863_s1 + $0x390] sm:$0xff] }
  0x3d   :  { %2246 = vmatpush.bf16.msrb.mxu3 %v3779_v5  ;;  %v3844_v5 = vld [vmem:[%s4863_s1 + $0x3d0] sm:$0xff] }
  0x3e   :  { %2208 = vmatpush.bf16.msrb.mxu0 %v3754_v6  ;;  %v3819_v6 = vld [vmem:[%s4863_s1 + $0x308] sm:$0xff] }
  0x3f   :  { %2221 = vmatpush.bf16.msrb.mxu1 %v3762_v7  ;;  %v3827_v7 = vld [vmem:[%s4863_s1 + $0x348] sm:$0xff] }
  0x40   :  { %2234 = vmatpush.bf16.msrb.mxu2 %v3770_v8  ;;  %v3835_v8 = vld [vmem:[%s4863_s1 + $0x388] sm:$0xff] }
  0x41   :  { %2247 = vmatpush.bf16.msrb.mxu3 %v3778_v9  ;;  %2209 = vmatmul.bf16.vlgmr.msrb.gmra.mxu0 %v547_v53  ;;  %v3848_v53 = vld [vmem:[%s4863_s1 + $0x3f0] sm:$0xff]  ;;  %v3843_v9 = vld [vmem:[%s4863_s1 + $0x3c8] sm:$0xff] }
  0x42   :  { %2253 = vmatpush.bf16.msra.mxu0 %v3793_v10  ;;  %2222 = vmatmul.bf16.vlgmr.msrb.gmra.mxu1 %v548_v55  ;;  %v3831_v55 = vld [vmem:[%s4863_s1 + $0x368] sm:$0xff] }
  0x43   :  { %2266 = vmatpush.bf16.msra.mxu1 %v3801_v11  ;;  %2235 = vmatmul.bf16.vlgmr.msrb.gmra.mxu2 %v549_v51  ;;  %v3832_v51 = vld [vmem:[%s4863_s1 + $0x370] sm:$0xff]  ;;  %v557_v10 = vld [vmem:[#allocation1 + $0x24] sm:$0xff] }
  0x44   :  { %2279 = vmatpush.bf16.msra.mxu2 %v3809_v12  ;;  %2248 = vmatmul.bf16.vlgmr.msrb.gmra.mxu3 %v550_v54  ;;  %v3823_v54 = vld [vmem:[%s4863_s1 + $0x328] sm:$0xff]  ;;  %v559_v11 = vld [vmem:[#allocation1 + $0x36] sm:$0xff] }
  0x45   :  { %2292 = vmatpush.bf16.msra.mxu3 %v3817_v13  ;;  %v558_v12 = vld [vmem:[#allocation1 + $0x2d] sm:$0xff]  ;;  %v560_v13 = vld [vmem:[#allocation1 + $0x3f] sm:$0xff] }
  0x46   :  { %2254 = vmatpush.bf16.msra.mxu0 %v3792_v14  ;;  %v23_v14 = vld [vmem:[%s4862_s0 + $0x10] sm:$0xff] }
  0x47   :  { %2267 = vmatpush.bf16.msra.mxu1 %v3800_v15  ;;  %562 = vst [vmem:[#allocation1] ss:$9 sm:$0xff] %v23_v14  ;;  %v3818_v15 = vld [vmem:[%s4863_s1 + $0x300] sm:$0xff]  ;;  %v3901_v14 = vld [vmem:[%s4863_s1 + $0x598] sm:$0xff] }
  0x48   :  { %2280 = vmatpush.bf16.msra.mxu2 %v3808_v16  ;;  %v3826_v16 = vld [vmem:[%s4863_s1 + $0x340] sm:$0xff] }
  0x49   :  { %2293 = vmatpush.bf16.msra.mxu3 %v3816_v17  ;;  %v3834_v17 = vld [vmem:[%s4863_s1 + $0x380] sm:$0xff] }
  0x4a   :  { %2255 = vmatpush.bf16.msra.mxu0 %v3791_v18  ;;  %v3842_v18 = vld [vmem:[%s4863_s1 + $0x3c0] sm:$0xff] }
  0x4b   :  { %2268 = vmatpush.bf16.msra.mxu1 %v3799_v19  ;;  %v3857_v19 = vld [vmem:[%s4863_s1 + $0x438] sm:$0xff] }
  0x4c   :  { %2281 = vmatpush.bf16.msra.mxu2 %v3807_v20  ;;  %v3865_v20 = vld [vmem:[%s4863_s1 + $0x478] sm:$0xff] }
  0x4d   :  { %2294 = vmatpush.bf16.msra.mxu3 %v3815_v21  ;;  %v3873_v21 = vld [vmem:[%s4863_s1 + $0x4b8] sm:$0xff] }
  0x4e   :  { %2256 = vmatpush.bf16.msra.mxu0 %v3790_v22  ;;  %v3881_v22 = vld [vmem:[%s4863_s1 + $0x4f8] sm:$0xff] }
  0x4f   :  { %2269 = vmatpush.bf16.msra.mxu1 %v3798_v23  ;;  %v3856_v23 = vld [vmem:[%s4863_s1 + $0x430] sm:$0xff] }
  0x50   :  { %2282 = vmatpush.bf16.msra.mxu2 %v3806_v24  ;;  %v3864_v24 = vld [vmem:[%s4863_s1 + $0x470] sm:$0xff] }
  0x51   :  { %2295 = vmatpush.bf16.msra.mxu3 %v3814_v25  ;;  %v3872_v25 = vld [vmem:[%s4863_s1 + $0x4b0] sm:$0xff] }
  0x52   :  { %2257 = vmatpush.bf16.msra.mxu0 %v3789_v26  ;;  %v3880_v26 = vld [vmem:[%s4863_s1 + $0x4f0] sm:$0xff] }
  0x53   :  { %2270 = vmatpush.bf16.msra.mxu1 %v3797_v27  ;;  %v3855_v27 = vld [vmem:[%s4863_s1 + $0x428] sm:$0xff] }
  0x54   :  { %2283 = vmatpush.bf16.msra.mxu2 %v3805_v28  ;;  %v3863_v28 = vld [vmem:[%s4863_s1 + $0x468] sm:$0xff] }
  0x55   :  { %2296 = vmatpush.bf16.msra.mxu3 %v3813_v29  ;;  %v3871_v29 = vld [vmem:[%s4863_s1 + $0x4a8] sm:$0xff] }
  0x56   :  { %2258 = vmatpush.bf16.msra.mxu0 %v3788_v30  ;;  %v3879_v30 = vld [vmem:[%s4863_s1 + $0x4e8] sm:$0xff] }
  0x57   :  { %2271 = vmatpush.bf16.msra.mxu1 %v3796_v31  ;;  %v3854_v31 = vld [vmem:[%s4863_s1 + $0x420] sm:$0xff] }
  0x58   :  { %2284 = vmatpush.bf16.msra.mxu2 %v3804_v32  ;;  %v3862_v32 = vld [vmem:[%s4863_s1 + $0x460] sm:$0xff] }
  0x59   :  { %2297 = vmatpush.bf16.msra.mxu3 %v3812_v33  ;;  %v3870_v33 = vld [vmem:[%s4863_s1 + $0x4a0] sm:$0xff] }
  0x5a   :  { %2259 = vmatpush.bf16.msra.mxu0 %v3787_v34  ;;  %v3878_v34 = vld [vmem:[%s4863_s1 + $0x4e0] sm:$0xff] }
  0x5b   :  { %2272 = vmatpush.bf16.msra.mxu1 %v3795_v35  ;;  %v3853_v35 = vld [vmem:[%s4863_s1 + $0x418] sm:$0xff] }
  0x5c   :  { %2285 = vmatpush.bf16.msra.mxu2 %v3803_v36  ;;  %v3861_v36 = vld [vmem:[%s4863_s1 + $0x458] sm:$0xff] }
  0x5d   :  { %2298 = vmatpush.bf16.msra.mxu3 %v3811_v37  ;;  %v3869_v37 = vld [vmem:[%s4863_s1 + $0x498] sm:$0xff] }
  0x5e   :  { %2260 = vmatpush.bf16.msra.mxu0 %v3786_v38  ;;  %v3877_v38 = vld [vmem:[%s4863_s1 + $0x4d8] sm:$0xff] }
  0x5f   :  { %2273 = vmatpush.bf16.msra.mxu1 %v3794_v39  ;;  %v3852_v39 = vld [vmem:[%s4863_s1 + $0x410] sm:$0xff] }
  0x60   :  { %2286 = vmatpush.bf16.msra.mxu2 %v3802_v40  ;;  %v3860_v40 = vld [vmem:[%s4863_s1 + $0x450] sm:$0xff] }
  0x61   :  { %2299 = vmatpush.bf16.msra.mxu3 %v3810_v41  ;;  %2261 = vmatmul.bf16.vlgmr.msra.gmra.mxu0 %v553_v46  ;;  %v3868_v41 = vld [vmem:[%s4863_s1 + $0x490] sm:$0xff]  ;;  %v3875_v46 = vld [vmem:[%s4863_s1 + $0x4c8] sm:$0xff] }
  0x62   :  { %2305 = vmatpush.bf16.msrb.mxu0 %v3825_v42  ;;  %2274 = vmatmul.bf16.vlgmr.msra.gmra.mxu1 %v554_v48  ;;  %v3876_v42 = vld [vmem:[%s4863_s1 + $0x4d0] sm:$0xff]  ;;  %v3858_v48 = vld [vmem:[%s4863_s1 + $0x440] sm:$0xff] }
  0x63   :  { %2318 = vmatpush.bf16.msrb.mxu1 %v3833_v43  ;;  %2287 = vmatmul.bf16.vlgmr.msra.gmra.mxu2 %v555_v47  ;;  %v3851_v43 = vld [vmem:[%s4863_s1 + $0x408] sm:$0xff]  ;;  %v3850_v47 = vld [vmem:[%s4863_s1 + $0x400] sm:$0xff] }
  0x64   :  { %2331 = vmatpush.bf16.msrb.mxu2 %v3841_v44  ;;  %2300 = vmatmul.bf16.vlgmr.msra.gmra.mxu3 %v556_v49  ;;  %v3859_v44 = vld [vmem:[%s4863_s1 + $0x448] sm:$0xff]  ;;  %v3866_v49 = vld [vmem:[%s4863_s1 + $0x480] sm:$0xff] }
  0x65   :  { %2344 = vmatpush.bf16.msrb.mxu3 %v3849_v45  ;;  %v3867_v45 = vld [vmem:[%s4863_s1 + $0x488] sm:$0xff] }
  0x66   :  { %2306 = vmatpush.bf16.msrb.mxu0 %v3824_v50  ;;  %v3874_v50 = vld [vmem:[%s4863_s1 + $0x4c0] sm:$0xff] }
  0x67   :  { %2319 = vmatpush.bf16.msrb.mxu1 %v3832_v51  ;;  %v3889_v51 = vld [vmem:[%s4863_s1 + $0x538] sm:$0xff] }
  0x68   :  { %2332 = vmatpush.bf16.msrb.mxu2 %v3840_v52  ;;  %v3897_v52 = vld [vmem:[%s4863_s1 + $0x578] sm:$0xff] }
  0x69   :  { %2345 = vmatpush.bf16.msrb.mxu3 %v3848_v53  ;;  %v3905_v53 = vld [vmem:[%s4863_s1 + $0x5b8] sm:$0xff] }
  0x6a   :  { %2307 = vmatpush.bf16.msrb.mxu0 %v3823_v54  ;;  %v3913_v54 = vld [vmem:[%s4863_s1 + $0x5f8] sm:$0xff] }
  0x6b   :  { %2320 = vmatpush.bf16.msrb.mxu1 %v3831_v55  ;;  %v563_v55 = vld [vmem:[#allocation1] sm:$0xff] }
  0x6c   :  { %2333 = vmatpush.bf16.msrb.mxu2 %v3839_v56  ;;  %v565_v56 = vld [vmem:[#allocation1 + $0x12] sm:$0xff] }
  0x6d   :  { %2346 = vmatpush.bf16.msrb.mxu3 %v3847_v57  ;;  %v564_v57 = vld [vmem:[#allocation1 + $0x9] sm:$0xff] }
  0x6e   :  { %2308 = vmatpush.bf16.msrb.mxu0 %v3822_v58  ;;  %v566_v58 = vld [vmem:[#allocation1 + $0x1b] sm:$0xff] }
  0x6f   :  { %2321 = vmatpush.bf16.msrb.mxu1 %v3830_v59  ;;  %v3888_v59 = vld [vmem:[%s4863_s1 + $0x530] sm:$0xff] }
  0x70   :  { %2334 = vmatpush.bf16.msrb.mxu2 %v3838_v60  ;;  %v3896_v60 = vld [vmem:[%s4863_s1 + $0x570] sm:$0xff] }
  0x71   :  { %2347 = vmatpush.bf16.msrb.mxu3 %v3846_v61  ;;  %v3904_v61 = vld [vmem:[%s4863_s1 + $0x5b0] sm:$0xff] }
  0x72   :  { %2309 = vmatpush.bf16.msrb.mxu0 %v3821_v62  ;;  %v3912_v62 = vld [vmem:[%s4863_s1 + $0x5f0] sm:$0xff] }
  0x73   :  { %2322 = vmatpush.bf16.msrb.mxu1 %v3829_v63  ;;  %v3887_v63 = vld [vmem:[%s4863_s1 + $0x528] sm:$0xff] }
  0x74   :  { %2335 = vmatpush.bf16.msrb.mxu2 %v3837_v0  ;;  %v3895_v0 = vld [vmem:[%s4863_s1 + $0x568] sm:$0xff] }
  0x75   :  { %2348 = vmatpush.bf16.msrb.mxu3 %v3845_v1  ;;  %v3987_v1 = vld [vmem:[%s4864_s2] ss:$0 sm:$0xff] }
  0x76   :  { %2310 = vmatpush.bf16.msrb.mxu0 %v3820_v2  ;;  %v3903_v2 = vld [vmem:[%s4863_s1 + $0x5a8] sm:$0xff] }
  0x77   :  { %2323 = vmatpush.bf16.msrb.mxu1 %v3828_v3  ;;  %v3911_v3 = vld [vmem:[%s4863_s1 + $0x5e8] sm:$0xff] }
  0x78   :  { %2336 = vmatpush.bf16.msrb.mxu2 %v3836_v4 }
  0x79   :  { %2349 = vmatpush.bf16.msrb.mxu3 %v3844_v5  ;;  %v3886_v5 = vld [vmem:[%s4863_s1 + $0x520] sm:$0xff] }
  0x7a   :  { %2311 = vmatpush.bf16.msrb.mxu0 %v3819_v6  ;;  %v3894_v6 = vld [vmem:[%s4863_s1 + $0x560] sm:$0xff] }
  0x7b   :  { %2324 = vmatpush.bf16.msrb.mxu1 %v3827_v7 }
  0x7c   :  { %2337 = vmatpush.bf16.msrb.mxu2 %v3835_v8 }
  0x7d   :  { %2350 = vmatpush.bf16.msrb.mxu3 %v3843_v9  ;;  %v3902_v9 = vld [vmem:[%s4863_s1 + $0x5a0] sm:$0xff] }
  0x7e   :  { %2312 = vmatpush.bf16.msrb.mxu0 %v3818_v15  ;;  %v3909_v15 = vld [vmem:[%s4863_s1 + $0x5d8] sm:$0xff] }
  0x7f   :  { %2325 = vmatpush.bf16.msrb.mxu1 %v3826_v16 }
  0x80   :  { %2338 = vmatpush.bf16.msrb.mxu2 %v3834_v17 }
  0x81   :  { %2351 = vmatpush.bf16.msrb.mxu3 %v3842_v18  ;;  %2313 = vmatmul.bf16.vlgmr.msrb.gmra.mxu0 %v557_v10  ;;  %v3910_v10 = vld [vmem:[%s4863_s1 + $0x5e0] sm:$0xff] }
  0x82   :  { %2357 = vmatpush.bf16.msra.mxu0 %v3857_v19  ;;  %2326 = vmatmul.bf16.vlgmr.msrb.gmra.mxu1 %v558_v12  ;;  %v3885_v12 = vld [vmem:[%s4863_s1 + $0x518] sm:$0xff] }
  0x83   :  { %2370 = vmatpush.bf16.msra.mxu1 %v3865_v20  ;;  %2339 = vmatmul.bf16.vlgmr.msrb.gmra.mxu2 %v559_v11  ;;  %v3884_v20 = vld [vmem:[%s4863_s1 + $0x510] sm:$0xff] }
  0x84   :  { %2383 = vmatpush.bf16.msra.mxu2 %v3873_v21  ;;  %2352 = vmatmul.bf16.vlgmr.msrb.gmra.mxu3 %v560_v13  ;;  %v3893_v13 = vld [vmem:[%s4863_s1 + $0x558] sm:$0xff]  ;;  %v3892_v21 = vld [vmem:[%s4863_s1 + $0x550] sm:$0xff] }
  0x85   :  { %2396 = vmatpush.bf16.msra.mxu3 %v3881_v22 }
  0x86   :  { %2358 = vmatpush.bf16.msra.mxu0 %v3856_v23 }
  0x87   :  { %2371 = vmatpush.bf16.msra.mxu1 %v3864_v24  ;;  %v3900_v24 = vld [vmem:[%s4863_s1 + $0x590] sm:$0xff] }
  0x88   :  { %2384 = vmatpush.bf16.msra.mxu2 %v3872_v25  ;;  %v3908_v25 = vld [vmem:[%s4863_s1 + $0x5d0] sm:$0xff] }
  0x89   :  { %2397 = vmatpush.bf16.msra.mxu3 %v3880_v26  ;;  %v3883_v26 = vld [vmem:[%s4863_s1 + $0x508] sm:$0xff] }
  0x8a   :  { %2359 = vmatpush.bf16.msra.mxu0 %v3855_v27  ;;  %v3891_v27 = vld [vmem:[%s4863_s1 + $0x548] sm:$0xff] }
  0x8b   :  { %2372 = vmatpush.bf16.msra.mxu1 %v3863_v28  ;;  %v3899_v28 = vld [vmem:[%s4863_s1 + $0x588] sm:$0xff] }
  0x8c   :  { %2385 = vmatpush.bf16.msra.mxu2 %v3871_v29  ;;  %v3907_v29 = vld [vmem:[%s4863_s1 + $0x5c8] sm:$0xff] }
  0x8d   :  { %2398 = vmatpush.bf16.msra.mxu3 %v3879_v30  ;;  %v567_v30 = vld [vmem:[#allocation1 + $0x24] sm:$0xff] }
  0x8e   :  { %2360 = vmatpush.bf16.msra.mxu0 %v3854_v31  ;;  %v569_v31 = vld [vmem:[#allocation1 + $0x36] sm:$0xff] }
  0x8f   :  { %2373 = vmatpush.bf16.msra.mxu1 %v3862_v32 }
  0x90   :  { %2386 = vmatpush.bf16.msra.mxu2 %v3870_v33  ;;  %v568_v33 = vld [vmem:[#allocation1 + $0x2d] sm:$0xff] }
  0x91   :  { %2399 = vmatpush.bf16.msra.mxu3 %v3878_v34  ;;  %v570_v34 = vld [vmem:[#allocation1 + $0x3f] sm:$0xff] }
  0x92   :  { %2361 = vmatpush.bf16.msra.mxu0 %v3853_v35 }
  0x93   :  { %2374 = vmatpush.bf16.msra.mxu1 %v3861_v36  ;;  %v24_v36 = vld [vmem:[%s4862_s0 + $0x18] sm:$0xff] }
  0x94   :  { %2387 = vmatpush.bf16.msra.mxu2 %v3869_v37  ;;  %572 = vst [vmem:[#allocation1] ss:$9 sm:$0xff] %v24_v36  ;;  %v3882_v37 = vld [vmem:[%s4863_s1 + $0x500] sm:$0xff]  ;;  %v3975_v36 = vld [vmem:[%s4863_s1 + $0x7e8] sm:$0xff] }
  0x95   :  { %2400 = vmatpush.bf16.msra.mxu3 %v3877_v38  ;;  %v3890_v38 = vld [vmem:[%s4863_s1 + $0x540] sm:$0xff] }
  0x96   :  { %2362 = vmatpush.bf16.msra.mxu0 %v3852_v39  ;;  %v3898_v39 = vld [vmem:[%s4863_s1 + $0x580] sm:$0xff] }
  0x97   :  { %2375 = vmatpush.bf16.msra.mxu1 %v3860_v40  ;;  %v3906_v40 = vld [vmem:[%s4863_s1 + $0x5c0] sm:$0xff] }
  0x98   :  { %2388 = vmatpush.bf16.msra.mxu2 %v3868_v41  ;;  %v3921_v41 = vld [vmem:[%s4863_s1 + $0x638] sm:$0xff] }
  0x99   :  { %2401 = vmatpush.bf16.msra.mxu3 %v3876_v42  ;;  %v3929_v42 = vld [vmem:[%s4863_s1 + $0x678] sm:$0xff] }
  0x9a   :  { %2363 = vmatpush.bf16.msra.mxu0 %v3851_v43  ;;  %v3937_v43 = vld [vmem:[%s4863_s1 + $0x6b8] sm:$0xff] }
  0x9b   :  { %2376 = vmatpush.bf16.msra.mxu1 %v3859_v44  ;;  %v3945_v44 = vld [vmem:[%s4863_s1 + $0x6f8] sm:$0xff] }
  0x9c   :  { %2389 = vmatpush.bf16.msra.mxu2 %v3867_v45  ;;  %v3920_v45 = vld [vmem:[%s4863_s1 + $0x630] sm:$0xff] }
  0x9d   :  { %2402 = vmatpush.bf16.msra.mxu3 %v3875_v46  ;;  %v3928_v46 = vld [vmem:[%s4863_s1 + $0x670] sm:$0xff] }
  0x9e   :  { %2364 = vmatpush.bf16.msra.mxu0 %v3850_v47  ;;  %v2158_v4 = vpop.f32.mrf.mxu0  ;;  %v3936_v47 = vld [vmem:[%s4863_s1 + $0x6b0] sm:$0xff] }
  0x9f   :  { %2377 = vmatpush.bf16.msra.mxu1 %v3858_v48  ;;  %v2159_v7 = vadd.f32 %v3987_v1, %v2158_v4  ;;  %v2171_v8 = vpop.f32.mrf.mxu1  ;;  %v3944_v48 = vld [vmem:[%s4863_s1 + $0x6f0] sm:$0xff] }
  0xa0   :  { %2390 = vmatpush.bf16.msra.mxu2 %v3866_v49  ;;  %v3919_v49 = vld [vmem:[%s4863_s1 + $0x628] sm:$0xff] }
  0xa1   :  { %2403 = vmatpush.bf16.msra.mxu3 %v3874_v50  ;;  %2365 = vmatmul.bf16.vlgmr.msra.gmra.mxu0 %v563_v55  ;;  %v2172_v11 = vadd.f32 %v2171_v8, %v2159_v7  ;;  %v3927_v50 = vld [vmem:[%s4863_s1 + $0x668] sm:$0xff]  ;;  %v3926_v55 = vld [vmem:[%s4863_s1 + $0x660] sm:$0xff] }
  0xa2   :  { %2409 = vmatpush.bf16.msrb.mxu0 %v3889_v51  ;;  %2378 = vmatmul.bf16.vlgmr.msra.gmra.mxu1 %v564_v57  ;;  %v3935_v51 = vld [vmem:[%s4863_s1 + $0x6a8] sm:$0xff] }
  0xa3   :  { %2422 = vmatpush.bf16.msrb.mxu1 %v3897_v52  ;;  %2391 = vmatmul.bf16.vlgmr.msra.gmra.mxu2 %v565_v56  ;;  %v3943_v52 = vld [vmem:[%s4863_s1 + $0x6e8] sm:$0xff] }
  0xa4   :  { %2435 = vmatpush.bf16.msrb.mxu2 %v3905_v53  ;;  %2404 = vmatmul.bf16.vlgmr.msra.gmra.mxu3 %v566_v58  ;;  %v3934_v58 = vld [vmem:[%s4863_s1 + $0x6a0] sm:$0xff] }
  0xa5   :  { %2448 = vmatpush.bf16.msrb.mxu3 %v3913_v54  ;;  %v3918_v54 = vld [vmem:[%s4863_s1 + $0x620] sm:$0xff] }
  0xa6   :  { %2410 = vmatpush.bf16.msrb.mxu0 %v3888_v59  ;;  %v2184_v16 = vpop.f32.mrf.mxu2  ;;  %v2160_v19 = vpop.f32.mrf.mxu0  ;;  %v3942_v59 = vld [vmem:[%s4863_s1 + $0x6e0] sm:$0xff] }
  0xa7   :  { %2423 = vmatpush.bf16.msrb.mxu1 %v3896_v60  ;;  %v2185_v17 = vadd.f32 %v2184_v16, %v2172_v11  ;;  %v2197_v18 = vpop.f32.mrf.mxu3  ;;  %v2173_v23 = vpop.f32.mrf.mxu1  ;;  %v3915_v11 = vld [vmem:[%s4863_s1 + $0x608] sm:$0xff]  ;;  %v3930_v19 = vld [vmem:[%s4863_s1 + $0x680] sm:$0xff] }
  0xa8   :  { %2436 = vmatpush.bf16.msrb.mxu2 %v3904_v61  ;;  %v3917_v61 = vld [vmem:[%s4863_s1 + $0x618] sm:$0xff] }
  0xa9   :  { %2449 = vmatpush.bf16.msrb.mxu3 %v3912_v62  ;;  %v4604_v22 = vadd.f32 %v2197_v18, %v2185_v17  ;;  %v3925_v62 = vld [vmem:[%s4863_s1 + $0x658] sm:$0xff]  ;;  %v3914_v17 = vld [vmem:[%s4863_s1 + $0x600] sm:$0xff] }
  0xaa   :  { %2411 = vmatpush.bf16.msrb.mxu0 %v3887_v63  ;;  %v3933_v63 = vld [vmem:[%s4863_s1 + $0x698] sm:$0xff]  ;;  %v3922_v18 = vld [vmem:[%s4863_s1 + $0x640] sm:$0xff] }
  0xab   :  { %2424 = vmatpush.bf16.msrb.mxu1 %v3895_v0  ;;  %v3941_v0 = vld [vmem:[%s4863_s1 + $0x6d8] sm:$0xff] }
  0xac   :  { %2437 = vmatpush.bf16.msrb.mxu2 %v3903_v2  ;;  %v3969_v23 = vld [vmem:[%s4863_s1 + $0x7b8] sm:$0xff] }
  0xad   :  { %2450 = vmatpush.bf16.msrb.mxu3 %v3911_v3 }
  0xae   :  { %2412 = vmatpush.bf16.msrb.mxu0 %v3886_v5  ;;  %v2186_v32 = vpop.f32.mrf.mxu2  ;;  %v3916_v5 = vld [vmem:[%s4863_s1 + $0x610] sm:$0xff] }
  0xaf   :  { %2425 = vmatpush.bf16.msrb.mxu1 %v3894_v6  ;;  %v2199_v35 = vpop.f32.mrf.mxu3  ;;  %v3924_v6 = vld [vmem:[%s4863_s1 + $0x650] sm:$0xff] }
  0xb0   :  { %2438 = vmatpush.bf16.msrb.mxu2 %v3902_v9  ;;  %v3932_v9 = vld [vmem:[%s4863_s1 + $0x690] sm:$0xff]  ;;  %v3967_v35 = vld [vmem:[%s4863_s1 + $0x7a8] sm:$0xff] }
  0xb1   :  { %2451 = vmatpush.bf16.msrb.mxu3 %v3910_v10  ;;  %v3940_v10 = vld [vmem:[%s4863_s1 + $0x6d0] sm:$0xff] }
  0xb2   :  { %2413 = vmatpush.bf16.msrb.mxu0 %v3885_v12  ;;  %v3923_v12 = vld [vmem:[%s4863_s1 + $0x648] sm:$0xff]  ;;  %v3976_v32 = vld [vmem:[%s4863_s1 + $0x7f0] sm:$0xff] }
  0xb3   :  { %2426 = vmatpush.bf16.msrb.mxu1 %v3893_v13  ;;  %v3931_v13 = vld [vmem:[%s4863_s1 + $0x688] sm:$0xff] }
  0xb4   :  { %2439 = vmatpush.bf16.msrb.mxu2 %v3901_v14  ;;  %v3939_v14 = vld [vmem:[%s4863_s1 + $0x6c8] sm:$0xff] }
  0xb5   :  { %2452 = vmatpush.bf16.msrb.mxu3 %v3909_v15 }
  0xb6   :  { %2414 = vmatpush.bf16.msrb.mxu0 %v3884_v20  ;;  %v3938_v20 = vld [vmem:[%s4863_s1 + $0x6c0] sm:$0xff] }
  0xb7   :  { %2427 = vmatpush.bf16.msrb.mxu1 %v3892_v21  ;;  %v3953_v21 = vld [vmem:[%s4863_s1 + $0x738] sm:$0xff] }
  0xb8   :  { %2440 = vmatpush.bf16.msrb.mxu2 %v3900_v24  ;;  %v3977_v24 = vld [vmem:[%s4863_s1 + $0x7f8] sm:$0xff] }
  0xb9   :  { %2453 = vmatpush.bf16.msrb.mxu3 %v3908_v25  ;;  %v573_v25 = vld [vmem:[#allocation1] sm:$0xff] }
  0xba   :  { %2415 = vmatpush.bf16.msrb.mxu0 %v3883_v26  ;;  %v575_v26 = vld [vmem:[#allocation1 + $0x12] sm:$0xff] }
  0xbb   :  { %2428 = vmatpush.bf16.msrb.mxu1 %v3891_v27  ;;  %v574_v27 = vld [vmem:[#allocation1 + $0x9] sm:$0xff] }
  0xbc   :  { %2441 = vmatpush.bf16.msrb.mxu2 %v3899_v28  ;;  %v576_v28 = vld [vmem:[#allocation1 + $0x1b] sm:$0xff] }
  0xbd   :  { %2454 = vmatpush.bf16.msrb.mxu3 %v3907_v29  ;;  %v3952_v29 = vld [vmem:[%s4863_s1 + $0x730] sm:$0xff] }
  0xbe   :  { %2416 = vmatpush.bf16.msrb.mxu0 %v3882_v37  ;;  %v2210_v53 = vpop.f32.mrf.mxu0 }
  0xbf   :  { %2429 = vmatpush.bf16.msrb.mxu1 %v3890_v38  ;;  %v2211_v56 = vadd.f32 %v2210_v53, %v4604_v22  ;;  %v2223_v57 = vpop.f32.mrf.mxu1  ;;  %v3961_v22 = vld [vmem:[%s4863_s1 + $0x778] sm:$0xff] }
  0xc0   :  { %2442 = vmatpush.bf16.msrb.mxu2 %v3898_v39  ;;  %v3950_v39 = vld [vmem:[%s4863_s1 + $0x720] sm:$0xff] }
  0xc1   :  { %2455 = vmatpush.bf16.msrb.mxu3 %v3906_v40  ;;  %2417 = vmatmul.bf16.vlgmr.msrb.gmra.mxu0 %v567_v30  ;;  %v2224_v60 = vadd.f32 %v2223_v57, %v2211_v56  ;;  %v3960_v30 = vld [vmem:[%s4863_s1 + $0x770] sm:$0xff]  ;;  %v3958_v40 = vld [vmem:[%s4863_s1 + $0x760] sm:$0xff] }
  0xc2   :  { %2461 = vmatpush.bf16.msra.mxu0 %v3921_v41  ;;  %2430 = vmatmul.bf16.vlgmr.msrb.gmra.mxu1 %v568_v33  ;;  %v3951_v33 = vld [vmem:[%s4863_s1 + $0x728] sm:$0xff]  ;;  %v3964_v57 = vld [vmem:[%s4863_s1 + $0x790] sm:$0xff] }
  0xc3   :  { %2474 = vmatpush.bf16.msra.mxu1 %v3929_v42  ;;  %2443 = vmatmul.bf16.vlgmr.msrb.gmra.mxu2 %v569_v31  ;;  %v3968_v31 = vld [vmem:[%s4863_s1 + $0x7b0] sm:$0xff]  ;;  %v3966_v42 = vld [vmem:[%s4863_s1 + $0x7a0] sm:$0xff] }
  0xc4   :  { %2487 = vmatpush.bf16.msra.mxu2 %v3937_v43  ;;  %2456 = vmatmul.bf16.vlgmr.msrb.gmra.mxu3 %v570_v34  ;;  %v3959_v34 = vld [vmem:[%s4863_s1 + $0x768] sm:$0xff]  ;;  %v3974_v43 = vld [vmem:[%s4863_s1 + $0x7e0] sm:$0xff] }
  0xc5   :  { %2500 = vmatpush.bf16.msra.mxu3 %v3945_v44 }
  0xc6   :  { %2462 = vmatpush.bf16.msra.mxu0 %v3920_v45  ;;  %v2236_v1 = vpop.f32.mrf.mxu2  ;;  %v2212_v4 = vpop.f32.mrf.mxu0  ;;  %v3949_v45 = vld [vmem:[%s4863_s1 + $0x718] sm:$0xff] }
  0xc7   :  { %2475 = vmatpush.bf16.msra.mxu1 %v3928_v46  ;;  %v2237_v2 = vadd.f32 %v2236_v1, %v2224_v60  ;;  %v2249_v3 = vpop.f32.mrf.mxu3  ;;  %v2225_v8 = vpop.f32.mrf.mxu1  ;;  %v3957_v46 = vld [vmem:[%s4863_s1 + $0x758] sm:$0xff]  ;;  %v3955_v60 = vld [vmem:[%s4863_s1 + $0x748] sm:$0xff]  ;;  %v3946_v1 = vld [vmem:[%s4863_s1 + $0x700] sm:$0xff] }
  0xc8   :  { %2488 = vmatpush.bf16.msra.mxu2 %v3936_v47  ;;  %v3965_v47 = vld [vmem:[%s4863_s1 + $0x798] sm:$0xff]  ;;  %v3970_v4 = vld [vmem:[%s4863_s1 + $0x7c0] sm:$0xff] }
  0xc9   :  { %2501 = vmatpush.bf16.msra.mxu3 %v3944_v48  ;;  %v2250_v7 = vadd.f32 %v2249_v3, %v2237_v2  ;;  %v3973_v48 = vld [vmem:[%s4863_s1 + $0x7d8] sm:$0xff]  ;;  %v3954_v2 = vld [vmem:[%s4863_s1 + $0x740] sm:$0xff] }
  0xca   :  { %2463 = vmatpush.bf16.msra.mxu0 %v3919_v49  ;;  %v3962_v3 = vld [vmem:[%s4863_s1 + $0x780] sm:$0xff] }
  0xcb   :  { %2476 = vmatpush.bf16.msra.mxu1 %v3927_v50  ;;  %v580_v8 = vld [vmem:[#allocation1 + $0x3f] sm:$0xff] }
  0xcc   :  { %2489 = vmatpush.bf16.msra.mxu2 %v3935_v51 }
  0xcd   :  { %2502 = vmatpush.bf16.msra.mxu3 %v3943_v52 }
  0xce   :  { %2464 = vmatpush.bf16.msra.mxu0 %v3918_v54  ;;  %v2238_v15 = vpop.f32.mrf.mxu2  ;;  %v3948_v54 = vld [vmem:[%s4863_s1 + $0x710] sm:$0xff] }
  0xcf   :  { %2477 = vmatpush.bf16.msra.mxu1 %v3926_v55  ;;  %v2251_v16 = vpop.f32.mrf.mxu3  ;;  %v3956_v55 = vld [vmem:[%s4863_s1 + $0x750] sm:$0xff] }
  0xd0   :  { %2490 = vmatpush.bf16.msra.mxu2 %v3934_v58  ;;  %v3972_v58 = vld [vmem:[%s4863_s1 + $0x7d0] sm:$0xff] }
  0xd1   :  { %2503 = vmatpush.bf16.msra.mxu3 %v3942_v59  ;;  %v3947_v59 = vld [vmem:[%s4863_s1 + $0x708] sm:$0xff] }
  0xd2   :  { %2465 = vmatpush.bf16.msra.mxu0 %v3917_v61  ;;  %v3963_v61 = vld [vmem:[%s4863_s1 + $0x788] sm:$0xff] }
  0xd3   :  { %2478 = vmatpush.bf16.msra.mxu1 %v3925_v62  ;;  %v3971_v62 = vld [vmem:[%s4863_s1 + $0x7c8] sm:$0xff] }
  0xd4   :  { %2491 = vmatpush.bf16.msra.mxu2 %v3933_v63 }
  0xd5   :  { %2504 = vmatpush.bf16.msra.mxu3 %v3941_v0 }
  0xd6   :  { %2466 = vmatpush.bf16.msra.mxu0 %v3916_v5  ;;  %v577_v5 = vld [vmem:[#allocation1 + $0x24] sm:$0xff] }
  0xd7   :  { %2479 = vmatpush.bf16.msra.mxu1 %v3924_v6  ;;  %v578_v6 = vld [vmem:[#allocation1 + $0x2d] sm:$0xff] }
  0xd8   :  { %2492 = vmatpush.bf16.msra.mxu2 %v3932_v9 }
  0xd9   :  { %2505 = vmatpush.bf16.msra.mxu3 %v3940_v10 }
  0xda   :  { %2467 = vmatpush.bf16.msra.mxu0 %v3915_v11 }
  0xdb   :  { %2480 = vmatpush.bf16.msra.mxu1 %v3923_v12 }
  0xdc   :  { %2493 = vmatpush.bf16.msra.mxu2 %v3931_v13 }
  0xdd   :  { %2506 = vmatpush.bf16.msra.mxu3 %v3939_v14 }
  0xde   :  { %2468 = vmatpush.bf16.msra.mxu0 %v3914_v17  ;;  %v2262_v37 = vpop.f32.mrf.mxu0 }
  0xdf   :  { %2481 = vmatpush.bf16.msra.mxu1 %v3922_v18  ;;  %v2263_v38 = vadd.f32 %v2262_v37, %v2250_v7  ;;  %v2275_v41 = vpop.f32.mrf.mxu1  ;;  %v579_v7 = vld [vmem:[#allocation1 + $0x36] sm:$0xff] }
  0xe0   :  { %2494 = vmatpush.bf16.msra.mxu2 %v3930_v19  ;;  %v3985_v37 = vld [vmem:[%s4865_s3 + $0x38] sm:$0xff] }
  0xe1   :  { %2507 = vmatpush.bf16.msra.mxu3 %v3938_v20  ;;  %2469 = vmatmul.bf16.vlgmr.msra.gmra.mxu0 %v573_v25  ;;  %v2276_v44 = vadd.f32 %v2275_v41, %v2263_v38  ;;  %v3983_v41 = vld [vmem:[%s4865_s3 + $0x28] sm:$0xff] }
  0xe2   :  { %2513 = vmatpush.bf16.msrb.mxu0 %v3953_v21  ;;  %2482 = vmatmul.bf16.vlgmr.msra.gmra.mxu1 %v574_v27 }
  0xe3   :  { %2526 = vmatpush.bf16.msrb.mxu1 %v3961_v22  ;;  %2495 = vmatmul.bf16.vlgmr.msra.gmra.mxu2 %v575_v26 }
  0xe4   :  { %2539 = vmatpush.bf16.msrb.mxu2 %v3969_v23  ;;  %2508 = vmatmul.bf16.vlgmr.msra.gmra.mxu3 %v576_v28 }
  0xe5   :  { %2552 = vmatpush.bf16.msrb.mxu3 %v3977_v24 }
  0xe6   :  { %2514 = vmatpush.bf16.msrb.mxu0 %v3952_v29  ;;  %v2288_v49 = vpop.f32.mrf.mxu2  ;;  %v2264_v52 = vpop.f32.mrf.mxu0 }
  0xe7   :  { %2527 = vmatpush.bf16.msrb.mxu1 %v3960_v30  ;;  %v2289_v50 = vadd.f32 %v2288_v49, %v2276_v44  ;;  %v2301_v51 = vpop.f32.mrf.mxu3  ;;  %v2277_v56 = vpop.f32.mrf.mxu1  ;;  %v3982_v44 = vld [vmem:[%s4865_s3 + $0x20] sm:$0xff]  ;;  %v3979_v49 = vld [vmem:[%s4865_s3 + $0x8] sm:$0xff] }
  0xe8   :  { %2540 = vmatpush.bf16.msrb.mxu2 %v3968_v31 }
  0xe9   :  { %2553 = vmatpush.bf16.msrb.mxu3 %v3976_v32  ;;  %v2302_v53 = vadd.f32 %v2301_v51, %v2289_v50 }
  0xea   :  { %2515 = vmatpush.bf16.msrb.mxu0 %v3951_v33 }
  0xeb   :  { %2528 = vmatpush.bf16.msrb.mxu1 %v3959_v34 }
  0xec   :  { %2541 = vmatpush.bf16.msrb.mxu2 %v3967_v35 }
  0xed   :  { %2554 = vmatpush.bf16.msrb.mxu3 %v3975_v36 }
  0xee   :  { %2516 = vmatpush.bf16.msrb.mxu0 %v3950_v39  ;;  %v2290_v63 = vpop.f32.mrf.mxu2 }
  0xef   :  { %2529 = vmatpush.bf16.msrb.mxu1 %v3958_v40  ;;  %v2303_v0 = vpop.f32.mrf.mxu3  ;;  %v3984_v40 = vld [vmem:[%s4865_s3 + $0x30] sm:$0xff] }
  0xf0   :  { %2542 = vmatpush.bf16.msrb.mxu2 %v3966_v42 }
  0xf1   :  { %2555 = vmatpush.bf16.msrb.mxu3 %v3974_v43 }
  0xf2   :  { %2517 = vmatpush.bf16.msrb.mxu0 %v3949_v45  ;;  %v3981_v45 = vld [vmem:[%s4865_s3 + $0x18] sm:$0xff] }
  0xf3   :  { %2530 = vmatpush.bf16.msrb.mxu1 %v3957_v46 }
  0xf4   :  { %2543 = vmatpush.bf16.msrb.mxu2 %v3965_v47  ;;  %v3980_v47 = vld [vmem:[%s4865_s3 + $0x10] sm:$0xff] }
  0xf5   :  { %2556 = vmatpush.bf16.msrb.mxu3 %v3973_v48 }
  0xf6   :  { %2518 = vmatpush.bf16.msrb.mxu0 %v3948_v54  ;;  %v3978_v54 = vld [vmem:[%s4865_s3] sm:$0xff] }
  0xf7   :  { %2531 = vmatpush.bf16.msrb.mxu1 %v3956_v55 }
  0xf8   :  { %2544 = vmatpush.bf16.msrb.mxu2 %v3964_v57 }
  0xf9   :  { %2557 = vmatpush.bf16.msrb.mxu3 %v3972_v58 }
  0xfa   :  { %2519 = vmatpush.bf16.msrb.mxu0 %v3947_v59 }
  0xfb   :  { %2532 = vmatpush.bf16.msrb.mxu1 %v3955_v60 }
  0xfc   :  { %2545 = vmatpush.bf16.msrb.mxu2 %v3963_v61 }
  0xfd   :  { %2558 = vmatpush.bf16.msrb.mxu3 %v3971_v62 }
  0xfe   :  { %2520 = vmatpush.bf16.msrb.mxu0 %v3946_v1  ;;  %v2314_v9 = vpop.f32.mrf.mxu0 }
  0xff   :  { %2533 = vmatpush.bf16.msrb.mxu1 %v3954_v2  ;;  %v2315_v10 = vadd.f32 %v2314_v9, %v2302_v53  ;;  %v2327_v11 = vpop.f32.mrf.mxu1 }
 0x100   :  { %2546 = vmatpush.bf16.msrb.mxu2 %v3962_v3 }
 0x101   :  { %2559 = vmatpush.bf16.msrb.mxu3 %v3970_v4  ;;  %2521 = vmatmul.bf16.vlgmr.msrb.gmra.mxu0 %v577_v5  ;;  %v2328_v12 = vadd.f32 %v2327_v11, %v2315_v10 }
 0x102   :  { %2534 = vmatmul.bf16.vlgmr.msrb.gmra.mxu1 %v578_v6  ;;  %2635 = vmatpush.bf16.msra.mxu0 %v3985_v37 }
 0x103   :  { %2547 = vmatmul.bf16.vlgmr.msrb.gmra.mxu2 %v579_v7 }
 0x104   :  { %2560 = vmatmul.bf16.vlgmr.msrb.gmra.mxu3 %v580_v8 }
 0x106   :  { %v2340_v13 = vpop.f32.mrf.mxu2  ;;  %v2316_v16 = vpop.f32.mrf.mxu0  ;;  %2636 = vmatpush.bf16.msra.mxu0 %v3984_v40 }
 0x107   :  { %v2341_v14 = vadd.f32 %v2340_v13, %v2328_v12  ;;  %v2353_v15 = vpop.f32.mrf.mxu3  ;;  %v2329_v18 = vpop.f32.mrf.mxu1 }
 0x109   :  { %v2354_v17 = vadd.f32 %v2353_v15, %v2341_v14  ;;  %v3988_v15 = vld [vmem:[%s4866_s4] ss:$0 sm:$0xff] }
 0x10a   :  { %2637 = vmatpush.bf16.msra.mxu0 %v3983_v41 }
 0x10e   :  { %v2342_v19 = vpop.f32.mrf.mxu2  ;;  %2638 = vmatpush.bf16.msra.mxu0 %v3982_v44 }
 0x10f   :  { %v2355_v20 = vpop.f32.mrf.mxu3 }
 0x112   :  { %2639 = vmatpush.bf16.msra.mxu0 %v3981_v45 }
 0x116   :  { %2640 = vmatpush.bf16.msra.mxu0 %v3980_v47 }
 0x11a   :  { %2641 = vmatpush.bf16.msra.mxu0 %v3979_v49 }
 0x11e   :  { %v2366_v21 = vpop.f32.mrf.mxu0  ;;  %2642 = vmatpush.bf16.msra.mxu0 %v3978_v54 }
 0x11f   :  { %v2367_v22 = vadd.f32 %v2366_v21, %v2354_v17  ;;  %v2379_v23 = vpop.f32.mrf.mxu1 }
 0x121   :  { %v2380_v24 = vadd.f32 %v2379_v23, %v2367_v22 }
 0x126   :  { %v2392_v25 = vpop.f32.mrf.mxu2  ;;  %v2368_v28 = vpop.f32.mrf.mxu0 }
 0x127   :  { %v2393_v26 = vadd.f32 %v2392_v25, %v2380_v24  ;;  %v2405_v27 = vpop.f32.mrf.mxu3  ;;  %v2381_v30 = vpop.f32.mrf.mxu1 }
 0x129   :  { %v2406_v29 = vadd.f32 %v2405_v27, %v2393_v26 }
 0x12e   :  { %v2394_v31 = vpop.f32.mrf.mxu2 }
 0x12f   :  { %v2407_v32 = vpop.f32.mrf.mxu3 }
 0x13e   :  { %v2418_v33 = vpop.f32.mrf.mxu0 }
 0x13f   :  { %v2431_v34 = vpop.f32.mrf.mxu1  ;;  %v2419_v51 = vadd.f32 %v2418_v33, %v2406_v29 }
 0x141   :  { %v2432_v56 = vadd.f32 %v2431_v34, %v2419_v51 }
 0x146   :  { %v2444_v35 = vpop.f32.mrf.mxu2  ;;  %v2420_v38 = vpop.f32.mrf.mxu0 }
 0x147   :  { %v2457_v36 = vpop.f32.mrf.mxu3  ;;  %v2433_v39 = vpop.f32.mrf.mxu1  ;;  %v2445_v57 = vadd.f32 %v2444_v35, %v2432_v56 }
 0x149   :  { %v2458_v60 = vadd.f32 %v2457_v36, %v2445_v57 }
 0x14e   :  { %v2446_v42 = vpop.f32.mrf.mxu2 }
 0x14f   :  { %v2459_v43 = vpop.f32.mrf.mxu3 }
 0x15e   :  { %v2470_v46 = vpop.f32.mrf.mxu0 }
 0x15f   :  { %v2483_v48 = vpop.f32.mrf.mxu1  ;;  %v2471_v61 = vadd.f32 %v2470_v46, %v2458_v60 }
 0x161   :  { %v2484_v62 = vadd.f32 %v2483_v48, %v2471_v61 }
 0x166   :  { %v2496_v50 = vpop.f32.mrf.mxu2  ;;  %v2472_v53 = vpop.f32.mrf.mxu0 }
 0x167   :  { %v2509_v52 = vpop.f32.mrf.mxu3  ;;  %v2485_v55 = vpop.f32.mrf.mxu1  ;;  %v2497_v63 = vadd.f32 %v2496_v50, %v2484_v62 }
 0x169   :  { %v2510_v0 = vadd.f32 %v2509_v52, %v2497_v63 }
 0x16e   :  { %v2498_v58 = vpop.f32.mrf.mxu2 }
 0x16f   :  { %v2511_v59 = vpop.f32.mrf.mxu3 }
 0x17e   :  { %v2522_v1 = vpop.f32.mrf.mxu0 }
 0x17f   :  { %v2535_v2 = vpop.f32.mrf.mxu1  ;;  %v2523_v3 = vadd.f32 %v2522_v1, %v2510_v0 }
 0x181   :  { %v2536_v4 = vadd.f32 %v2535_v2, %v2523_v3 }
 0x186   :  { %v2548_v5 = vpop.f32.mrf.mxu2  ;;  %v2524_v8 = vpop.f32.mrf.mxu0 }
 0x187   :  { %v2561_v6 = vpop.f32.mrf.mxu3  ;;  %v2549_v7 = vadd.f32 %v2548_v5, %v2536_v4  ;;  %v2537_v9 = vpop.f32.mrf.mxu1 }
 0x189   :  { %v2562_v10 = vadd.f32 %v2561_v6, %v2549_v7 }
 0x18b   :  { %v2565_v11 = vmax.f32 %v2562_v10, 0.0 }
 0x18d   :  { %v2566_v12 = vpack.c.bf16 %v2565_v11, %v2565_v11 }
 0x18e   :  { %v2550_v13 = vpop.f32.mrf.mxu2 }
 0x18f   :  { %v2563_v14 = vpop.f32.mrf.mxu3  ;;  %2643 = vmatmul.bf16.vlgmr.msra.gmra.mxu0 %v2566_v12 }
 0x20c   :  { %v2644_v16 = vpop.f32.mrf.mxu0 }
 0x20d   :  { %v2645_v17 = vadd.f32 %v3988_v15, %v2644_v16 }
 0x20f   :  { %2649 = vst.msk [vmem:[#allocation2] sm:$0x3] %vm2648_vm0, %v2645_v17 }
 0x210   :  { %2660 = dma.vmem_to_hbm [thread:$0]  %s2656_s19, 32, %s2658_s22, [#allocation3]  }
 0x214   :  { %v2646_v18 = vpop.f32.mrf.mxu0 }
 0x215   :  { %4013 = dma.done.wait [#allocation3], 32  }
 0x216   :  { %4014 = vsyncadd [#allocation3], 4294967264 }
 0x217   :  { %2665 = vsyncpa [#allocation3], 1 }

</bundles_post_ra>
